<compile_context>
chip_gen: v7x
topology: tpu7x:2x2x1
jax: 0.10.0
libtpu: 0.0.40
codegen_flags: <defaults>
</compile_context>

<pallas_src>
import functools
import math

import jax
import jax.numpy as jnp
from jax import lax
from jax.experimental import pallas as pl
from jax.experimental.pallas import tpu as pltpu

LRELU_SLOPE = 0.2
LN_EPS = 1e-6
CP = 128                      # padded channel (lane) width for all kernel I/O


def _leaky(x, slope=LRELU_SLOPE):
    return jnp.where(x > 0, x, slope * x)


def _round_up(x, m):
    return ((x + m - 1) // m) * m


def _tpu_budget():
    """(vmem_limit_bytes, input pipeline depth) per TPU generation."""
    try:
        cap = int(pltpu.get_tpu_info().vmem_capacity_bytes)
    except Exception:
        return 48 * 1024 * 1024, 2          # conservative default (fits v7x)
    if cap <= 64 * 1024 * 1024:             # v7x: 64 MiB VMEM per TensorCore
        return 48 * 1024 * 1024, 2
    return 96 * 1024 * 1024, 3              # v5e / v6e: 128 MiB per core


def _pick_tm(M16, tk, buf_depth, vmem_limit):
    """Largest M-tile (multiple of 16, dividing M16) whose pipelined working set
    fits the VMEM budget; capped so the parallel axis keeps >= 2 blocks
    (v7x has 2 TensorCores)."""
    fixed = tk * CP * 2 + 3 * CP * 4                     # weights + bias/LN rows
    per_row = buf_depth * tk * 2 + 2 * CP * 2 + CP * 4   # patches + out + acc
    avail = max(vmem_limit * 3 // 5 - fixed, per_row * 16)
    tm_cap = min(1024, max(16, (avail // per_row) // 16 * 16))
    if M16 >= 32:
        tm_cap = min(tm_cap, max(16, (M16 // 2) // 16 * 16))
    tm, t = 16, 16
    limit = min(tm_cap, M16)
    while t <= limit:
        if M16 % t == 0:
            tm = t
        t += 16
    return tm


# ----------------------------------------------------------------------------
# Fused conv (im2col matmul) + bias + channels-first LayerNorm + LeakyReLU
# ----------------------------------------------------------------------------
def _epilogue(acc, b_ref, g_ref, be_ref, has_bias, has_ln, cout, out_dtype):
    if has_bias:
        acc = acc + b_ref[...]
    if has_ln:
        # PyTorch custom LayerNorm(data_format='channels_first'): normalize
        # over the channel dim at each spatial position.  Padded lanes
        # (>= cout) hold exact zeros (zero weight cols / bias), so only the
        # variance needs an explicit mask.
        inv_c = 1.0 / float(cout)
        mu = jnp.sum(acc, axis=-1, keepdims=True) * inv_c
        d = acc - mu
        lane = lax.broadcasted_iota(jnp.int32, (1, CP), 1)
        var = jnp.sum(jnp.where(lane < cout, d * d, 0.0),
                      axis=-1, keepdims=True) * inv_c
        acc = d * lax.rsqrt(var + LN_EPS) * g_ref[...] + be_ref[...]
    return _leaky(acc).astype(out_dtype)


def _make_conv_kernel_1shot(has_bias, has_ln, cout):
    # Full K contraction in a single jnp.dot: no K grid axis, no scratch.
    def kernel(p_ref, w_ref, b_ref, g_ref, be_ref, o_ref):
        acc = jnp.dot(p_ref[...], w_ref[...], preferred_element_type=jnp.float32)
        o_ref[...] = _epilogue(acc, b_ref, g_ref, be_ref,
                               has_bias, has_ln, cout, o_ref.dtype)
    return kernel


def _make_conv_kernel_ktiled(has_bias, has_ln, cout):
    # Fallback for very large K: K-reduction grid axis + f32 VMEM accumulator.
    def kernel(p_ref, w_ref, b_ref, g_ref, be_ref, o_ref, acc_ref):
        k = pl.program_id(1)

        @pl.when(k == 0)
        def _():
            acc_ref[...] = jnp.zeros_like(acc_ref)

        acc_ref[...] += jnp.dot(p_ref[...], w_ref[...],
                                preferred_element_type=jnp.float32)

        @pl.when(k == pl.num_programs(1) - 1)
        def _():
            o_ref[...] = _epilogue(acc_ref[...], b_ref, g_ref, be_ref,
                                   has_bias, has_ln, cout, o_ref.dtype)
    return kernel


def _im2col(x, kw, stride, pad):
    """x: (N, D, H, W, C) -> (M16, kw^3*C) bf16 patches, M16 = round_up(M, 16)."""
    N, D, H, W, C = x.shape
    xp = jnp.pad(x, ((0, 0), (pad, pad), (pad, pad), (pad, pad), (0, 0)))
    OD = (D + 2 * pad - kw) // stride + 1
    OH = (H + 2 * pad - kw) // stride + 1
    OW = (W + 2 * pad - kw) // stride + 1
    cols = []
    for kd in range(kw):
        for kh in range(kw):
            for kv in range(kw):
                cols.append(
                    xp[:, kd:kd + stride * OD:stride,
                       kh:kh + stride * OH:stride,
                       kv:kv + stride * OW:stride, :])
    patches = jnp.stack(cols, axis=-2)            # (N, OD, OH, OW, kw^3, C)
    M = N * OD * OH * OW
    K = kw ** 3 * C
    patches = patches.reshape(M, K)
    M16 = _round_up(M, 16)
    if M16 != M:                                   # bounded to <16 extra rows
        patches = jnp.pad(patches, ((0, M16 - M), (0, 0)))
    return patches, M, (N, OD, OH, OW)


def conv3d_ln_lrelu(x, w, b, g, beta, *, kw, stride, pad, has_bias, has_ln, cout):
    """Fused Conv3d (+bias) (+channels-first LayerNorm) + LeakyReLU(0.2).

    x: (N, D, H, W, Cin) bf16;  w: (kw^3*Cin, 128) bf16 (cols >= cout are 0);
    weight rows ordered (kd, kh, kw, cin)."""
    vmem_limit, buf_depth = _tpu_budget()
    patches, M, (N, OD, OH, OW) = _im2col(x.astype(jnp.bfloat16), kw, stride, pad)
    M16, K = patches.shape

    # Single-shot path whenever the full weight panel comfortably fits VMEM.
    fused_k = (K * CP * 2) <= vmem_limit // 6
    if fused_k:
        tk = K
    else:
        tk = K
        for cand in (4096, 2048, 1024, 512, 256, 128):
            if K % cand == 0:
                tk = cand
                break
    tm = _pick_tm(M16, tk, buf_depth, vmem_limit)
    n_blocks = M16 // tm

    ce = pl.CostEstimate(
        flops=2 * M16 * K * CP, transcendentals=0,
        bytes_accessed=(M16 * K + K * CP + M16 * CP) * 2 + 3 * CP * 4)

    if fused_k:
        # Deeper input pipelining on v5e/v6e where VMEM is plentiful.
        if buf_depth > 2 and n_blocks >= buf_depth:
            p_spec = pl.BlockSpec((tm, K), lambda i: (i, 0),
                                  pipeline_mode=pl.Buffered(buf_depth))
        else:
            p_spec = pl.BlockSpec((tm, K), lambda i: (i, 0))
        out = pl.pallas_call(
            _make_conv_kernel_1shot(has_bias, has_ln, cout),
            out_shape=jax.ShapeDtypeStruct((M16, CP), jnp.bfloat16),
            grid=(n_blocks,),
            in_specs=[
                p_spec,                                        # patches
                pl.BlockSpec((K, CP), lambda i: (0, 0)),       # full weight panel
                pl.BlockSpec((1, CP), lambda i: (0, 0)),       # bias
                pl.BlockSpec((1, CP), lambda i: (0, 0)),       # ln gamma
                pl.BlockSpec((1, CP), lambda i: (0, 0)),       # ln beta
            ],
            out_specs=pl.BlockSpec((tm, CP), lambda i: (i, 0)),
            compiler_params=pltpu.CompilerParams(
                dimension_semantics=("parallel",),
                vmem_limit_bytes=vmem_limit),
            cost_estimate=ce,
        )(patches, w, b, g, beta)
    else:
        out = pl.pallas_call(
            _make_conv_kernel_ktiled(has_bias, has_ln, cout),
            out_shape=jax.ShapeDtypeStruct((M16, CP), jnp.bfloat16),
            grid=(n_blocks, K // tk),
            in_specs=[
                pl.BlockSpec((tm, tk), lambda i, k: (i, k)),
                pl.BlockSpec((tk, CP), lambda i, k: (k, 0)),
                pl.BlockSpec((1, CP), lambda i, k: (0, 0)),
                pl.BlockSpec((1, CP), lambda i, k: (0, 0)),
                pl.BlockSpec((1, CP), lambda i, k: (0, 0)),
            ],
            out_specs=pl.BlockSpec((tm, CP), lambda i, k: (i, 0)),
            scratch_shapes=[pltpu.VMEM((tm, CP), jnp.float32)],
            compiler_params=pltpu.CompilerParams(
                dimension_semantics=("parallel", "arbitrary"),
                vmem_limit_bytes=vmem_limit),
            cost_estimate=ce,
        )(patches, w, b, g, beta)

    return out[:M, :cout].reshape(N, OD, OH, OW, cout)


# ----------------------------------------------------------------------------
# hyperAttnResBlock — fused per-sample kernel
# ----------------------------------------------------------------------------
def _make_hyper_kernel(p_true, c_true):
    scale = 1.0 / math.sqrt(float(c_true))

    def kernel(x_ref, w1_ref, b1_ref, g1_ref, w2_ref, b2_ref, g2_ref,
               wqkv_ref, wo_ref, o_ref):
        pp = x_ref.shape[1]
        x = x_ref[0]                              # (PP, CP) bf16
        xf = x.astype(jnp.float32)

        # hyper residual sub-block 1 (per-sample generated 1x1x1 conv weights)
        h = jnp.dot(x, w1_ref[0], preferred_element_type=jnp.float32) + b1_ref[0]
        xf = xf + g1_ref[...] * _leaky(h)

        # hyper residual sub-block 2
        h = jnp.dot(xf.astype(jnp.bfloat16), w2_ref[0],
                    preferred_element_type=jnp.float32) + b2_ref[0]
        xf = xf + g2_ref[...] * _leaky(h)

        # spatial self-attention (fused QKV, transpose-free q.k^T), residual.
        xb = xf.astype(jnp.bfloat16)
        qkv = jnp.dot(xb, wqkv_ref[...], preferred_element_type=jnp.float32)
        q = qkv[:, :CP].astype(jnp.bfloat16)
        kk = qkv[:, CP:2 * CP].astype(jnp.bfloat16)
        v = qkv[:, 2 * CP:].astype(jnp.bfloat16)
        logits = lax.dot_general(q, kk, (((1,), (1,)), ((), ())),
                                 preferred_element_type=jnp.float32) * scale
        col = lax.broadcasted_iota(jnp.int32, (pp, pp), 1)
        logits = jnp.where(col < p_true, logits, -1e30)   # mask padded keys
        m = jnp.max(logits, axis=-1, keepdims=True)
        p = jnp.exp(logits - m)
        a = p * pl.reciprocal(jnp.sum(p, axis=-1, keepdims=True), approx=True)
        ctx = jnp.dot(a.astype(jnp.bfloat16), v,
                      preferred_element_type=jnp.float32)
        h = jnp.dot(ctx.astype(jnp.bfloat16), wo_ref[...],
                    preferred_element_type=jnp.float32)
        # NOTE: padded query rows (>= p_true) hold garbage; the wrapper's
        # [:, :P] slice removes them — keep that slice coupled to this kernel.
        o_ref[...] = (xf + h)[None]

    return kernel


def hyper_attn_res_block(x5, s, hp):
    vmem_limit, _ = _tpu_budget()
    N, OD, OH, OW, C = x5.shape
    P = OD * OH * OW
    PP = _round_up(max(P, 16), 16)
    x = x5.reshape(N, P, C).astype(jnp.bfloat16)
    x = jnp.pad(x, ((0, 0), (0, PP - P), (0, CP - C)))

    def gen(we, be, ww, wb):
        # style -> per-sample 1x1x1 conv weights (hyper network); tiny, XLA.
        e = _leaky(s @ we + be)                    # (N, hyper_dim)
        W = (e @ ww).reshape(N, C, C)
        W = jnp.pad(W, ((0, 0), (0, CP - C), (0, CP - C))).astype(jnp.bfloat16)
        bvec = jnp.pad((e @ wb).reshape(N, 1, C), ((0, 0), (0, 0), (0, CP - C)))
        return W, bvec

    W1, b1 = gen(hp['we1'], hp['be1'], hp['ww1'], hp['wb1'])
    W2, b2 = gen(hp['we2'], hp['be2'], hp['ww2'], hp['wb2'])
    g1 = jnp.pad(hp['gamma1'].reshape(1, C), ((0, 0), (0, CP - C)))
    g2 = jnp.pad(hp['gamma2'].reshape(1, C), ((0, 0), (0, CP - C)))

    ce = pl.CostEstimate(
        flops=N * (4 * PP * CP * CP + 2 * PP * CP * 3 * CP
                   + 4 * PP * PP * CP + 2 * PP * CP * CP),
        transcendentals=N * PP * PP,
        bytes_accessed=(N * PP * CP * 2 * 2 + 2 * N * CP * CP * 2
                        + 4 * CP * CP * 2 + N * PP * CP * 4))

    out = pl.pallas_call(
        _make_hyper_kernel(P, C),
        out_shape=jax.ShapeDtypeStruct((N, PP, CP), jnp.float32),
        grid=(N,),
        in_specs=[
            pl.BlockSpec((1, PP, CP), lambda n: (n, 0, 0)),   # x (per sample)
            pl.BlockSpec((1, CP, CP), lambda n: (n, 0, 0)),   # W1 (per sample)
            pl.BlockSpec((1, 1, CP), lambda n: (n, 0, 0)),    # b1
            pl.BlockSpec((1, CP), lambda n: (0, 0)),          # gamma1
            pl.BlockSpec((1, CP, CP), lambda n: (n, 0, 0)),   # W2
            pl.BlockSpec((1, 1, CP), lambda n: (n, 0, 0)),    # b2
            pl.BlockSpec((1, CP), lambda n: (0, 0)),          # gamma2
            pl.BlockSpec((CP, 3 * CP), lambda n: (0, 0)),     # fused Wq|Wk|Wv
            pl.BlockSpec((CP, CP), lambda n: (0, 0)),         # Wo
        ],
        out_specs=pl.BlockSpec((1, PP, CP), lambda n: (n, 0, 0)),
        compiler_params=pltpu.CompilerParams(
            dimension_semantics=("parallel",),
            vmem_limit_bytes=vmem_limit),
        cost_estimate=ce,
    )(x, W1, b1, g1, W2, b2, g2, hp['wqkv'], hp['wo'])
    return out[:, :P, :C].reshape(N, OD, OH, OW, C)


# ----------------------------------------------------------------------------
# Parameter init + full forward
# ----------------------------------------------------------------------------
def init_params(key, args):
    c_in, ndf, n_layers, kw = (args['in_channels'], args['ndf'],
                               args['n_layers'], args['kw'])
    # (cin, cout, stride, has_bias, has_ln) — matches the PyTorch Sequential.
    layer_cfg = [(c_in, ndf, 2, True, False)]
    nf_mult = 1
    for n in range(1, n_layers):
        nf_prev, nf_mult = nf_mult, min(2 ** n, 8)
        layer_cfg.append((ndf * nf_prev, ndf * nf_mult, 2, False, True))
    nf_prev, nf_mult = nf_mult, min(2 ** n_layers, 8)
    layer_cfg.append((ndf * nf_prev, ndf * nf_mult, 1, False, True))

    keys = jax.random.split(key, len(layer_cfg) + 1)
    convs = []
    for k, (ci, co, _, has_bias, _) in zip(keys[:-1], layer_cfg):
        k_w, k_b = jax.random.split(k)
        Kdim = kw ** 3 * ci
        # Weight rows ordered (kd, kh, kw, cin); PyTorch Conv3d weights are
        # (cout, cin, kd, kh, kw) — importing real weights needs a transpose.
        w = jax.random.normal(k_w, (Kdim, co), jnp.float32) / jnp.sqrt(Kdim)
        b = (jax.random.normal(k_b, (1, co), jnp.float32) * 0.01
             if has_bias else jnp.zeros((1, co), jnp.float32))
        w_p = jnp.pad(w, ((0, 0), (0, CP - co))).astype(jnp.bfloat16)
        b_p = jnp.pad(b, ((0, 0), (0, CP - co)))
        # Fused LayerNorm statistics rely on padded lanes being exact zeros.
        if co < CP:
            assert float(jnp.max(jnp.abs(w_p[:, co:].astype(jnp.float32)))) == 0.0
            assert float(jnp.max(jnp.abs(b_p[:, co:]))) == 0.0
        convs.append(dict(
            w=w_p, b=b_p,
            g=jnp.pad(jnp.ones((1, co), jnp.float32), ((0, 0), (0, CP - co))),
            beta=jnp.zeros((1, CP), jnp.float32)))

    C = ndf * nf_mult
    sd, hd = args['style_dim'], args['hyper_conv_dim']
    lsiv = args['layer_scale_init_value']
    hk = jax.random.split(keys[-1], 10)

    def nrm(k, shape, fan_in):
        return jax.random.normal(k, shape, jnp.float32) / jnp.sqrt(fan_in)

    def pad_cc(w):
        return jnp.pad(w, ((0, CP - C), (0, CP - C)))

    wq, wk, wv, wo = (nrm(hk[i], (C, C), C) for i in range(6, 10))
    hyper = dict(
        we1=nrm(hk[0], (sd, hd), sd), be1=jnp.zeros((hd,), jnp.float32),
        ww1=nrm(hk[1], (hd, C * C), hd * C), wb1=nrm(hk[2], (hd, C), hd),
        gamma1=jnp.full((C,), lsiv, jnp.float32),
        we2=nrm(hk[3], (sd, hd), sd), be2=jnp.zeros((hd,), jnp.float32),
        ww2=nrm(hk[4], (hd, C * C), hd * C), wb2=nrm(hk[5], (hd, C), hd),
        gamma2=jnp.full((C,), lsiv, jnp.float32),
        wqkv=jnp.concatenate([pad_cc(wq), pad_cc(wk), pad_cc(wv)],
                             axis=1).astype(jnp.bfloat16),
        wo=pad_cc(wo).astype(jnp.bfloat16),
    )
    return dict(convs=convs, hyper=hyper), layer_cfg


def nlayer_discriminator(x, s, params, args, layer_cfg):
    """x: (N, D, H, W, Cin) channels-last; s: (N, style_dim)."""
    h = x.astype(jnp.bfloat16)
    for p, (_, co, stride, has_bias, has_ln) in zip(params['convs'], layer_cfg):
        h = conv3d_ln_lrelu(h, p['w'], p['b'], p['g'], p['beta'],
                            kw=args['kw'], stride=stride, pad=args['padw'],
                            has_bias=has_bias, has_ln=has_ln, cout=co)
    return hyper_attn_res_block(h, s, params['hyper'])


if __name__ == "__main__":
    args = dict(in_channels=4, ndf=8, n_layers=3, kw=4, padw=1,
                hyper_conv_dim=16, style_dim=16, layer_scale_init_value=1e-6)

    key = jax.random.PRNGKey(0)
    kx, ks, kp = jax.random.split(key, 3)
    N, D, H, W = 2, 16, 16, 16

    # PyTorch input would be NCDHW (2, 4, 16, 16, 16); kernel layout is NDHWC.
    x = jax.random.normal(kx, (N, D, H, W, args['in_channels']), jnp.float32)
    s = jax.random.normal(ks, (N, args['style_dim']), jnp.float32)

    params, layer_cfg = init_params(kp, args)
    fwd = jax.jit(functools.partial(nlayer_discriminator, params=params,
                                    args=args, layer_cfg=layer_cfg))

    out = jax.block_until_ready(fwd(x, s))

    final_c = args['ndf'] * min(2 ** args['n_layers'], 8)
    assert out.shape == (N, 1, 1, 1, final_c), out.shape
    assert bool(jnp.all(jnp.isfinite(out)))
    print("KERNEL_OK")
</pallas_src>

<mosaic_0001>
module attributes {stable_mosaic.version = 11 : i64} {
  func.func @kernel(%arg0: i32, %arg1: memref<512x256xbf16, #tpu.memory_space<vmem>>, %arg2: memref<256x128xbf16, #tpu.memory_space<vmem>>, %arg3: memref<1x128xf32, #tpu.memory_space<vmem>>, %arg4: memref<1x128xf32, #tpu.memory_space<vmem>>, %arg5: memref<1x128xf32, #tpu.memory_space<vmem>>, %arg6: memref<512x128xbf16, #tpu.memory_space<vmem>>) attributes {dimension_semantics = [#tpu.dimension_semantics<parallel>], iteration_bounds = array<i64: 2>, scalar_prefetch = 0 : i64, scratch_operands = 0 : i64, tpu.core_type = #tpu.core_type<tc>, window_params = [{transform_indices = @transform_0, window_bounds = array<i64: 512, 256>}, {pipeline_mode = #tpu.pipeline_mode<synchronous>, transform_indices = @transform_1, window_bounds = array<i64: 256, 128>}, {pipeline_mode = #tpu.pipeline_mode<synchronous>, transform_indices = @transform_2, window_bounds = array<i64: 1, 128>}, {pipeline_mode = #tpu.pipeline_mode<synchronous>, transform_indices = @transform_3, window_bounds = array<i64: 1, 128>}, {pipeline_mode = #tpu.pipeline_mode<synchronous>, transform_indices = @transform_4, window_bounds = array<i64: 1, 128>}, {transform_indices = @transform_5, window_bounds = array<i64: 512, 128>}]} {
    %c0 = arith.constant 0 : index
    %c0_0 = arith.constant 0 : index
    %0 = vector.load %arg1[%c0, %c0_0] : memref<512x256xbf16, #tpu.memory_space<vmem>>, vector<512x256xbf16>
    %c0_1 = arith.constant 0 : index
    %c0_2 = arith.constant 0 : index
    %1 = vector.load %arg2[%c0_1, %c0_2] : memref<256x128xbf16, #tpu.memory_space<vmem>>, vector<256x128xbf16>
    %cst = arith.constant dense<0.000000e+00> : vector<512x128xf32>
    %2 = tpu.matmul %0, %1, %cst {dimension_numbers = #tpu.dot_dimension_numbers<[1], [0], [0], [1], [0, 0, 1, 1], [], []>} : vector<512x256xbf16>, vector<256x128xbf16>, vector<512x128xf32> -> vector<512x128xf32>
    %c0_3 = arith.constant 0 : index
    %c0_4 = arith.constant 0 : index
    %3 = vector.load %arg3[%c0_3, %c0_4] : memref<1x128xf32, #tpu.memory_space<vmem>>, vector<1x128xf32>
    %4 = vector.broadcast %3 : vector<1x128xf32> to vector<512x128xf32>
    %5 = arith.addf %2, %4 : vector<512x128xf32>
    %cst_5 = arith.constant 0.000000e+00 : f32
    %6 = vector.broadcast %cst_5 : f32 to vector<512x128xf32>
    %7 = arith.cmpf ogt, %5, %6 : vector<512x128xf32>
    %cst_6 = arith.constant 2.000000e-01 : f32
    %8 = vector.broadcast %cst_6 : f32 to vector<512x128xf32>
    %9 = arith.mulf %8, %5 : vector<512x128xf32>
    %10 = arith.select %7, %5, %9 : vector<512x128xi1>, vector<512x128xf32>
    %11 = arith.truncf %10 : vector<512x128xf32> to vector<512x128xbf16>
    %c0_7 = arith.constant 0 : index
    %c0_8 = arith.constant 0 : index
    %12 = vector.load %arg6[%c0_7, %c0_8] : memref<512x128xbf16, #tpu.memory_space<vmem>>, vector<512x128xbf16>
    tpu.vector_store %arg6[%c0_7, %c0_8], %11 {strides = array<i32>} : memref<512x128xbf16, #tpu.memory_space<vmem>>, vector<512x128xbf16>,
    return
  }
  func.func @transform_0(%arg0: i32) -> (i32, i32) {
    %c0_i32 = arith.constant 0 : i32
    %c0_i32_0 = arith.constant 0 : i32
    return %arg0, %c0_i32 : i32, i32
  }
  func.func @transform_1(%arg0: i32) -> (i32, i32) {
    %c0_i32 = arith.constant 0 : i32
    %c0_i32_0 = arith.constant 0 : i32
    %c0_i32_1 = arith.constant 0 : i32
    return %c0_i32, %c0_i32_0 : i32, i32
  }
  func.func @transform_2(%arg0: i32) -> (i32, i32) {
    %c0_i32 = arith.constant 0 : i32
    %c0_i32_0 = arith.constant 0 : i32
    %c0_i32_1 = arith.constant 0 : i32
    return %c0_i32, %c0_i32_0 : i32, i32
  }
  func.func @transform_3(%arg0: i32) -> (i32, i32) {
    %c0_i32 = arith.constant 0 : i32
    %c0_i32_0 = arith.constant 0 : i32
    %c0_i32_1 = arith.constant 0 : i32
    return %c0_i32, %c0_i32_0 : i32, i32
  }
  func.func @transform_4(%arg0: i32) -> (i32, i32) {
    %c0_i32 = arith.constant 0 : i32
    %c0_i32_0 = arith.constant 0 : i32
    %c0_i32_1 = arith.constant 0 : i32
    return %c0_i32, %c0_i32_0 : i32, i32
  }
  func.func @transform_5(%arg0: i32) -> (i32, i32) {
    %c0_i32 = arith.constant 0 : i32
    %c0_i32_0 = arith.constant 0 : i32
    return %arg0, %c0_i32 : i32, i32
  }
}

module attributes {stable_mosaic.version = 11 : i64} {
  func.func @kernel(%arg0: i32, %arg1: memref<64x512xbf16, #tpu.memory_space<vmem>>, %arg2: memref<512x128xbf16, #tpu.memory_space<vmem>>, %arg3: memref<1x128xf32, #tpu.memory_space<vmem>>, %arg4: memref<1x128xf32, #tpu.memory_space<vmem>>, %arg5: memref<1x128xf32, #tpu.memory_space<vmem>>, %arg6: memref<64x128xbf16, #tpu.memory_space<vmem>>) attributes {dimension_semantics = [#tpu.dimension_semantics<parallel>], iteration_bounds = array<i64: 2>, scalar_prefetch = 0 : i64, scratch_operands = 0 : i64, tpu.core_type = #tpu.core_type<tc>, window_params = [{transform_indices = @transform_0, window_bounds = array<i64: 64, 512>}, {pipeline_mode = #tpu.pipeline_mode<synchronous>, transform_indices = @transform_1, window_bounds = array<i64: 512, 128>}, {pipeline_mode = #tpu.pipeline_mode<synchronous>, transform_indices = @transform_2, window_bounds = array<i64: 1, 128>}, {pipeline_mode = #tpu.pipeline_mode<synchronous>, transform_indices = @transform_3, window_bounds = array<i64: 1, 128>}, {pipeline_mode = #tpu.pipeline_mode<synchronous>, transform_indices = @transform_4, window_bounds = array<i64: 1, 128>}, {transform_indices = @transform_5, window_bounds = array<i64: 64, 128>}]} {
    %c0 = arith.constant 0 : index
    %c0_0 = arith.constant 0 : index
    %0 = vector.load %arg1[%c0, %c0_0] : memref<64x512xbf16, #tpu.memory_space<vmem>>, vector<64x512xbf16>
    %c0_1 = arith.constant 0 : index
    %c0_2 = arith.constant 0 : index
    %1 = vector.load %arg2[%c0_1, %c0_2] : memref<512x128xbf16, #tpu.memory_space<vmem>>, vector<512x128xbf16>
    %cst = arith.constant dense<0.000000e+00> : vector<64x128xf32>
    %2 = tpu.matmul %0, %1, %cst {dimension_numbers = #tpu.dot_dimension_numbers<[1], [0], [0], [1], [0, 0, 1, 1], [], []>} : vector<64x512xbf16>, vector<512x128xbf16>, vector<64x128xf32> -> vector<64x128xf32>
    %cst_3 = arith.constant dense<0.000000e+00> : vector<64xf32>
    %3 = vector.multi_reduction <add>, %2, %cst_3 [1] : vector<64x128xf32> to vector<64xf32>
    %4 = vector.shape_cast %3 : vector<64xf32> to vector<64x1xf32>
    %cst_4 = arith.constant 6.250000e-02 : f32
    %5 = vector.broadcast %cst_4 : f32 to vector<64x1xf32>
    %6 = arith.mulf %4, %5 : vector<64x1xf32>
    %7 = vector.broadcast %6 : vector<64x1xf32> to vector<64x128xf32>
    %8 = arith.subf %2, %7 : vector<64x128xf32>
    %9 = tpu.iota {dimensions = array<i32: 1>} : vector<1x128xi32>
    %c16_i32 = arith.constant 16 : i32
    %10 = vector.broadcast %c16_i32 : i32 to vector<1x128xi32>
    %11 = arith.cmpi slt, %9, %10 : vector<1x128xi32>
    %12 = arith.mulf %8, %8 : vector<64x128xf32>
    %cst_5 = arith.constant 0.000000e+00 : f32
    %13 = vector.shape_cast %11 : vector<1x128xi1> to vector<1x128xi1>
    %14 = vector.broadcast %13 : vector<1x128xi1> to vector<64x128xi1>
    %15 = vector.broadcast %cst_5 : f32 to vector<64x128xf32>
    %16 = arith.select %14, %12, %15 : vector<64x128xi1>, vector<64x128xf32>
    %cst_6 = arith.constant dense<0.000000e+00> : vector<64xf32>
    %17 = vector.multi_reduction <add>, %16, %cst_6 [1] : vector<64x128xf32> to vector<64xf32>
    %18 = vector.shape_cast %17 : vector<64xf32> to vector<64x1xf32>
    %cst_7 = arith.constant 6.250000e-02 : f32
    %19 = vector.broadcast %cst_7 : f32 to vector<64x1xf32>
    %20 = arith.mulf %18, %19 : vector<64x1xf32>
    %cst_8 = arith.constant 9.99999997E-7 : f32
    %21 = vector.broadcast %cst_8 : f32 to vector<64x1xf32>
    %22 = arith.addf %20, %21 : vector<64x1xf32>
    %23 = math.rsqrt %22 : vector<64x1xf32>
    %24 = vector.broadcast %23 : vector<64x1xf32> to vector<64x128xf32>
    %25 = arith.mulf %8, %24 : vector<64x128xf32>
    %c0_9 = arith.constant 0 : index
    %c0_10 = arith.constant 0 : index
    %26 = vector.load %arg4[%c0_9, %c0_10] : memref<1x128xf32, #tpu.memory_space<vmem>>, vector<1x128xf32>
    %27 = vector.broadcast %26 : vector<1x128xf32> to vector<64x128xf32>
    %28 = arith.mulf %25, %27 : vector<64x128xf32>
    %c0_11 = arith.constant 0 : index
    %c0_12 = arith.constant 0 : index
    %29 = vector.load %arg5[%c0_11, %c0_12] : memref<1x128xf32, #tpu.memory_space<vmem>>, vector<1x128xf32>
    %30 = vector.broadcast %29 : vector<1x128xf32> to vector<64x128xf32>
    %31 = arith.addf %28, %30 : vector<64x128xf32>
    %cst_13 = arith.constant 0.000000e+00 : f32
    %32 = vector.broadcast %cst_13 : f32 to vector<64x128xf32>
    %33 = arith.cmpf ogt, %31, %32 : vector<64x128xf32>
    %cst_14 = arith.constant 2.000000e-01 : f32
    %34 = vector.broadcast %cst_14 : f32 to vector<64x128xf32>
    %35 = arith.mulf %34, %31 : vector<64x128xf32>
    %36 = arith.select %33, %31, %35 : vector<64x128xi1>, vector<64x128xf32>
    %37 = arith.truncf %36 : vector<64x128xf32> to vector<64x128xbf16>
    %c0_15 = arith.constant 0 : index
    %c0_16 = arith.constant 0 : index
    %38 = vector.load %arg6[%c0_15, %c0_16] : memref<64x128xbf16, #tpu.memory_space<vmem>>, vector<64x128xbf16>
    tpu.vector_store %arg6[%c0_15, %c0_16], %37 {strides = array<i32>} : memref<64x128xbf16, #tpu.memory_space<vmem>>, vector<64x128xbf16>,
    return
  }
  func.func @transform_0(%arg0: i32) -> (i32, i32) {
    %c0_i32 = arith.constant 0 : i32
    %c0_i32_0 = arith.constant 0 : i32
    return %arg0, %c0_i32 : i32, i32
  }
  func.func @transform_1(%arg0: i32) -> (i32, i32) {
    %c0_i32 = arith.constant 0 : i32
    %c0_i32_0 = arith.constant 0 : i32
    %c0_i32_1 = arith.constant 0 : i32
    return %c0_i32, %c0_i32_0 : i32, i32
  }
  func.func @transform_2(%arg0: i32) -> (i32, i32) {
    %c0_i32 = arith.constant 0 : i32
    %c0_i32_0 = arith.constant 0 : i32
    %c0_i32_1 = arith.constant 0 : i32
    return %c0_i32, %c0_i32_0 : i32, i32
  }
  func.func @transform_3(%arg0: i32) -> (i32, i32) {
    %c0_i32 = arith.constant 0 : i32
    %c0_i32_0 = arith.constant 0 : i32
    %c0_i32_1 = arith.constant 0 : i32
    return %c0_i32, %c0_i32_0 : i32, i32
  }
  func.func @transform_4(%arg0: i32) -> (i32, i32) {
    %c0_i32 = arith.constant 0 : i32
    %c0_i32_0 = arith.constant 0 : i32
    %c0_i32_1 = arith.constant 0 : i32
    return %c0_i32, %c0_i32_0 : i32, i32
  }
  func.func @transform_5(%arg0: i32) -> (i32, i32) {
    %c0_i32 = arith.constant 0 : i32
    %c0_i32_0 = arith.constant 0 : i32
    return %arg0, %c0_i32 : i32, i32
  }
}

module attributes {stable_mosaic.version = 11 : i64} {
  func.func @kernel(%arg0: i32, %arg1: memref<16x1024xbf16, #tpu.memory_space<vmem>>, %arg2: memref<1024x128xbf16, #tpu.memory_space<vmem>>, %arg3: memref<1x128xf32, #tpu.memory_space<vmem>>, %arg4: memref<1x128xf32, #tpu.memory_space<vmem>>, %arg5: memref<1x128xf32, #tpu.memory_space<vmem>>, %arg6: memref<16x128xbf16, #tpu.memory_space<vmem>>) attributes {dimension_semantics = [#tpu.dimension_semantics<parallel>], iteration_bounds = array<i64: 1>, scalar_prefetch = 0 : i64, scratch_operands = 0 : i64, tpu.core_type = #tpu.core_type<tc>, window_params = [{transform_indices = @transform_0, window_bounds = array<i64: 16, 1024>}, {pipeline_mode = #tpu.pipeline_mode<synchronous>, transform_indices = @transform_1, window_bounds = array<i64: 1024, 128>}, {pipeline_mode = #tpu.pipeline_mode<synchronous>, transform_indices = @transform_2, window_bounds = array<i64: 1, 128>}, {pipeline_mode = #tpu.pipeline_mode<synchronous>, transform_indices = @transform_3, window_bounds = array<i64: 1, 128>}, {pipeline_mode = #tpu.pipeline_mode<synchronous>, transform_indices = @transform_4, window_bounds = array<i64: 1, 128>}, {transform_indices = @transform_5, window_bounds = array<i64: 16, 128>}]} {
    %c0 = arith.constant 0 : index
    %c0_0 = arith.constant 0 : index
    %0 = vector.load %arg1[%c0, %c0_0] : memref<16x1024xbf16, #tpu.memory_space<vmem>>, vector<16x1024xbf16>
    %c0_1 = arith.constant 0 : index
    %c0_2 = arith.constant 0 : index
    %1 = vector.load %arg2[%c0_1, %c0_2] : memref<1024x128xbf16, #tpu.memory_space<vmem>>, vector<1024x128xbf16>
    %cst = arith.constant dense<0.000000e+00> : vector<16x128xf32>
    %2 = tpu.matmul %0, %1, %cst {dimension_numbers = #tpu.dot_dimension_numbers<[1], [0], [0], [1], [0, 0, 1, 1], [], []>} : vector<16x1024xbf16>, vector<1024x128xbf16>, vector<16x128xf32> -> vector<16x128xf32>
    %cst_3 = arith.constant dense<0.000000e+00> : vector<16xf32>
    %3 = vector.multi_reduction <add>, %2, %cst_3 [1] : vector<16x128xf32> to vector<16xf32>
    %4 = vector.shape_cast %3 : vector<16xf32> to vector<16x1xf32>
    %cst_4 = arith.constant 3.125000e-02 : f32
    %5 = vector.broadcast %cst_4 : f32 to vector<16x1xf32>
    %6 = arith.mulf %4, %5 : vector<16x1xf32>
    %7 = vector.broadcast %6 : vector<16x1xf32> to vector<16x128xf32>
    %8 = arith.subf %2, %7 : vector<16x128xf32>
    %9 = tpu.iota {dimensions = array<i32: 1>} : vector<1x128xi32>
    %c32_i32 = arith.constant 32 : i32
    %10 = vector.broadcast %c32_i32 : i32 to vector<1x128xi32>
    %11 = arith.cmpi slt, %9, %10 : vector<1x128xi32>
    %12 = arith.mulf %8, %8 : vector<16x128xf32>
    %cst_5 = arith.constant 0.000000e+00 : f32
    %13 = vector.shape_cast %11 : vector<1x128xi1> to vector<1x128xi1>
    %14 = vector.broadcast %13 : vector<1x128xi1> to vector<16x128xi1>
    %15 = vector.broadcast %cst_5 : f32 to vector<16x128xf32>
    %16 = arith.select %14, %12, %15 : vector<16x128xi1>, vector<16x128xf32>
    %cst_6 = arith.constant dense<0.000000e+00> : vector<16xf32>
    %17 = vector.multi_reduction <add>, %16, %cst_6 [1] : vector<16x128xf32> to vector<16xf32>
    %18 = vector.shape_cast %17 : vector<16xf32> to vector<16x1xf32>
    %cst_7 = arith.constant 3.125000e-02 : f32
    %19 = vector.broadcast %cst_7 : f32 to vector<16x1xf32>
    %20 = arith.mulf %18, %19 : vector<16x1xf32>
    %cst_8 = arith.constant 9.99999997E-7 : f32
    %21 = vector.broadcast %cst_8 : f32 to vector<16x1xf32>
    %22 = arith.addf %20, %21 : vector<16x1xf32>
    %23 = math.rsqrt %22 : vector<16x1xf32>
    %24 = vector.broadcast %23 : vector<16x1xf32> to vector<16x128xf32>
    %25 = arith.mulf %8, %24 : vector<16x128xf32>
    %c0_9 = arith.constant 0 : index
    %c0_10 = arith.constant 0 : index
    %26 = vector.load %arg4[%c0_9, %c0_10] : memref<1x128xf32, #tpu.memory_space<vmem>>, vector<1x128xf32>
    %27 = vector.broadcast %26 : vector<1x128xf32> to vector<16x128xf32>
    %28 = arith.mulf %25, %27 : vector<16x128xf32>
    %c0_11 = arith.constant 0 : index
    %c0_12 = arith.constant 0 : index
    %29 = vector.load %arg5[%c0_11, %c0_12] : memref<1x128xf32, #tpu.memory_space<vmem>>, vector<1x128xf32>
    %30 = vector.broadcast %29 : vector<1x128xf32> to vector<16x128xf32>
    %31 = arith.addf %28, %30 : vector<16x128xf32>
    %cst_13 = arith.constant 0.000000e+00 : f32
    %32 = vector.broadcast %cst_13 : f32 to vector<16x128xf32>
    %33 = arith.cmpf ogt, %31, %32 : vector<16x128xf32>
    %cst_14 = arith.constant 2.000000e-01 : f32
    %34 = vector.broadcast %cst_14 : f32 to vector<16x128xf32>
    %35 = arith.mulf %34, %31 : vector<16x128xf32>
    %36 = arith.select %33, %31, %35 : vector<16x128xi1>, vector<16x128xf32>
    %37 = arith.truncf %36 : vector<16x128xf32> to vector<16x128xbf16>
    %c0_15 = arith.constant 0 : index
    %c0_16 = arith.constant 0 : index
    %38 = vector.load %arg6[%c0_15, %c0_16] : memref<16x128xbf16, #tpu.memory_space<vmem>>, vector<16x128xbf16>
    tpu.vector_store %arg6[%c0_15, %c0_16], %37 {strides = array<i32>} : memref<16x128xbf16, #tpu.memory_space<vmem>>, vector<16x128xbf16>,
    return
  }
  func.func @transform_0(%arg0: i32) -> (i32, i32) {
    %c0_i32 = arith.constant 0 : i32
    %c0_i32_0 = arith.constant 0 : i32
    return %arg0, %c0_i32 : i32, i32
  }
  func.func @transform_1(%arg0: i32) -> (i32, i32) {
    %c0_i32 = arith.constant 0 : i32
    %c0_i32_0 = arith.constant 0 : i32
    %c0_i32_1 = arith.constant 0 : i32
    return %c0_i32, %c0_i32_0 : i32, i32
  }
  func.func @transform_2(%arg0: i32) -> (i32, i32) {
    %c0_i32 = arith.constant 0 : i32
    %c0_i32_0 = arith.constant 0 : i32
    %c0_i32_1 = arith.constant 0 : i32
    return %c0_i32, %c0_i32_0 : i32, i32
  }
  func.func @transform_3(%arg0: i32) -> (i32, i32) {
    %c0_i32 = arith.constant 0 : i32
    %c0_i32_0 = arith.constant 0 : i32
    %c0_i32_1 = arith.constant 0 : i32
    return %c0_i32, %c0_i32_0 : i32, i32
  }
  func.func @transform_4(%arg0: i32) -> (i32, i32) {
    %c0_i32 = arith.constant 0 : i32
    %c0_i32_0 = arith.constant 0 : i32
    %c0_i32_1 = arith.constant 0 : i32
    return %c0_i32, %c0_i32_0 : i32, i32
  }
  func.func @transform_5(%arg0: i32) -> (i32, i32) {
    %c0_i32 = arith.constant 0 : i32
    %c0_i32_0 = arith.constant 0 : i32
    return %arg0, %c0_i32 : i32, i32
  }
}

module attributes {stable_mosaic.version = 11 : i64} {
  func.func @kernel(%arg0: i32, %arg1: memref<16x2048xbf16, #tpu.memory_space<vmem>>, %arg2: memref<2048x128xbf16, #tpu.memory_space<vmem>>, %arg3: memref<1x128xf32, #tpu.memory_space<vmem>>, %arg4: memref<1x128xf32, #tpu.memory_space<vmem>>, %arg5: memref<1x128xf32, #tpu.memory_space<vmem>>, %arg6: memref<16x128xbf16, #tpu.memory_space<vmem>>) attributes {dimension_semantics = [#tpu.dimension_semantics<parallel>], iteration_bounds = array<i64: 1>, scalar_prefetch = 0 : i64, scratch_operands = 0 : i64, tpu.core_type = #tpu.core_type<tc>, window_params = [{transform_indices = @transform_0, window_bounds = array<i64: 16, 2048>}, {pipeline_mode = #tpu.pipeline_mode<synchronous>, transform_indices = @transform_1, window_bounds = array<i64: 2048, 128>}, {pipeline_mode = #tpu.pipeline_mode<synchronous>, transform_indices = @transform_2, window_bounds = array<i64: 1, 128>}, {pipeline_mode = #tpu.pipeline_mode<synchronous>, transform_indices = @transform_3, window_bounds = array<i64: 1, 128>}, {pipeline_mode = #tpu.pipeline_mode<synchronous>, transform_indices = @transform_4, window_bounds = array<i64: 1, 128>}, {transform_indices = @transform_5, window_bounds = array<i64: 16, 128>}]} {
    %c0 = arith.constant 0 : index
    %c0_0 = arith.constant 0 : index
    %0 = vector.load %arg1[%c0, %c0_0] : memref<16x2048xbf16, #tpu.memory_space<vmem>>, vector<16x2048xbf16>
    %c0_1 = arith.constant 0 : index
    %c0_2 = arith.constant 0 : index
    %1 = vector.load %arg2[%c0_1, %c0_2] : memref<2048x128xbf16, #tpu.memory_space<vmem>>, vector<2048x128xbf16>
    %cst = arith.constant dense<0.000000e+00> : vector<16x128xf32>
    %2 = tpu.matmul %0, %1, %cst {dimension_numbers = #tpu.dot_dimension_numbers<[1], [0], [0], [1], [0, 0, 1, 1], [], []>} : vector<16x2048xbf16>, vector<2048x128xbf16>, vector<16x128xf32> -> vector<16x128xf32>
    %cst_3 = arith.constant dense<0.000000e+00> : vector<16xf32>
    %3 = vector.multi_reduction <add>, %2, %cst_3 [1] : vector<16x128xf32> to vector<16xf32>
    %4 = vector.shape_cast %3 : vector<16xf32> to vector<16x1xf32>
    %cst_4 = arith.constant 1.562500e-02 : f32
    %5 = vector.broadcast %cst_4 : f32 to vector<16x1xf32>
    %6 = arith.mulf %4, %5 : vector<16x1xf32>
    %7 = vector.broadcast %6 : vector<16x1xf32> to vector<16x128xf32>
    %8 = arith.subf %2, %7 : vector<16x128xf32>
    %9 = tpu.iota {dimensions = array<i32: 1>} : vector<1x128xi32>
    %c64_i32 = arith.constant 64 : i32
    %10 = vector.broadcast %c64_i32 : i32 to vector<1x128xi32>
    %11 = arith.cmpi slt, %9, %10 : vector<1x128xi32>
    %12 = arith.mulf %8, %8 : vector<16x128xf32>
    %cst_5 = arith.constant 0.000000e+00 : f32
    %13 = vector.shape_cast %11 : vector<1x128xi1> to vector<1x128xi1>
    %14 = vector.broadcast %13 : vector<1x128xi1> to vector<16x128xi1>
    %15 = vector.broadcast %cst_5 : f32 to vector<16x128xf32>
    %16 = arith.select %14, %12, %15 : vector<16x128xi1>, vector<16x128xf32>
    %cst_6 = arith.constant dense<0.000000e+00> : vector<16xf32>
    %17 = vector.multi_reduction <add>, %16, %cst_6 [1] : vector<16x128xf32> to vector<16xf32>
    %18 = vector.shape_cast %17 : vector<16xf32> to vector<16x1xf32>
    %cst_7 = arith.constant 1.562500e-02 : f32
    %19 = vector.broadcast %cst_7 : f32 to vector<16x1xf32>
    %20 = arith.mulf %18, %19 : vector<16x1xf32>
    %cst_8 = arith.constant 9.99999997E-7 : f32
    %21 = vector.broadcast %cst_8 : f32 to vector<16x1xf32>
    %22 = arith.addf %20, %21 : vector<16x1xf32>
    %23 = math.rsqrt %22 : vector<16x1xf32>
    %24 = vector.broadcast %23 : vector<16x1xf32> to vector<16x128xf32>
    %25 = arith.mulf %8, %24 : vector<16x128xf32>
    %c0_9 = arith.constant 0 : index
    %c0_10 = arith.constant 0 : index
    %26 = vector.load %arg4[%c0_9, %c0_10] : memref<1x128xf32, #tpu.memory_space<vmem>>, vector<1x128xf32>
    %27 = vector.broadcast %26 : vector<1x128xf32> to vector<16x128xf32>
    %28 = arith.mulf %25, %27 : vector<16x128xf32>
    %c0_11 = arith.constant 0 : index
    %c0_12 = arith.constant 0 : index
    %29 = vector.load %arg5[%c0_11, %c0_12] : memref<1x128xf32, #tpu.memory_space<vmem>>, vector<1x128xf32>
    %30 = vector.broadcast %29 : vector<1x128xf32> to vector<16x128xf32>
    %31 = arith.addf %28, %30 : vector<16x128xf32>
    %cst_13 = arith.constant 0.000000e+00 : f32
    %32 = vector.broadcast %cst_13 : f32 to vector<16x128xf32>
    %33 = arith.cmpf ogt, %31, %32 : vector<16x128xf32>
    %cst_14 = arith.constant 2.000000e-01 : f32
    %34 = vector.broadcast %cst_14 : f32 to vector<16x128xf32>
    %35 = arith.mulf %34, %31 : vector<16x128xf32>
    %36 = arith.select %33, %31, %35 : vector<16x128xi1>, vector<16x128xf32>
    %37 = arith.truncf %36 : vector<16x128xf32> to vector<16x128xbf16>
    %c0_15 = arith.constant 0 : index
    %c0_16 = arith.constant 0 : index
    %38 = vector.load %arg6[%c0_15, %c0_16] : memref<16x128xbf16, #tpu.memory_space<vmem>>, vector<16x128xbf16>
    tpu.vector_store %arg6[%c0_15, %c0_16], %37 {strides = array<i32>} : memref<16x128xbf16, #tpu.memory_space<vmem>>, vector<16x128xbf16>,
    return
  }
  func.func @transform_0(%arg0: i32) -> (i32, i32) {
    %c0_i32 = arith.constant 0 : i32
    %c0_i32_0 = arith.constant 0 : i32
    return %arg0, %c0_i32 : i32, i32
  }
  func.func @transform_1(%arg0: i32) -> (i32, i32) {
    %c0_i32 = arith.constant 0 : i32
    %c0_i32_0 = arith.constant 0 : i32
    %c0_i32_1 = arith.constant 0 : i32
    return %c0_i32, %c0_i32_0 : i32, i32
  }
  func.func @transform_2(%arg0: i32) -> (i32, i32) {
    %c0_i32 = arith.constant 0 : i32
    %c0_i32_0 = arith.constant 0 : i32
    %c0_i32_1 = arith.constant 0 : i32
    return %c0_i32, %c0_i32_0 : i32, i32
  }
  func.func @transform_3(%arg0: i32) -> (i32, i32) {
    %c0_i32 = arith.constant 0 : i32
    %c0_i32_0 = arith.constant 0 : i32
    %c0_i32_1 = arith.constant 0 : i32
    return %c0_i32, %c0_i32_0 : i32, i32
  }
  func.func @transform_4(%arg0: i32) -> (i32, i32) {
    %c0_i32 = arith.constant 0 : i32
    %c0_i32_0 = arith.constant 0 : i32
    %c0_i32_1 = arith.constant 0 : i32
    return %c0_i32, %c0_i32_0 : i32, i32
  }
  func.func @transform_5(%arg0: i32) -> (i32, i32) {
    %c0_i32 = arith.constant 0 : i32
    %c0_i32_0 = arith.constant 0 : i32
    return %arg0, %c0_i32 : i32, i32
  }
}

module attributes {stable_mosaic.version = 11 : i64} {
  func.func @kernel(%arg0: i32, %arg1: memref<1x16x128xbf16, #tpu.memory_space<vmem>>, %arg2: memref<1x128x128xbf16, #tpu.memory_space<vmem>>, %arg3: memref<1x1x128xf32, #tpu.memory_space<vmem>>, %arg4: memref<1x128xf32, #tpu.memory_space<vmem>>, %arg5: memref<1x128x128xbf16, #tpu.memory_space<vmem>>, %arg6: memref<1x1x128xf32, #tpu.memory_space<vmem>>, %arg7: memref<1x128xf32, #tpu.memory_space<vmem>>, %arg8: memref<128x384xbf16, #tpu.memory_space<vmem>>, %arg9: memref<128x128xbf16, #tpu.memory_space<vmem>>, %arg10: memref<1x16x128xf32, #tpu.memory_space<vmem>>) attributes {dimension_semantics = [#tpu.dimension_semantics<parallel>], iteration_bounds = array<i64: 2>, scalar_prefetch = 0 : i64, scratch_operands = 0 : i64, tpu.core_type = #tpu.core_type<tc>, window_params = [{transform_indices = @transform_0, window_bounds = array<i64: 1, 16, 128>}, {transform_indices = @transform_1, window_bounds = array<i64: 1, 128, 128>}, {transform_indices = @transform_2, window_bounds = array<i64: 1, 1, 128>}, {pipeline_mode = #tpu.pipeline_mode<synchronous>, transform_indices = @transform_3, window_bounds = array<i64: 1, 128>}, {transform_indices = @transform_4, window_bounds = array<i64: 1, 128, 128>}, {transform_indices = @transform_5, window_bounds = array<i64: 1, 1, 128>}, {pipeline_mode = #tpu.pipeline_mode<synchronous>, transform_indices = @transform_6, window_bounds = array<i64: 1, 128>}, {pipeline_mode = #tpu.pipeline_mode<synchronous>, transform_indices = @transform_7, window_bounds = array<i64: 128, 384>}, {pipeline_mode = #tpu.pipeline_mode<synchronous>, transform_indices = @transform_8, window_bounds = array<i64: 128, 128>}, {transform_indices = @transform_9, window_bounds = array<i64: 1, 16, 128>}]} {
    %c0 = arith.constant 0 : index
    %c0_0 = arith.constant 0 : index
    %c0_1 = arith.constant 0 : index
    %0 = vector.load %arg1[%c0, %c0_0, %c0_1] : memref<1x16x128xbf16, #tpu.memory_space<vmem>>, vector<1x16x128xbf16>
    %1 = vector.shape_cast %0 : vector<1x16x128xbf16> to vector<16x128xbf16>
    %2 = arith.extf %1 : vector<16x128xbf16> to vector<16x128xf32>
    %c0_2 = arith.constant 0 : index
    %c0_3 = arith.constant 0 : index
    %c0_4 = arith.constant 0 : index
    %3 = vector.load %arg2[%c0_2, %c0_3, %c0_4] : memref<1x128x128xbf16, #tpu.memory_space<vmem>>, vector<1x128x128xbf16>
    %4 = vector.shape_cast %3 : vector<1x128x128xbf16> to vector<128x128xbf16>
    %cst = arith.constant dense<0.000000e+00> : vector<16x128xf32>
    %5 = tpu.matmul %1, %4, %cst {dimension_numbers = #tpu.dot_dimension_numbers<[1], [0], [0], [1], [0, 0, 1, 1], [], []>} : vector<16x128xbf16>, vector<128x128xbf16>, vector<16x128xf32> -> vector<16x128xf32>
    %c0_5 = arith.constant 0 : index
    %c0_6 = arith.constant 0 : index
    %c0_7 = arith.constant 0 : index
    %6 = vector.load %arg3[%c0_5, %c0_6, %c0_7] : memref<1x1x128xf32, #tpu.memory_space<vmem>>, vector<1x1x128xf32>
    %7 = vector.shape_cast %6 : vector<1x1x128xf32> to vector<1x128xf32>
    %8 = vector.broadcast %7 : vector<1x128xf32> to vector<16x128xf32>
    %9 = arith.addf %5, %8 : vector<16x128xf32>
    %c0_8 = arith.constant 0 : index
    %c0_9 = arith.constant 0 : index
    %10 = vector.load %arg4[%c0_8, %c0_9] : memref<1x128xf32, #tpu.memory_space<vmem>>, vector<1x128xf32>
    %cst_10 = arith.constant 0.000000e+00 : f32
    %11 = vector.broadcast %cst_10 : f32 to vector<16x128xf32>
    %12 = arith.cmpf ogt, %9, %11 : vector<16x128xf32>
    %cst_11 = arith.constant 2.000000e-01 : f32
    %13 = vector.broadcast %cst_11 : f32 to vector<16x128xf32>
    %14 = arith.mulf %13, %9 : vector<16x128xf32>
    %15 = arith.select %12, %9, %14 : vector<16x128xi1>, vector<16x128xf32>
    %16 = vector.broadcast %10 : vector<1x128xf32> to vector<16x128xf32>
    %17 = arith.mulf %16, %15 : vector<16x128xf32>
    %18 = arith.addf %2, %17 : vector<16x128xf32>
    %19 = arith.truncf %18 : vector<16x128xf32> to vector<16x128xbf16>
    %c0_12 = arith.constant 0 : index
    %c0_13 = arith.constant 0 : index
    %c0_14 = arith.constant 0 : index
    %20 = vector.load %arg5[%c0_12, %c0_13, %c0_14] : memref<1x128x128xbf16, #tpu.memory_space<vmem>>, vector<1x128x128xbf16>
    %21 = vector.shape_cast %20 : vector<1x128x128xbf16> to vector<128x128xbf16>
    %cst_15 = arith.constant dense<0.000000e+00> : vector<16x128xf32>
    %22 = tpu.matmul %19, %21, %cst_15 {dimension_numbers = #tpu.dot_dimension_numbers<[1], [0], [0], [1], [0, 0, 1, 1], [], []>} : vector<16x128xbf16>, vector<128x128xbf16>, vector<16x128xf32> -> vector<16x128xf32>
    %c0_16 = arith.constant 0 : index
    %c0_17 = arith.constant 0 : index
    %c0_18 = arith.constant 0 : index
    %23 = vector.load %arg6[%c0_16, %c0_17, %c0_18] : memref<1x1x128xf32, #tpu.memory_space<vmem>>, vector<1x1x128xf32>
    %24 = vector.shape_cast %23 : vector<1x1x128xf32> to vector<1x128xf32>
    %25 = vector.broadcast %24 : vector<1x128xf32> to vector<16x128xf32>
    %26 = arith.addf %22, %25 : vector<16x128xf32>
    %c0_19 = arith.constant 0 : index
    %c0_20 = arith.constant 0 : index
    %27 = vector.load %arg7[%c0_19, %c0_20] : memref<1x128xf32, #tpu.memory_space<vmem>>, vector<1x128xf32>
    %cst_21 = arith.constant 0.000000e+00 : f32
    %28 = vector.broadcast %cst_21 : f32 to vector<16x128xf32>
    %29 = arith.cmpf ogt, %26, %28 : vector<16x128xf32>
    %cst_22 = arith.constant 2.000000e-01 : f32
    %30 = vector.broadcast %cst_22 : f32 to vector<16x128xf32>
    %31 = arith.mulf %30, %26 : vector<16x128xf32>
    %32 = arith.select %29, %26, %31 : vector<16x128xi1>, vector<16x128xf32>
    %33 = vector.broadcast %27 : vector<1x128xf32> to vector<16x128xf32>
    %34 = arith.mulf %33, %32 : vector<16x128xf32>
    %35 = arith.addf %18, %34 : vector<16x128xf32>
    %36 = arith.truncf %35 : vector<16x128xf32> to vector<16x128xbf16>
    %c0_23 = arith.constant 0 : index
    %c0_24 = arith.constant 0 : index
    %37 = vector.load %arg8[%c0_23, %c0_24] : memref<128x384xbf16, #tpu.memory_space<vmem>>, vector<128x384xbf16>
    %cst_25 = arith.constant dense<0.000000e+00> : vector<16x384xf32>
    %38 = tpu.matmul %36, %37, %cst_25 {dimension_numbers = #tpu.dot_dimension_numbers<[1], [0], [0], [1], [0, 0, 1, 1], [], []>} : vector<16x128xbf16>, vector<128x384xbf16>, vector<16x384xf32> -> vector<16x384xf32>
    %39 = vector.extract_strided_slice %38 {offsets = [0, 0], sizes = [16, 128], strides = [1, 1]} : vector<16x384xf32> to vector<16x128xf32>
    %40 = arith.truncf %39 : vector<16x128xf32> to vector<16x128xbf16>
    %41 = vector.extract_strided_slice %38 {offsets = [0, 128], sizes = [16, 128], strides = [1, 1]} : vector<16x384xf32> to vector<16x128xf32>
    %42 = arith.truncf %41 : vector<16x128xf32> to vector<16x128xbf16>
    %43 = vector.extract_strided_slice %38 {offsets = [0, 256], sizes = [16, 128], strides = [1, 1]} : vector<16x384xf32> to vector<16x128xf32>
    %44 = arith.truncf %43 : vector<16x128xf32> to vector<16x128xbf16>
    %cst_26 = arith.constant dense<0.000000e+00> : vector<16x16xf32>
    %45 = tpu.matmul %40, %42, %cst_26 {dimension_numbers = #tpu.dot_dimension_numbers<[1], [1], [0], [0], [0, 0, 1, 0], [], []>} : vector<16x128xbf16>, vector<16x128xbf16>, vector<16x16xf32> -> vector<16x16xf32>
    %cst_27 = arith.constant 1.250000e-01 : f32
    %46 = vector.broadcast %cst_27 : f32 to vector<16x16xf32>
    %47 = arith.mulf %45, %46 : vector<16x16xf32>
    %48 = tpu.iota {dimensions = array<i32: 1>} : vector<16x16xi32>
    %c1_i32 = arith.constant 1 : i32
    %49 = vector.broadcast %c1_i32 : i32 to vector<16x16xi32>
    %50 = arith.cmpi slt, %48, %49 : vector<16x16xi32>
    %cst_28 = arith.constant -1.000000e+30 : f32
    %51 = vector.broadcast %cst_28 : f32 to vector<16x16xf32>
    %52 = arith.select %50, %47, %51 : vector<16x16xi1>, vector<16x16xf32>
    %cst_29 = arith.constant dense<0xFF800000> : vector<16xf32>
    %53 = vector.multi_reduction <maximumf>, %52, %cst_29 [1] : vector<16x16xf32> to vector<16xf32>
    %54 = vector.shape_cast %53 : vector<16xf32> to vector<16x1xf32>
    %55 = vector.broadcast %54 : vector<16x1xf32> to vector<16x16xf32>
    %56 = arith.subf %52, %55 : vector<16x16xf32>
    %57 = math.exp %56 : vector<16x16xf32>
    %cst_30 = arith.constant dense<0.000000e+00> : vector<16xf32>
    %58 = vector.multi_reduction <add>, %57, %cst_30 [1] : vector<16x16xf32> to vector<16xf32>
    %59 = vector.shape_cast %58 : vector<16xf32> to vector<16x1xf32>
    %60 = tpu.reciprocal %59 {approx = true} : vector<16x1xf32> -> vector<16x1xf32>
    %61 = vector.broadcast %60 : vector<16x1xf32> to vector<16x16xf32>
    %62 = arith.mulf %57, %61 : vector<16x16xf32>
    %63 = arith.truncf %62 : vector<16x16xf32> to vector<16x16xbf16>
    %cst_31 = arith.constant dense<0.000000e+00> : vector<16x128xf32>
    %64 = tpu.matmul %63, %44, %cst_31 {dimension_numbers = #tpu.dot_dimension_numbers<[1], [0], [0], [1], [0, 0, 1, 1], [], []>} : vector<16x16xbf16>, vector<16x128xbf16>, vector<16x128xf32> -> vector<16x128xf32>
    %65 = arith.truncf %64 : vector<16x128xf32> to vector<16x128xbf16>
    %c0_32 = arith.constant 0 : index
    %c0_33 = arith.constant 0 : index
    %66 = vector.load %arg9[%c0_32, %c0_33] : memref<128x128xbf16, #tpu.memory_space<vmem>>, vector<128x128xbf16>
    %cst_34 = arith.constant dense<0.000000e+00> : vector<16x128xf32>
    %67 = tpu.matmul %65, %66, %cst_34 {dimension_numbers = #tpu.dot_dimension_numbers<[1], [0], [0], [1], [0, 0, 1, 1], [], []>} : vector<16x128xbf16>, vector<128x128xbf16>, vector<16x128xf32> -> vector<16x128xf32>
    %68 = arith.addf %35, %67 : vector<16x128xf32>
    %69 = vector.shape_cast %68 : vector<16x128xf32> to vector<1x16x128xf32>
    %c0_35 = arith.constant 0 : index
    %c0_36 = arith.constant 0 : index
    %c0_37 = arith.constant 0 : index
    %70 = vector.load %arg10[%c0_35, %c0_36, %c0_37] : memref<1x16x128xf32, #tpu.memory_space<vmem>>, vector<1x16x128xf32>
    tpu.vector_store %arg10[%c0_35, %c0_36, %c0_37], %69 {strides = array<i32>} : memref<1x16x128xf32, #tpu.memory_space<vmem>>, vector<1x16x128xf32>,
    return
  }
  func.func @transform_0(%arg0: i32) -> (i32, i32, i32) {
    %c0_i32 = arith.constant 0 : i32
    %c0_i32_0 = arith.constant 0 : i32
    %c0_i32_1 = arith.constant 0 : i32
    return %arg0, %c0_i32, %c0_i32_0 : i32, i32, i32
  }
  func.func @transform_1(%arg0: i32) -> (i32, i32, i32) {
    %c0_i32 = arith.constant 0 : i32
    %c0_i32_0 = arith.constant 0 : i32
    %c0_i32_1 = arith.constant 0 : i32
    return %arg0, %c0_i32, %c0_i32_0 : i32, i32, i32
  }
  func.func @transform_2(%arg0: i32) -> (i32, i32, i32) {
    %c0_i32 = arith.constant 0 : i32
    %c0_i32_0 = arith.constant 0 : i32
    %c0_i32_1 = arith.constant 0 : i32
    return %arg0, %c0_i32, %c0_i32_0 : i32, i32, i32
  }
  func.func @transform_3(%arg0: i32) -> (i32, i32) {
    %c0_i32 = arith.constant 0 : i32
    %c0_i32_0 = arith.constant 0 : i32
    %c0_i32_1 = arith.constant 0 : i32
    return %c0_i32, %c0_i32_0 : i32, i32
  }
  func.func @transform_4(%arg0: i32) -> (i32, i32, i32) {
    %c0_i32 = arith.constant 0 : i32
    %c0_i32_0 = arith.constant 0 : i32
    %c0_i32_1 = arith.constant 0 : i32
    return %arg0, %c0_i32, %c0_i32_0 : i32, i32, i32
  }
  func.func @transform_5(%arg0: i32) -> (i32, i32, i32) {
    %c0_i32 = arith.constant 0 : i32
    %c0_i32_0 = arith.constant 0 : i32
    %c0_i32_1 = arith.constant 0 : i32
    return %arg0, %c0_i32, %c0_i32_0 : i32, i32, i32
  }
  func.func @transform_6(%arg0: i32) -> (i32, i32) {
    %c0_i32 = arith.constant 0 : i32
    %c0_i32_0 = arith.constant 0 : i32
    %c0_i32_1 = arith.constant 0 : i32
    return %c0_i32, %c0_i32_0 : i32, i32
  }
  func.func @transform_7(%arg0: i32) -> (i32, i32) {
    %c0_i32 = arith.constant 0 : i32
    %c0_i32_0 = arith.constant 0 : i32
    %c0_i32_1 = arith.constant 0 : i32
    return %c0_i32, %c0_i32_0 : i32, i32
  }
  func.func @transform_8(%arg0: i32) -> (i32, i32) {
    %c0_i32 = arith.constant 0 : i32
    %c0_i32_0 = arith.constant 0 : i32
    %c0_i32_1 = arith.constant 0 : i32
    return %c0_i32, %c0_i32_0 : i32, i32
  }
  func.func @transform_9(%arg0: i32) -> (i32, i32, i32) {
    %c0_i32 = arith.constant 0 : i32
    %c0_i32_0 = arith.constant 0 : i32
    %c0_i32_1 = arith.constant 0 : i32
    return %arg0, %c0_i32, %c0_i32_0 : i32, i32, i32
  }
}

</mosaic_0001>

<bundles_post_ra>
// kernel: nlayer_discriminator.5
= control target key start
LH: loop header
LB: loop body
LE: loop exit
PB: predicated region body
PF: predicated region fallthrough
CT: control target
= control target key end

     0   :  { %s2213_s18 = smov 0   ;;  %s2483_s0 = inlined_call_operand.vmem [shape: bf16[1024,256], index: 0, kind: input, shape index: {}]   ;;  %s2484_s1 = inlined_call_operand.vmem [shape: bf16[256,128], index: 1, kind: input, shape index: {}]   ;;  %s2485_s2 = inlined_call_operand.vmem [shape: f32[1,128], index: 2, kind: input, shape index: {}]   ;;  %s2486_s3 = inlined_call_operand.vmem [shape: f32[1,128], index: 3, kind: input, shape index: {}]   ;;  %s2487_s4 = inlined_call_operand.vmem [shape: f32[1,128], index: 4, kind: input, shape index: {}]   ;;  %s2488_s5 = inlined_call_operand.vmem [shape: bf16[1024,128], index: 5, kind: output, shape index: {}]  }
   0x1 LB: > { %s1608_s19 = sadd.s32 4294967295, %s2180_s18   ;;  %p1612_p0 = scmp.ge.s32.totalorder %s2180_s18, 1  ;;  %s2180_s18 = sphi %s2213_s18, %s15_s18  }
   0x2   : > { %p189_p1 = scmp.lt.s32.totalorder %s2180_s18, 3 }
   0x4   : > { %p190_p2 = pnand %p1612_p0, %p189_p1 }
   0x5   : > { %v2062_v0 = vld [vmem:[%s2484_s1] sm:$0xff] (!%p190_p2)   ;;  %v2182_v1 = vmov (!%p190_p2), 0   ;;  %s1613_s20 = sshll.u32 (!%p190_p2), %s1608_s19, 6  ;;  %v2063_v2 = vld [vmem:[%s2484_s1 + $0x8] sm:$0xff] (!%p190_p2)   ;;  %v2064_v3 = vld [vmem:[%s2484_s1 + $0x10] sm:$0xff] (!%p190_p2)  }
   0x6   : > { %193 = sbr.rel (%p190_p2) target bundleno = 412 (0x19c), region = 40  ;;  %751 = vmatprep.subr.bf16.mxu0 (!%p190_p2), %v2182_v1  ;;  %2021 = vmatprep.subr.bf16.mxu1 (!%p190_p2), %v2182_v1  ;;  %p219_p3 = scmp.lt.s32.totalorder (!%p190_p2), %s1613_s20, 127  ;;  %v2065_v4 = vld [vmem:[%s2484_s1 + $0x18] sm:$0xff] (!%p190_p2)   ;;  %v2066_v5 = vld [vmem:[%s2484_s1 + $0x20] sm:$0xff] (!%p190_p2)   ;;  %v2067_v7 = vld [vmem:[%s2484_s1 + $0x28] sm:$0xff] (!%p190_p2)  }
   0x7   : > { %752 = vmatpush1.bf16.msra.mxu0 (!%p190_p2), %v2062_v0  ;;  %2037 = vmatpush1.bf16.msra.mxu1 (!%p190_p2), %v2062_v0  ;;  %v2068_v9 = vld [vmem:[%s2484_s1 + $0x30] sm:$0xff] (!%p190_p2)   ;;  %v2069_v10 = vld [vmem:[%s2484_s1 + $0x38] sm:$0xff] (!%p190_p2)   ;;  %v2070_v11 = vld [vmem:[%s2484_s1 + $0x40] sm:$0xff] (!%p190_p2)  }
   0x8   : > { %753 = vmatprep.subr.bf16.mxu0 (!%p190_p2), %v2182_v1  ;;  %2022 = vmatprep.subr.bf16.mxu1 (!%p190_p2), %v2182_v1  ;;  %v2071_v12 = vld [vmem:[%s2484_s1 + $0x48] sm:$0xff] (!%p190_p2)   ;;  %v2072_v13 = vld [vmem:[%s2484_s1 + $0x50] sm:$0xff] (!%p190_p2)   ;;  %v2073_v14 = vld [vmem:[%s2484_s1 + $0x58] sm:$0xff] (!%p190_p2)  }
   0x9   : > { %v2074_v15 = vld [vmem:[%s2484_s1 + $0x60] sm:$0xff] (!%p190_p2)   ;;  %v2075_v16 = vld [vmem:[%s2484_s1 + $0x68] sm:$0xff] (!%p190_p2)   ;;  %v2076_v17 = vld [vmem:[%s2484_s1 + $0x70] sm:$0xff] (!%p190_p2)  }
   0xa   : > { %v2077_v18 = vld [vmem:[%s2484_s1 + $0x78] sm:$0xff] (!%p190_p2)  }
   0xb   : > { %754 = vmatpush1.bf16.msra.mxu0 (!%p190_p2), %v2063_v2  ;;  %2038 = vmatpush1.bf16.msra.mxu1 (!%p190_p2), %v2063_v2 }
   0xc   : > { %755 = vmatprep.subr.bf16.mxu0 (!%p190_p2), %v2182_v1  ;;  %2023 = vmatprep.subr.bf16.mxu1 (!%p190_p2), %v2182_v1 }
   0xd   : > { %s2490_s20 = smov (!%p219_p3, %s1613_s20), 127 }
   0xe   : > { %s1765_s27 = sshll.u32 %s2490_s20, 3 }
   0xf   : > { %756 = vmatpush1.bf16.msra.mxu0 %v2064_v3  ;;  %2039 = vmatpush1.bf16.msra.mxu1 %v2064_v3  ;;  %s2250_s7 = scalar_lea.vmem %s2483_s0, %s1765_s27 }
  0x10   : > { %757 = vmatprep.subr.bf16.mxu0 %v2182_v1  ;;  %2024 = vmatprep.subr.bf16.mxu1 %v2182_v1  ;;  %v2080_v6 = vld [vmem:[%s2250_s7 + $0x4] ss:$8 sps:$4 sm:$0xff]   ;;  %v2078_v19 = vld [vmem:[%s2250_s7] ss:$8 sps:$4 sm:$0xff]   ;;  %v2084_v21 = vld [vmem:[%s2250_s7 + $0x14] ss:$8 sps:$4 sm:$0xff]  }
  0x11   : > { %v2083_v8 = vld [vmem:[%s2250_s7 + $0x104] ss:$8 sps:$4 sm:$0xff]   ;;  %783 = vmatprep.mubr.bf16.mxu0 %v2080_v6  ;;  %v2081_v20 = vld [vmem:[%s2250_s7 + $0x100] ss:$8 sps:$4 sm:$0xff]   ;;  %v2086_v22 = vld [vmem:[%s2250_s7 + $0x114] ss:$8 sps:$4 sm:$0xff]  }
  0x12   : > { %911 = vmatprep.mubr.bf16.mxu1 %v2083_v8  ;;  %v2088_v23 = vld [vmem:[%s2250_s7 + $0x10] ss:$8 sps:$4 sm:$0xff]   ;;  %v2090_v25 = vld [vmem:[%s2250_s7 + $0x24] ss:$8 sps:$4 sm:$0xff]   ;;  %v2094_v27 = vld [vmem:[%s2250_s7 + $0x20] ss:$8 sps:$4 sm:$0xff]  }
  0x13   : > { %758 = vmatpush1.bf16.msra.mxu0 %v2065_v4  ;;  %2040 = vmatpush1.bf16.msra.mxu1 %v2065_v4  ;;  %v2089_v24 = vld [vmem:[%s2250_s7 + $0x110] ss:$8 sps:$4 sm:$0xff]   ;;  %v2092_v26 = vld [vmem:[%s2250_s7 + $0x124] ss:$8 sps:$4 sm:$0xff]   ;;  %v2095_v28 = vld [vmem:[%s2250_s7 + $0x120] ss:$8 sps:$4 sm:$0xff]  }
  0x14   : > { %759 = vmatprep.subr.bf16.mxu0 %v2182_v1  ;;  %2025 = vmatprep.subr.bf16.mxu1 %v2182_v1  ;;  %v2096_v29 = vld [vmem:[%s2250_s7 + $0x34] ss:$8 sps:$4 sm:$0xff]   ;;  %v2100_v31 = vld [vmem:[%s2250_s7 + $0x30] ss:$8 sps:$4 sm:$0xff]   ;;  %v2102_v33 = vld [vmem:[%s2250_s7 + $0x44] ss:$8 sps:$4 sm:$0xff]  }
  0x15   : > { %v2098_v30 = vld [vmem:[%s2250_s7 + $0x134] ss:$8 sps:$4 sm:$0xff]   ;;  %v2101_v32 = vld [vmem:[%s2250_s7 + $0x130] ss:$8 sps:$4 sm:$0xff]   ;;  %v2104_v34 = vld [vmem:[%s2250_s7 + $0x144] ss:$8 sps:$4 sm:$0xff]  }
  0x16   : > { %v2106_v35 = vld [vmem:[%s2250_s7 + $0x40] ss:$8 sps:$4 sm:$0xff]   ;;  %v2108_v37 = vld [vmem:[%s2250_s7 + $0x54] ss:$8 sps:$4 sm:$0xff]   ;;  %v2112_v39 = vld [vmem:[%s2250_s7 + $0x50] ss:$8 sps:$4 sm:$0xff]  }
  0x17   : > { %760 = vmatpush1.bf16.msra.mxu0 %v2066_v5  ;;  %2041 = vmatpush1.bf16.msra.mxu1 %v2066_v5  ;;  %v2107_v36 = vld [vmem:[%s2250_s7 + $0x140] ss:$8 sps:$4 sm:$0xff]   ;;  %v2110_v38 = vld [vmem:[%s2250_s7 + $0x154] ss:$8 sps:$4 sm:$0xff]   ;;  %v2113_v40 = vld [vmem:[%s2250_s7 + $0x150] ss:$8 sps:$4 sm:$0xff]  }
  0x18   : > { %761 = vmatprep.subr.bf16.mxu0 %v2182_v1  ;;  %2026 = vmatprep.subr.bf16.mxu1 %v2182_v1  ;;  %v2114_v41 = vld [vmem:[%s2250_s7 + $0x64] ss:$8 sps:$4 sm:$0xff]   ;;  %v2118_v43 = vld [vmem:[%s2250_s7 + $0x60] ss:$8 sps:$4 sm:$0xff]   ;;  %v2120_v45 = vld [vmem:[%s2250_s7 + $0x74] ss:$8 sps:$4 sm:$0xff]  }
  0x19   : > { %v2116_v42 = vld [vmem:[%s2250_s7 + $0x164] ss:$8 sps:$4 sm:$0xff]   ;;  %v2119_v44 = vld [vmem:[%s2250_s7 + $0x160] ss:$8 sps:$4 sm:$0xff]   ;;  %v2122_v46 = vld [vmem:[%s2250_s7 + $0x174] ss:$8 sps:$4 sm:$0xff]  }
  0x1a   : > { %v2124_v47 = vld [vmem:[%s2250_s7 + $0x70] ss:$8 sps:$4 sm:$0xff]   ;;  %v2126_v49 = vld [vmem:[%s2250_s7 + $0x84] ss:$8 sps:$4 sm:$0xff]   ;;  %v2130_v51 = vld [vmem:[%s2250_s7 + $0x80] ss:$8 sps:$4 sm:$0xff]  }
  0x1b   : > { %762 = vmatpush1.bf16.msra.mxu0 %v2067_v7  ;;  %2042 = vmatpush1.bf16.msra.mxu1 %v2067_v7  ;;  %v2125_v48 = vld [vmem:[%s2250_s7 + $0x170] ss:$8 sps:$4 sm:$0xff]   ;;  %v2128_v50 = vld [vmem:[%s2250_s7 + $0x184] ss:$8 sps:$4 sm:$0xff]   ;;  %v2131_v52 = vld [vmem:[%s2250_s7 + $0x180] ss:$8 sps:$4 sm:$0xff]  }
  0x1c   : > { %763 = vmatprep.subr.bf16.mxu0 %v2182_v1  ;;  %2027 = vmatprep.subr.bf16.mxu1 %v2182_v1  ;;  %v2132_v53 = vld [vmem:[%s2250_s7 + $0x94] ss:$8 sps:$4 sm:$0xff]   ;;  %v2136_v55 = vld [vmem:[%s2250_s7 + $0x90] ss:$8 sps:$4 sm:$0xff]   ;;  %v2138_v57 = vld [vmem:[%s2250_s7 + $0xa4] ss:$8 sps:$4 sm:$0xff]  }
  0x1d   : > { %v2134_v54 = vld [vmem:[%s2250_s7 + $0x194] ss:$8 sps:$4 sm:$0xff]   ;;  %v2137_v56 = vld [vmem:[%s2250_s7 + $0x190] ss:$8 sps:$4 sm:$0xff]   ;;  %v2140_v58 = vld [vmem:[%s2250_s7 + $0x1a4] ss:$8 sps:$4 sm:$0xff]  }
  0x1e   : > { %v2142_v59 = vld [vmem:[%s2250_s7 + $0xa0] ss:$8 sps:$4 sm:$0xff]   ;;  %v2144_v61 = vld [vmem:[%s2250_s7 + $0xb4] ss:$8 sps:$4 sm:$0xff]   ;;  %v2148_v63 = vld [vmem:[%s2250_s7 + $0xb0] ss:$8 sps:$4 sm:$0xff]  }
  0x1f   : > { %764 = vmatpush1.bf16.msra.mxu0 %v2068_v9  ;;  %2043 = vmatpush1.bf16.msra.mxu1 %v2068_v9  ;;  %v2143_v60 = vld [vmem:[%s2250_s7 + $0x1a0] ss:$8 sps:$4 sm:$0xff]   ;;  %v2146_v62 = vld [vmem:[%s2250_s7 + $0x1b4] ss:$8 sps:$4 sm:$0xff]   ;;  %v2149_v0 = vld [vmem:[%s2250_s7 + $0x1b0] ss:$8 sps:$4 sm:$0xff]  }
  0x20   : > { %765 = vmatprep.subr.bf16.mxu0 %v2182_v1  ;;  %2028 = vmatprep.subr.bf16.mxu1 %v2182_v1  ;;  %v2152_v2 = vld [vmem:[%s2250_s7 + $0x1c4] ss:$8 sps:$4 sm:$0xff]   ;;  %v2154_v3 = vld [vmem:[%s2250_s7 + $0xc0] ss:$8 sps:$4 sm:$0xff]   ;;  %v2156_v5 = vld [vmem:[%s2250_s7 + $0xd4] ss:$8 sps:$4 sm:$0xff]  }
  0x21   : > { %v2155_v4 = vld [vmem:[%s2250_s7 + $0x1c0] ss:$8 sps:$4 sm:$0xff]   ;;  %v2158_v6 = vld [vmem:[%s2250_s7 + $0x1d4] ss:$8 sps:$4 sm:$0xff]   ;;  %v2160_v7 = vld [vmem:[%s2250_s7 + $0xd0] ss:$8 sps:$4 sm:$0xff]  }
  0x22   : > { %v2161_v8 = vld [vmem:[%s2250_s7 + $0x1d0] ss:$8 sps:$4 sm:$0xff]   ;;  %v2162_v9 = vld [vmem:[%s2250_s7 + $0xe4] ss:$8 sps:$4 sm:$0xff]  }
  0x23   : > { %766 = vmatpush1.bf16.msra.mxu0 %v2069_v10  ;;  %2044 = vmatpush1.bf16.msra.mxu1 %v2069_v10  ;;  %v2164_v10 = vld [vmem:[%s2250_s7 + $0x1e4] ss:$8 sps:$4 sm:$0xff]  }
  0x24   : > { %767 = vmatprep.subr.bf16.mxu0 %v2182_v1  ;;  %2029 = vmatprep.subr.bf16.mxu1 %v2182_v1 }
  0x27   : > { %768 = vmatpush1.bf16.msra.mxu0 %v2070_v11  ;;  %2045 = vmatpush1.bf16.msra.mxu1 %v2070_v11  ;;  %v2166_v11 = vld [vmem:[%s2250_s7 + $0xe0] ss:$8 sps:$4 sm:$0xff]  }
  0x28   : > { %769 = vmatprep.subr.bf16.mxu0 %v2182_v1  ;;  %2030 = vmatprep.subr.bf16.mxu1 %v2182_v1 }
  0x2b   : > { %770 = vmatpush1.bf16.msra.mxu0 %v2071_v12  ;;  %2046 = vmatpush1.bf16.msra.mxu1 %v2071_v12  ;;  %v2167_v12 = vld [vmem:[%s2250_s7 + $0x1e0] ss:$8 sps:$4 sm:$0xff]  }
  0x2c   : > { %771 = vmatprep.subr.bf16.mxu0 %v2182_v1  ;;  %2031 = vmatprep.subr.bf16.mxu1 %v2182_v1 }
  0x2f   : > { %772 = vmatpush1.bf16.msra.mxu0 %v2072_v13  ;;  %2047 = vmatpush1.bf16.msra.mxu1 %v2072_v13  ;;  %v2168_v13 = vld [vmem:[%s2250_s7 + $0xf4] ss:$8 sps:$4 sm:$0xff]  }
  0x30   : > { %773 = vmatprep.subr.bf16.mxu0 %v2182_v1  ;;  %2032 = vmatprep.subr.bf16.mxu1 %v2182_v1 }
  0x33   : > { %774 = vmatpush1.bf16.msra.mxu0 %v2073_v14  ;;  %2048 = vmatpush1.bf16.msra.mxu1 %v2073_v14  ;;  %v2170_v14 = vld [vmem:[%s2250_s7 + $0x1f4] ss:$8 sps:$4 sm:$0xff]  }
  0x34   : > { %775 = vmatprep.subr.bf16.mxu0 %v2182_v1  ;;  %2033 = vmatprep.subr.bf16.mxu1 %v2182_v1 }
  0x37   : > { %776 = vmatpush1.bf16.msra.mxu0 %v2074_v15  ;;  %2049 = vmatpush1.bf16.msra.mxu1 %v2074_v15  ;;  %v2172_v15 = vld [vmem:[%s2250_s7 + $0xf0] ss:$8 sps:$4 sm:$0xff]  }
  0x38   : > { %777 = vmatprep.subr.bf16.mxu0 %v2182_v1  ;;  %2034 = vmatprep.subr.bf16.mxu1 %v2182_v1 }
  0x3b   : > { %778 = vmatpush1.bf16.msra.mxu0 %v2075_v16  ;;  %2050 = vmatpush1.bf16.msra.mxu1 %v2075_v16  ;;  %v2173_v16 = vld [vmem:[%s2250_s7 + $0x1f0] ss:$8 sps:$4 sm:$0xff]  }
  0x3c   : > { %779 = vmatprep.subr.bf16.mxu0 %v2182_v1  ;;  %2035 = vmatprep.subr.bf16.mxu1 %v2182_v1 }
  0x3f   : > { %780 = vmatpush1.bf16.msra.mxu0 %v2076_v17  ;;  %2051 = vmatpush1.bf16.msra.mxu1 %v2076_v17  ;;  %v2376_v17 = vld [vmem:[%s2485_s2] ss:$0 sm:$0xff] }
  0x40   : > { %781 = vmatprep.subr.bf16.mxu0 %v2182_v1  ;;  %2036 = vmatprep.subr.bf16.mxu1 %v2182_v1  ;;  %v2150_v1 = vld [vmem:[%s2250_s7 + $0xc4] ss:$8 sps:$4 sm:$0xff]   ;;  %s1617_s7 = sshll.u32 %s2490_s20, 2 }
  0x41   : > { %s2386_s10 = scalar_lea.vmem %s2488_s5, %s1617_s7 }
  0x43   : > { %782 = vmatpush1.bf16.msra.mxu0 %v2077_v18  ;;  %2052 = vmatpush1.bf16.msra.mxu1 %v2077_v18 }
  0x46   : > { %784 = vmatmul.mubr.bf16.vlgmr.msra.gmra.mrb[0].mxu0 %v2078_v19  ;;  %912 = vmatmul.mubr.bf16.vlgmr.msra.gmra.mrb[0].mxu1 %v2081_v20 }
  0x47   : > { %791 = vmatprep.mubr.bf16.mxu0 %v2084_v21  ;;  %919 = vmatprep.mubr.bf16.mxu1 %v2086_v22 }
  0x4e   : > { %792 = vmatmul.mubr.bf16.gmra.mrb[4].mxu0 %v2088_v23  ;;  %920 = vmatmul.mubr.bf16.gmra.mrb[4].mxu1 %v2089_v24 }
  0x4f   : > { %799 = vmatprep.mubr.bf16.mxu0 %v2090_v25  ;;  %927 = vmatprep.mubr.bf16.mxu1 %v2092_v26 }
  0x56   : > { %800 = vmatmul.mubr.bf16.gmra.mrb[8].mxu0 %v2094_v27  ;;  %928 = vmatmul.mubr.bf16.gmra.mrb[8].mxu1 %v2095_v28 }
  0x57   : > { %807 = vmatprep.mubr.bf16.mxu0 %v2096_v29  ;;  %935 = vmatprep.mubr.bf16.mxu1 %v2098_v30 }
  0x5e   : > { %808 = vmatmul.mubr.bf16.gmra.mrb[12].mxu0 %v2100_v31  ;;  %936 = vmatmul.mubr.bf16.gmra.mrb[12].mxu1 %v2101_v32 }
  0x5f   : > { %815 = vmatprep.mubr.bf16.mxu0 %v2102_v33  ;;  %943 = vmatprep.mubr.bf16.mxu1 %v2104_v34 }
  0x66   : > { %816 = vmatmul.mubr.bf16.gmra.mrb[16].mxu0 %v2106_v35  ;;  %944 = vmatmul.mubr.bf16.gmra.mrb[16].mxu1 %v2107_v36 }
  0x67   : > { %823 = vmatprep.mubr.bf16.mxu0 %v2108_v37  ;;  %951 = vmatprep.mubr.bf16.mxu1 %v2110_v38 }
  0x6e   : > { %824 = vmatmul.mubr.bf16.gmra.mrb[20].mxu0 %v2112_v39  ;;  %952 = vmatmul.mubr.bf16.gmra.mrb[20].mxu1 %v2113_v40 }
  0x6f   : > { %831 = vmatprep.mubr.bf16.mxu0 %v2114_v41  ;;  %959 = vmatprep.mubr.bf16.mxu1 %v2116_v42 }
  0x76   : > { %832 = vmatmul.mubr.bf16.gmra.mrb[24].mxu0 %v2118_v43  ;;  %960 = vmatmul.mubr.bf16.gmra.mrb[24].mxu1 %v2119_v44 }
  0x77   : > { %839 = vmatprep.mubr.bf16.mxu0 %v2120_v45  ;;  %967 = vmatprep.mubr.bf16.mxu1 %v2122_v46 }
  0x7e   : > { %840 = vmatmul.mubr.bf16.gmra.mrb[28].mxu0 %v2124_v47  ;;  %968 = vmatmul.mubr.bf16.gmra.mrb[28].mxu1 %v2125_v48 }
  0x7f   : > { %847 = vmatprep.mubr.bf16.mxu0 %v2126_v49  ;;  %975 = vmatprep.mubr.bf16.mxu1 %v2128_v50 }
  0x86   : > { %848 = vmatmul.mubr.bf16.gmra.mrb[32].mxu0 %v2130_v51  ;;  %976 = vmatmul.mubr.bf16.gmra.mrb[32].mxu1 %v2131_v52 }
  0x87   : > { %855 = vmatprep.mubr.bf16.mxu0 %v2132_v53  ;;  %983 = vmatprep.mubr.bf16.mxu1 %v2134_v54 }
  0x8e   : > { %856 = vmatmul.mubr.bf16.gmra.mrb[36].mxu0 %v2136_v55  ;;  %984 = vmatmul.mubr.bf16.gmra.mrb[36].mxu1 %v2137_v56 }
  0x8f   : > { %863 = vmatprep.mubr.bf16.mxu0 %v2138_v57  ;;  %991 = vmatprep.mubr.bf16.mxu1 %v2140_v58 }
  0x96   : > { %864 = vmatmul.mubr.bf16.gmra.mrb[40].mxu0 %v2142_v59  ;;  %992 = vmatmul.mubr.bf16.gmra.mrb[40].mxu1 %v2143_v60 }
  0x97   : > { %871 = vmatprep.mubr.bf16.mxu0 %v2144_v61  ;;  %999 = vmatprep.mubr.bf16.mxu1 %v2146_v62 }
  0x9e   : > { %872 = vmatmul.mubr.bf16.gmra.mrb[44].mxu0 %v2148_v63  ;;  %1000 = vmatmul.mubr.bf16.gmra.mrb[44].mxu1 %v2149_v0 }
  0x9f   : > { %879 = vmatprep.mubr.bf16.mxu0 %v2150_v1  ;;  %1007 = vmatprep.mubr.bf16.mxu1 %v2152_v2 }
  0xa6   : > { %880 = vmatmul.mubr.bf16.gmra.mrb[48].mxu0 %v2154_v3  ;;  %1008 = vmatmul.mubr.bf16.gmra.mrb[48].mxu1 %v2155_v4 }
  0xa7   : > { %887 = vmatprep.mubr.bf16.mxu0 %v2156_v5  ;;  %1015 = vmatprep.mubr.bf16.mxu1 %v2158_v6 }
  0xae   : > { %888 = vmatmul.mubr.bf16.gmra.mrb[52].mxu0 %v2160_v7  ;;  %1016 = vmatmul.mubr.bf16.gmra.mrb[52].mxu1 %v2161_v8 }
  0xaf   : > { %895 = vmatprep.mubr.bf16.mxu0 %v2162_v9  ;;  %1023 = vmatprep.mubr.bf16.mxu1 %v2164_v10 }
  0xb6   : > { %896 = vmatmul.mubr.bf16.gmra.mrb[56].mxu0 %v2166_v11  ;;  %1024 = vmatmul.mubr.bf16.gmra.mrb[56].mxu1 %v2167_v12 }
  0xb7   : > { %903 = vmatprep.mubr.bf16.mxu0 %v2168_v13  ;;  %1031 = vmatprep.mubr.bf16.mxu1 %v2170_v14 }
  0xbe   : > { %904 = vmatmul.mubr.bf16.gmra.mrb[60].mxu0 %v2172_v15  ;;  %1032 = vmatmul.mubr.bf16.gmra.mrb[60].mxu1 %v2173_v16 }
 0x119   : > { %v785_v18 = vpop.f32.mrb[0].mxu0  ;;  %v913_v19 = vpop.f32.mrb[0].mxu1 }
 0x11a   : > { %v786_v20 = vadd.f32 %v2376_v17, %v785_v18  ;;  %v914_v21 = vadd.f32 %v2376_v17, %v913_v19  ;;  %v787_v22 = vpop.f32.mrb[1].mxu0  ;;  %v915_v23 = vpop.f32.mrb[1].mxu1 }
 0x11b   : > { %v788_v24 = vpop.f32.mrb[2].mxu0  ;;  %v916_v25 = vpop.f32.mrb[2].mxu1 }
 0x11c   : > { %v1104_v26 = vmul.f32 0.2, %v786_v20  ;;  %v1136_v27 = vmul.f32 0.2, %v914_v21  ;;  %v789_v28 = vadd.f32 %v2376_v17, %v788_v24  ;;  %v917_v29 = vadd.f32 %v2376_v17, %v916_v25  ;;  %v790_v30 = vpop.f32.mrb[3].mxu0  ;;  %v918_v31 = vpop.f32.mrb[3].mxu1 }
 0x11d   : > { %vm1040_vm0 = vcmp.gt.f32.partialorder %v786_v20, 0.0  ;;  %vm1072_vm1 = vcmp.gt.f32.partialorder %v914_v21, 0.0 }
 0x11e   : > { %vm1041_vm2 = vcmp.gt.f32.partialorder %v789_v28, 0.0  ;;  %v1105_v32 = vmul.f32 0.2, %v789_v28  ;;  %vm1073_vm3 = vcmp.gt.f32.partialorder %v917_v29, 0.0  ;;  %v1137_v33 = vmul.f32 0.2, %v917_v29 }
 0x11f   : > { %v1168_v34 = vsel %vm1040_vm0, %v786_v20, %v1104_v26  ;;  %v1200_v35 = vsel %vm1072_vm1, %v914_v21, %v1136_v27 }
 0x120   : > { %v1169_v36 = vsel %vm1041_vm2, %v789_v28, %v1105_v32  ;;  %v1201_v37 = vsel %vm1073_vm3, %v917_v29, %v1137_v33 }
 0x121   : > { %v793_v38 = vpop.f32.mrb[4].mxu0  ;;  %v921_v39 = vpop.f32.mrb[4].mxu1  ;;  %v1833_v40 = vpack.c.bf16 %v1169_v36, %v1168_v34  ;;  %v1913_v41 = vpack.c.bf16 %v1201_v37, %v1200_v35 }
 0x122   : > { %v794_v42 = vadd.f32 %v2376_v17, %v793_v38  ;;  %v922_v43 = vadd.f32 %v2376_v17, %v921_v39  ;;  %v795_v44 = vpop.f32.mrb[5].mxu0  ;;  %v923_v45 = vpop.f32.mrb[5].mxu1 }
 0x123   : > { %v796_v46 = vpop.f32.mrb[6].mxu0  ;;  %v924_v47 = vpop.f32.mrb[6].mxu1  ;;  %1834 = vst [vmem:[%s2386_s10] sm:$0xff] %v1833_v40   ;;  %2005 = vst [vmem:[%s2386_s10 + $0x80] sm:$0xff] %v1913_v41  }
 0x124   : > { %v1106_v48 = vmul.f32 0.2, %v794_v42  ;;  %v1138_v49 = vmul.f32 0.2, %v922_v43  ;;  %v797_v50 = vadd.f32 %v2376_v17, %v796_v46  ;;  %v925_v51 = vadd.f32 %v2376_v17, %v924_v47  ;;  %v798_v52 = vpop.f32.mrb[7].mxu0  ;;  %v926_v53 = vpop.f32.mrb[7].mxu1 }
 0x125   : > { %vm1042_vm4 = vcmp.gt.f32.partialorder %v794_v42, 0.0  ;;  %vm1074_vm5 = vcmp.gt.f32.partialorder %v922_v43, 0.0 }
 0x126   : > { %vm1043_vm6 = vcmp.gt.f32.partialorder %v797_v50, 0.0  ;;  %v1107_v54 = vmul.f32 0.2, %v797_v50  ;;  %vm1075_vm7 = vcmp.gt.f32.partialorder %v925_v51, 0.0  ;;  %v1139_v55 = vmul.f32 0.2, %v925_v51 }
 0x127   : > { %v1170_v56 = vsel %vm1042_vm4, %v794_v42, %v1106_v48  ;;  %v1202_v57 = vsel %vm1074_vm5, %v922_v43, %v1138_v49 }
 0x128   : > { %v1171_v58 = vsel %vm1043_vm6, %v797_v50, %v1107_v54  ;;  %v1203_v59 = vsel %vm1075_vm7, %v925_v51, %v1139_v55 }
 0x129   : > { %v801_v60 = vpop.f32.mrb[8].mxu0  ;;  %v929_v61 = vpop.f32.mrb[8].mxu1  ;;  %v1838_v62 = vpack.c.bf16 %v1171_v58, %v1170_v56  ;;  %v1918_v63 = vpack.c.bf16 %v1203_v59, %v1202_v57 }
 0x12a   : > { %v802_v0 = vadd.f32 %v2376_v17, %v801_v60  ;;  %v930_v1 = vadd.f32 %v2376_v17, %v929_v61  ;;  %v803_v2 = vpop.f32.mrb[9].mxu0  ;;  %v931_v3 = vpop.f32.mrb[9].mxu1 }
 0x12b   : > { %v804_v4 = vpop.f32.mrb[10].mxu0  ;;  %v932_v5 = vpop.f32.mrb[10].mxu1  ;;  %1990 = vst [vmem:[%s2386_s10 + $0x8] sm:$0xff] %v1838_v62   ;;  %2006 = vst [vmem:[%s2386_s10 + $0x88] sm:$0xff] %v1918_v63  }
 0x12c   : > { %v1108_v6 = vmul.f32 0.2, %v802_v0  ;;  %v1140_v7 = vmul.f32 0.2, %v930_v1  ;;  %v805_v8 = vadd.f32 %v2376_v17, %v804_v4  ;;  %v933_v9 = vadd.f32 %v2376_v17, %v932_v5  ;;  %v806_v10 = vpop.f32.mrb[11].mxu0  ;;  %v934_v11 = vpop.f32.mrb[11].mxu1 }
 0x12d   : > { %vm1044_vm8 = vcmp.gt.f32.partialorder %v802_v0, 0.0  ;;  %vm1076_vm9 = vcmp.gt.f32.partialorder %v930_v1, 0.0 }
 0x12e   : > { %vm1045_vm10 = vcmp.gt.f32.partialorder %v805_v8, 0.0  ;;  %v1109_v12 = vmul.f32 0.2, %v805_v8  ;;  %vm1077_vm11 = vcmp.gt.f32.partialorder %v933_v9, 0.0  ;;  %v1141_v13 = vmul.f32 0.2, %v933_v9 }
 0x12f   : > { %v1172_v14 = vsel %vm1044_vm8, %v802_v0, %v1108_v6  ;;  %v1204_v15 = vsel %vm1076_vm9, %v930_v1, %v1140_v7 }
 0x130   : > { %v1173_v16 = vsel %vm1045_vm10, %v805_v8, %v1109_v12  ;;  %v1205_v18 = vsel %vm1077_vm11, %v933_v9, %v1141_v13 }
 0x131   : > { %v809_v19 = vpop.f32.mrb[12].mxu0  ;;  %v937_v20 = vpop.f32.mrb[12].mxu1  ;;  %v1843_v21 = vpack.c.bf16 %v1173_v16, %v1172_v14  ;;  %v1923_v22 = vpack.c.bf16 %v1205_v18, %v1204_v15 }
 0x132   : > { %v810_v23 = vadd.f32 %v2376_v17, %v809_v19  ;;  %v938_v24 = vadd.f32 %v2376_v17, %v937_v20  ;;  %v811_v25 = vpop.f32.mrb[13].mxu0  ;;  %v939_v26 = vpop.f32.mrb[13].mxu1 }
 0x133   : > { %v812_v27 = vpop.f32.mrb[14].mxu0  ;;  %v940_v28 = vpop.f32.mrb[14].mxu1  ;;  %1991 = vst [vmem:[%s2386_s10 + $0x10] sm:$0xff] %v1843_v21   ;;  %2007 = vst [vmem:[%s2386_s10 + $0x90] sm:$0xff] %v1923_v22  }
 0x134   : > { %v1110_v29 = vmul.f32 0.2, %v810_v23  ;;  %v1142_v30 = vmul.f32 0.2, %v938_v24  ;;  %v813_v31 = vadd.f32 %v2376_v17, %v812_v27  ;;  %v941_v32 = vadd.f32 %v2376_v17, %v940_v28  ;;  %v814_v33 = vpop.f32.mrb[15].mxu0  ;;  %v942_v34 = vpop.f32.mrb[15].mxu1 }
 0x135   : > { %vm1046_vm12 = vcmp.gt.f32.partialorder %v810_v23, 0.0  ;;  %vm1078_vm13 = vcmp.gt.f32.partialorder %v938_v24, 0.0 }
 0x136   : > { %vm1047_vm14 = vcmp.gt.f32.partialorder %v813_v31, 0.0  ;;  %v1111_v35 = vmul.f32 0.2, %v813_v31  ;;  %vm1079_vm15 = vcmp.gt.f32.partialorder %v941_v32, 0.0  ;;  %v1143_v36 = vmul.f32 0.2, %v941_v32 }
 0x137   : > { %v1174_v37 = vsel %vm1046_vm12, %v810_v23, %v1110_v29  ;;  %v1206_v38 = vsel %vm1078_vm13, %v938_v24, %v1142_v30 }
 0x138   : > { %v1175_v39 = vsel %vm1047_vm14, %v813_v31, %v1111_v35  ;;  %v1207_v40 = vsel %vm1079_vm15, %v941_v32, %v1143_v36 }
 0x139   : > { %v817_v41 = vpop.f32.mrb[16].mxu0  ;;  %v945_v42 = vpop.f32.mrb[16].mxu1  ;;  %v1848_v43 = vpack.c.bf16 %v1175_v39, %v1174_v37  ;;  %v1928_v44 = vpack.c.bf16 %v1207_v40, %v1206_v38 }
 0x13a   : > { %v818_v45 = vadd.f32 %v2376_v17, %v817_v41  ;;  %v946_v46 = vadd.f32 %v2376_v17, %v945_v42  ;;  %v819_v47 = vpop.f32.mrb[17].mxu0  ;;  %v947_v48 = vpop.f32.mrb[17].mxu1 }
 0x13b   : > { %v820_v49 = vpop.f32.mrb[18].mxu0  ;;  %v948_v50 = vpop.f32.mrb[18].mxu1  ;;  %1992 = vst [vmem:[%s2386_s10 + $0x18] sm:$0xff] %v1848_v43   ;;  %2008 = vst [vmem:[%s2386_s10 + $0x98] sm:$0xff] %v1928_v44  }
 0x13c   : > { %v1112_v51 = vmul.f32 0.2, %v818_v45  ;;  %v1144_v52 = vmul.f32 0.2, %v946_v46  ;;  %v821_v53 = vadd.f32 %v2376_v17, %v820_v49  ;;  %v949_v54 = vadd.f32 %v2376_v17, %v948_v50  ;;  %v822_v55 = vpop.f32.mrb[19].mxu0  ;;  %v950_v56 = vpop.f32.mrb[19].mxu1 }
 0x13d   : > { %vm1048_vm0 = vcmp.gt.f32.partialorder %v818_v45, 0.0  ;;  %vm1080_vm1 = vcmp.gt.f32.partialorder %v946_v46, 0.0 }
 0x13e   : > { %vm1049_vm2 = vcmp.gt.f32.partialorder %v821_v53, 0.0  ;;  %v1113_v57 = vmul.f32 0.2, %v821_v53  ;;  %vm1081_vm3 = vcmp.gt.f32.partialorder %v949_v54, 0.0  ;;  %v1145_v58 = vmul.f32 0.2, %v949_v54 }
 0x13f   : > { %v1176_v59 = vsel %vm1048_vm0, %v818_v45, %v1112_v51  ;;  %v1208_v60 = vsel %vm1080_vm1, %v946_v46, %v1144_v52 }
 0x140   : > { %v1177_v61 = vsel %vm1049_vm2, %v821_v53, %v1113_v57  ;;  %v1209_v62 = vsel %vm1081_vm3, %v949_v54, %v1145_v58 }
 0x141   : > { %v825_v63 = vpop.f32.mrb[20].mxu0  ;;  %v953_v0 = vpop.f32.mrb[20].mxu1  ;;  %v1853_v1 = vpack.c.bf16 %v1177_v61, %v1176_v59  ;;  %v1933_v2 = vpack.c.bf16 %v1209_v62, %v1208_v60 }
 0x142   : > { %v826_v3 = vadd.f32 %v2376_v17, %v825_v63  ;;  %v954_v4 = vadd.f32 %v2376_v17, %v953_v0  ;;  %v827_v5 = vpop.f32.mrb[21].mxu0  ;;  %v955_v6 = vpop.f32.mrb[21].mxu1 }
 0x143   : > { %v828_v7 = vpop.f32.mrb[22].mxu0  ;;  %v956_v8 = vpop.f32.mrb[22].mxu1  ;;  %1993 = vst [vmem:[%s2386_s10 + $0x20] sm:$0xff] %v1853_v1   ;;  %2009 = vst [vmem:[%s2386_s10 + $0xa0] sm:$0xff] %v1933_v2  }
 0x144   : > { %v1114_v9 = vmul.f32 0.2, %v826_v3  ;;  %v1146_v10 = vmul.f32 0.2, %v954_v4  ;;  %v829_v11 = vadd.f32 %v2376_v17, %v828_v7  ;;  %v957_v12 = vadd.f32 %v2376_v17, %v956_v8  ;;  %v830_v13 = vpop.f32.mrb[23].mxu0  ;;  %v958_v14 = vpop.f32.mrb[23].mxu1 }
 0x145   : > { %vm1050_vm4 = vcmp.gt.f32.partialorder %v826_v3, 0.0  ;;  %vm1082_vm5 = vcmp.gt.f32.partialorder %v954_v4, 0.0 }
 0x146   : > { %vm1051_vm6 = vcmp.gt.f32.partialorder %v829_v11, 0.0  ;;  %v1115_v15 = vmul.f32 0.2, %v829_v11  ;;  %vm1083_vm7 = vcmp.gt.f32.partialorder %v957_v12, 0.0  ;;  %v1147_v16 = vmul.f32 0.2, %v957_v12 }
 0x147   : > { %v1178_v18 = vsel %vm1050_vm4, %v826_v3, %v1114_v9  ;;  %v1210_v19 = vsel %vm1082_vm5, %v954_v4, %v1146_v10 }
 0x148   : > { %v1179_v20 = vsel %vm1051_vm6, %v829_v11, %v1115_v15  ;;  %v1211_v21 = vsel %vm1083_vm7, %v957_v12, %v1147_v16 }
 0x149   : > { %v833_v22 = vpop.f32.mrb[24].mxu0  ;;  %v961_v23 = vpop.f32.mrb[24].mxu1  ;;  %v1858_v24 = vpack.c.bf16 %v1179_v20, %v1178_v18  ;;  %v1938_v25 = vpack.c.bf16 %v1211_v21, %v1210_v19 }
 0x14a   : > { %v834_v26 = vadd.f32 %v2376_v17, %v833_v22  ;;  %v962_v27 = vadd.f32 %v2376_v17, %v961_v23  ;;  %v835_v28 = vpop.f32.mrb[25].mxu0  ;;  %v963_v29 = vpop.f32.mrb[25].mxu1 }
 0x14b   : > { %v836_v30 = vpop.f32.mrb[26].mxu0  ;;  %v964_v31 = vpop.f32.mrb[26].mxu1  ;;  %1994 = vst [vmem:[%s2386_s10 + $0x28] sm:$0xff] %v1858_v24   ;;  %2010 = vst [vmem:[%s2386_s10 + $0xa8] sm:$0xff] %v1938_v25  }
 0x14c   : > { %v1116_v32 = vmul.f32 0.2, %v834_v26  ;;  %v1148_v33 = vmul.f32 0.2, %v962_v27  ;;  %v837_v34 = vadd.f32 %v2376_v17, %v836_v30  ;;  %v965_v35 = vadd.f32 %v2376_v17, %v964_v31  ;;  %v838_v36 = vpop.f32.mrb[27].mxu0  ;;  %v966_v37 = vpop.f32.mrb[27].mxu1 }
 0x14d   : > { %vm1052_vm8 = vcmp.gt.f32.partialorder %v834_v26, 0.0  ;;  %vm1084_vm9 = vcmp.gt.f32.partialorder %v962_v27, 0.0 }
 0x14e   : > { %vm1053_vm10 = vcmp.gt.f32.partialorder %v837_v34, 0.0  ;;  %v1117_v38 = vmul.f32 0.2, %v837_v34  ;;  %vm1085_vm11 = vcmp.gt.f32.partialorder %v965_v35, 0.0  ;;  %v1149_v39 = vmul.f32 0.2, %v965_v35 }
 0x14f   : > { %v1180_v40 = vsel %vm1052_vm8, %v834_v26, %v1116_v32  ;;  %v1212_v41 = vsel %vm1084_vm9, %v962_v27, %v1148_v33 }
 0x150   : > { %v1181_v42 = vsel %vm1053_vm10, %v837_v34, %v1117_v38  ;;  %v1213_v43 = vsel %vm1085_vm11, %v965_v35, %v1149_v39 }
 0x151   : > { %v841_v44 = vpop.f32.mrb[28].mxu0  ;;  %v969_v45 = vpop.f32.mrb[28].mxu1  ;;  %v1863_v46 = vpack.c.bf16 %v1181_v42, %v1180_v40  ;;  %v1943_v47 = vpack.c.bf16 %v1213_v43, %v1212_v41 }
 0x152   : > { %v842_v48 = vadd.f32 %v2376_v17, %v841_v44  ;;  %v970_v49 = vadd.f32 %v2376_v17, %v969_v45  ;;  %v843_v50 = vpop.f32.mrb[29].mxu0  ;;  %v971_v51 = vpop.f32.mrb[29].mxu1 }
 0x153   : > { %v844_v52 = vpop.f32.mrb[30].mxu0  ;;  %v972_v53 = vpop.f32.mrb[30].mxu1  ;;  %1995 = vst [vmem:[%s2386_s10 + $0x30] sm:$0xff] %v1863_v46   ;;  %2011 = vst [vmem:[%s2386_s10 + $0xb0] sm:$0xff] %v1943_v47  }
 0x154   : > { %v1118_v54 = vmul.f32 0.2, %v842_v48  ;;  %v1150_v55 = vmul.f32 0.2, %v970_v49  ;;  %v845_v56 = vadd.f32 %v2376_v17, %v844_v52  ;;  %v973_v57 = vadd.f32 %v2376_v17, %v972_v53  ;;  %v846_v58 = vpop.f32.mrb[31].mxu0  ;;  %v974_v59 = vpop.f32.mrb[31].mxu1 }
 0x155   : > { %vm1054_vm12 = vcmp.gt.f32.partialorder %v842_v48, 0.0  ;;  %vm1086_vm13 = vcmp.gt.f32.partialorder %v970_v49, 0.0 }
 0x156   : > { %vm1055_vm14 = vcmp.gt.f32.partialorder %v845_v56, 0.0  ;;  %v1119_v60 = vmul.f32 0.2, %v845_v56  ;;  %vm1087_vm15 = vcmp.gt.f32.partialorder %v973_v57, 0.0  ;;  %v1151_v61 = vmul.f32 0.2, %v973_v57 }
 0x157   : > { %v1182_v62 = vsel %vm1054_vm12, %v842_v48, %v1118_v54  ;;  %v1214_v63 = vsel %vm1086_vm13, %v970_v49, %v1150_v55 }
 0x158   : > { %v1183_v0 = vsel %vm1055_vm14, %v845_v56, %v1119_v60  ;;  %v1215_v1 = vsel %vm1087_vm15, %v973_v57, %v1151_v61 }
 0x159   : > { %v849_v2 = vpop.f32.mrb[32].mxu0  ;;  %v977_v3 = vpop.f32.mrb[32].mxu1  ;;  %v1868_v4 = vpack.c.bf16 %v1183_v0, %v1182_v62  ;;  %v1948_v5 = vpack.c.bf16 %v1215_v1, %v1214_v63 }
 0x15a   : > { %v850_v6 = vadd.f32 %v2376_v17, %v849_v2  ;;  %v978_v7 = vadd.f32 %v2376_v17, %v977_v3  ;;  %v851_v8 = vpop.f32.mrb[33].mxu0  ;;  %v979_v9 = vpop.f32.mrb[33].mxu1 }
 0x15b   : > { %v852_v10 = vpop.f32.mrb[34].mxu0  ;;  %v980_v11 = vpop.f32.mrb[34].mxu1  ;;  %1996 = vst [vmem:[%s2386_s10 + $0x38] sm:$0xff] %v1868_v4   ;;  %2012 = vst [vmem:[%s2386_s10 + $0xb8] sm:$0xff] %v1948_v5  }
 0x15c   : > { %v1120_v12 = vmul.f32 0.2, %v850_v6  ;;  %v1152_v13 = vmul.f32 0.2, %v978_v7  ;;  %v853_v14 = vadd.f32 %v2376_v17, %v852_v10  ;;  %v981_v15 = vadd.f32 %v2376_v17, %v980_v11  ;;  %v854_v16 = vpop.f32.mrb[35].mxu0  ;;  %v982_v18 = vpop.f32.mrb[35].mxu1 }
 0x15d   : > { %vm1056_vm0 = vcmp.gt.f32.partialorder %v850_v6, 0.0  ;;  %vm1088_vm1 = vcmp.gt.f32.partialorder %v978_v7, 0.0 }
 0x15e   : > { %vm1057_vm2 = vcmp.gt.f32.partialorder %v853_v14, 0.0  ;;  %v1121_v19 = vmul.f32 0.2, %v853_v14  ;;  %vm1089_vm3 = vcmp.gt.f32.partialorder %v981_v15, 0.0  ;;  %v1153_v20 = vmul.f32 0.2, %v981_v15 }
 0x15f   : > { %v1184_v21 = vsel %vm1056_vm0, %v850_v6, %v1120_v12  ;;  %v1216_v22 = vsel %vm1088_vm1, %v978_v7, %v1152_v13 }
 0x160   : > { %v1185_v23 = vsel %vm1057_vm2, %v853_v14, %v1121_v19  ;;  %v1217_v24 = vsel %vm1089_vm3, %v981_v15, %v1153_v20 }
 0x161   : > { %v857_v25 = vpop.f32.mrb[36].mxu0  ;;  %v985_v26 = vpop.f32.mrb[36].mxu1  ;;  %v1873_v27 = vpack.c.bf16 %v1185_v23, %v1184_v21  ;;  %v1953_v28 = vpack.c.bf16 %v1217_v24, %v1216_v22 }
 0x162   : > { %v858_v29 = vadd.f32 %v2376_v17, %v857_v25  ;;  %v986_v30 = vadd.f32 %v2376_v17, %v985_v26  ;;  %v859_v31 = vpop.f32.mrb[37].mxu0  ;;  %v987_v32 = vpop.f32.mrb[37].mxu1 }
 0x163   : > { %v860_v33 = vpop.f32.mrb[38].mxu0  ;;  %v988_v34 = vpop.f32.mrb[38].mxu1  ;;  %1997 = vst [vmem:[%s2386_s10 + $0x40] sm:$0xff] %v1873_v27   ;;  %2013 = vst [vmem:[%s2386_s10 + $0xc0] sm:$0xff] %v1953_v28  }
 0x164   : > { %v1122_v35 = vmul.f32 0.2, %v858_v29  ;;  %v1154_v36 = vmul.f32 0.2, %v986_v30  ;;  %v861_v37 = vadd.f32 %v2376_v17, %v860_v33  ;;  %v989_v38 = vadd.f32 %v2376_v17, %v988_v34  ;;  %v862_v39 = vpop.f32.mrb[39].mxu0  ;;  %v990_v40 = vpop.f32.mrb[39].mxu1 }
 0x165   : > { %vm1058_vm4 = vcmp.gt.f32.partialorder %v858_v29, 0.0  ;;  %vm1090_vm5 = vcmp.gt.f32.partialorder %v986_v30, 0.0 }
 0x166   : > { %vm1059_vm6 = vcmp.gt.f32.partialorder %v861_v37, 0.0  ;;  %v1123_v41 = vmul.f32 0.2, %v861_v37  ;;  %vm1091_vm7 = vcmp.gt.f32.partialorder %v989_v38, 0.0  ;;  %v1155_v42 = vmul.f32 0.2, %v989_v38 }
 0x167   : > { %v1186_v43 = vsel %vm1058_vm4, %v858_v29, %v1122_v35  ;;  %v1218_v44 = vsel %vm1090_vm5, %v986_v30, %v1154_v36 }
 0x168   : > { %v1187_v45 = vsel %vm1059_vm6, %v861_v37, %v1123_v41  ;;  %v1219_v46 = vsel %vm1091_vm7, %v989_v38, %v1155_v42 }
 0x169   : > { %v865_v47 = vpop.f32.mrb[40].mxu0  ;;  %v993_v48 = vpop.f32.mrb[40].mxu1  ;;  %v1878_v49 = vpack.c.bf16 %v1187_v45, %v1186_v43  ;;  %v1958_v50 = vpack.c.bf16 %v1219_v46, %v1218_v44 }
 0x16a   : > { %v866_v51 = vadd.f32 %v2376_v17, %v865_v47  ;;  %v994_v52 = vadd.f32 %v2376_v17, %v993_v48  ;;  %v867_v53 = vpop.f32.mrb[41].mxu0  ;;  %v995_v54 = vpop.f32.mrb[41].mxu1 }
 0x16b   : > { %v868_v55 = vpop.f32.mrb[42].mxu0  ;;  %v996_v56 = vpop.f32.mrb[42].mxu1  ;;  %1998 = vst [vmem:[%s2386_s10 + $0x48] sm:$0xff] %v1878_v49   ;;  %2014 = vst [vmem:[%s2386_s10 + $0xc8] sm:$0xff] %v1958_v50  }
 0x16c   : > { %v1124_v57 = vmul.f32 0.2, %v866_v51  ;;  %v1156_v58 = vmul.f32 0.2, %v994_v52  ;;  %v869_v59 = vadd.f32 %v2376_v17, %v868_v55  ;;  %v997_v60 = vadd.f32 %v2376_v17, %v996_v56  ;;  %v870_v61 = vpop.f32.mrb[43].mxu0  ;;  %v998_v62 = vpop.f32.mrb[43].mxu1 }
 0x16d   : > { %vm1060_vm8 = vcmp.gt.f32.partialorder %v866_v51, 0.0  ;;  %vm1092_vm9 = vcmp.gt.f32.partialorder %v994_v52, 0.0 }
 0x16e   : > { %vm1061_vm10 = vcmp.gt.f32.partialorder %v869_v59, 0.0  ;;  %v1125_v63 = vmul.f32 0.2, %v869_v59  ;;  %vm1093_vm11 = vcmp.gt.f32.partialorder %v997_v60, 0.0  ;;  %v1157_v0 = vmul.f32 0.2, %v997_v60 }
 0x16f   : > { %v1188_v1 = vsel %vm1060_vm8, %v866_v51, %v1124_v57  ;;  %v1220_v2 = vsel %vm1092_vm9, %v994_v52, %v1156_v58 }
 0x170   : > { %v1189_v3 = vsel %vm1061_vm10, %v869_v59, %v1125_v63  ;;  %v1221_v4 = vsel %vm1093_vm11, %v997_v60, %v1157_v0 }
 0x171   : > { %v873_v5 = vpop.f32.mrb[44].mxu0  ;;  %v1001_v6 = vpop.f32.mrb[44].mxu1  ;;  %v1883_v7 = vpack.c.bf16 %v1189_v3, %v1188_v1  ;;  %v1963_v8 = vpack.c.bf16 %v1221_v4, %v1220_v2 }
 0x172   : > { %v874_v9 = vadd.f32 %v2376_v17, %v873_v5  ;;  %v1002_v10 = vadd.f32 %v2376_v17, %v1001_v6  ;;  %v875_v11 = vpop.f32.mrb[45].mxu0  ;;  %v1003_v12 = vpop.f32.mrb[45].mxu1 }
 0x173   : > { %v876_v13 = vpop.f32.mrb[46].mxu0  ;;  %v1004_v14 = vpop.f32.mrb[46].mxu1  ;;  %1999 = vst [vmem:[%s2386_s10 + $0x50] sm:$0xff] %v1883_v7   ;;  %2015 = vst [vmem:[%s2386_s10 + $0xd0] sm:$0xff] %v1963_v8  }
 0x174   : > { %v1126_v15 = vmul.f32 0.2, %v874_v9  ;;  %v1158_v16 = vmul.f32 0.2, %v1002_v10  ;;  %v877_v18 = vadd.f32 %v2376_v17, %v876_v13  ;;  %v1005_v19 = vadd.f32 %v2376_v17, %v1004_v14  ;;  %v878_v20 = vpop.f32.mrb[47].mxu0  ;;  %v1006_v21 = vpop.f32.mrb[47].mxu1 }
 0x175   : > { %vm1062_vm12 = vcmp.gt.f32.partialorder %v874_v9, 0.0  ;;  %vm1094_vm13 = vcmp.gt.f32.partialorder %v1002_v10, 0.0 }
 0x176   : > { %vm1063_vm14 = vcmp.gt.f32.partialorder %v877_v18, 0.0  ;;  %v1127_v22 = vmul.f32 0.2, %v877_v18  ;;  %vm1095_vm15 = vcmp.gt.f32.partialorder %v1005_v19, 0.0  ;;  %v1159_v23 = vmul.f32 0.2, %v1005_v19 }
 0x177   : > { %v1190_v24 = vsel %vm1062_vm12, %v874_v9, %v1126_v15  ;;  %v1222_v25 = vsel %vm1094_vm13, %v1002_v10, %v1158_v16 }
 0x178   : > { %v1191_v26 = vsel %vm1063_vm14, %v877_v18, %v1127_v22  ;;  %v1223_v27 = vsel %vm1095_vm15, %v1005_v19, %v1159_v23 }
 0x179   : > { %v881_v28 = vpop.f32.mrb[48].mxu0  ;;  %v1009_v29 = vpop.f32.mrb[48].mxu1  ;;  %v1888_v30 = vpack.c.bf16 %v1191_v26, %v1190_v24  ;;  %v1968_v31 = vpack.c.bf16 %v1223_v27, %v1222_v25 }
 0x17a   : > { %v882_v32 = vadd.f32 %v2376_v17, %v881_v28  ;;  %v1010_v33 = vadd.f32 %v2376_v17, %v1009_v29  ;;  %v883_v34 = vpop.f32.mrb[49].mxu0  ;;  %v1011_v35 = vpop.f32.mrb[49].mxu1 }
 0x17b   : > { %v884_v36 = vpop.f32.mrb[50].mxu0  ;;  %v1012_v37 = vpop.f32.mrb[50].mxu1  ;;  %2000 = vst [vmem:[%s2386_s10 + $0x58] sm:$0xff] %v1888_v30   ;;  %2016 = vst [vmem:[%s2386_s10 + $0xd8] sm:$0xff] %v1968_v31  }
 0x17c   : > { %v1128_v38 = vmul.f32 0.2, %v882_v32  ;;  %v1160_v39 = vmul.f32 0.2, %v1010_v33  ;;  %v885_v40 = vadd.f32 %v2376_v17, %v884_v36  ;;  %v1013_v41 = vadd.f32 %v2376_v17, %v1012_v37  ;;  %v886_v42 = vpop.f32.mrb[51].mxu0  ;;  %v1014_v43 = vpop.f32.mrb[51].mxu1 }
 0x17d   : > { %vm1064_vm0 = vcmp.gt.f32.partialorder %v882_v32, 0.0  ;;  %vm1096_vm1 = vcmp.gt.f32.partialorder %v1010_v33, 0.0 }
 0x17e   : > { %vm1065_vm2 = vcmp.gt.f32.partialorder %v885_v40, 0.0  ;;  %v1129_v44 = vmul.f32 0.2, %v885_v40  ;;  %vm1097_vm3 = vcmp.gt.f32.partialorder %v1013_v41, 0.0  ;;  %v1161_v45 = vmul.f32 0.2, %v1013_v41 }
 0x17f   : > { %v1192_v46 = vsel %vm1064_vm0, %v882_v32, %v1128_v38  ;;  %v1224_v47 = vsel %vm1096_vm1, %v1010_v33, %v1160_v39 }
 0x180   : > { %v1193_v48 = vsel %vm1065_vm2, %v885_v40, %v1129_v44  ;;  %v1225_v49 = vsel %vm1097_vm3, %v1013_v41, %v1161_v45 }
 0x181   : > { %v889_v50 = vpop.f32.mrb[52].mxu0  ;;  %v1017_v51 = vpop.f32.mrb[52].mxu1  ;;  %v1893_v52 = vpack.c.bf16 %v1193_v48, %v1192_v46  ;;  %v1973_v53 = vpack.c.bf16 %v1225_v49, %v1224_v47 }
 0x182   : > { %v890_v54 = vadd.f32 %v2376_v17, %v889_v50  ;;  %v1018_v55 = vadd.f32 %v2376_v17, %v1017_v51  ;;  %v891_v56 = vpop.f32.mrb[53].mxu0  ;;  %v1019_v57 = vpop.f32.mrb[53].mxu1 }
 0x183   : > { %v892_v58 = vpop.f32.mrb[54].mxu0  ;;  %v1020_v59 = vpop.f32.mrb[54].mxu1  ;;  %2001 = vst [vmem:[%s2386_s10 + $0x60] sm:$0xff] %v1893_v52   ;;  %2017 = vst [vmem:[%s2386_s10 + $0xe0] sm:$0xff] %v1973_v53  }
 0x184   : > { %v1130_v60 = vmul.f32 0.2, %v890_v54  ;;  %v1162_v61 = vmul.f32 0.2, %v1018_v55  ;;  %v893_v62 = vadd.f32 %v2376_v17, %v892_v58  ;;  %v1021_v63 = vadd.f32 %v2376_v17, %v1020_v59  ;;  %v894_v0 = vpop.f32.mrb[55].mxu0  ;;  %v1022_v1 = vpop.f32.mrb[55].mxu1 }
 0x185   : > { %vm1066_vm4 = vcmp.gt.f32.partialorder %v890_v54, 0.0  ;;  %vm1098_vm5 = vcmp.gt.f32.partialorder %v1018_v55, 0.0 }
 0x186   : > { %vm1067_vm6 = vcmp.gt.f32.partialorder %v893_v62, 0.0  ;;  %v1131_v2 = vmul.f32 0.2, %v893_v62  ;;  %vm1099_vm7 = vcmp.gt.f32.partialorder %v1021_v63, 0.0  ;;  %v1163_v3 = vmul.f32 0.2, %v1021_v63 }
 0x187   : > { %v1194_v4 = vsel %vm1066_vm4, %v890_v54, %v1130_v60  ;;  %v1226_v5 = vsel %vm1098_vm5, %v1018_v55, %v1162_v61 }
 0x188   : > { %v1195_v6 = vsel %vm1067_vm6, %v893_v62, %v1131_v2  ;;  %v1227_v7 = vsel %vm1099_vm7, %v1021_v63, %v1163_v3 }
 0x189   : > { %v897_v8 = vpop.f32.mrb[56].mxu0  ;;  %v1025_v9 = vpop.f32.mrb[56].mxu1  ;;  %v1898_v10 = vpack.c.bf16 %v1195_v6, %v1194_v4  ;;  %v1978_v11 = vpack.c.bf16 %v1227_v7, %v1226_v5 }
 0x18a   : > { %v898_v12 = vadd.f32 %v2376_v17, %v897_v8  ;;  %v1026_v13 = vadd.f32 %v2376_v17, %v1025_v9  ;;  %v899_v14 = vpop.f32.mrb[57].mxu0  ;;  %v1027_v15 = vpop.f32.mrb[57].mxu1 }
 0x18b   : > { %v900_v16 = vpop.f32.mrb[58].mxu0  ;;  %v1028_v18 = vpop.f32.mrb[58].mxu1  ;;  %2002 = vst [vmem:[%s2386_s10 + $0x68] sm:$0xff] %v1898_v10   ;;  %2018 = vst [vmem:[%s2386_s10 + $0xe8] sm:$0xff] %v1978_v11  }
 0x18c   : > { %v1132_v19 = vmul.f32 0.2, %v898_v12  ;;  %v1164_v20 = vmul.f32 0.2, %v1026_v13  ;;  %v901_v21 = vadd.f32 %v2376_v17, %v900_v16  ;;  %v1029_v22 = vadd.f32 %v2376_v17, %v1028_v18  ;;  %v902_v23 = vpop.f32.mrb[59].mxu0  ;;  %v1030_v24 = vpop.f32.mrb[59].mxu1 }
 0x18d   : > { %vm1068_vm8 = vcmp.gt.f32.partialorder %v898_v12, 0.0  ;;  %vm1100_vm9 = vcmp.gt.f32.partialorder %v1026_v13, 0.0 }
 0x18e   : > { %vm1069_vm10 = vcmp.gt.f32.partialorder %v901_v21, 0.0  ;;  %v1133_v25 = vmul.f32 0.2, %v901_v21  ;;  %vm1101_vm11 = vcmp.gt.f32.partialorder %v1029_v22, 0.0  ;;  %v1165_v26 = vmul.f32 0.2, %v1029_v22 }
 0x18f   : > { %v1196_v27 = vsel %vm1068_vm8, %v898_v12, %v1132_v19  ;;  %v1228_v28 = vsel %vm1100_vm9, %v1026_v13, %v1164_v20 }
 0x190   : > { %v1197_v29 = vsel %vm1069_vm10, %v901_v21, %v1133_v25  ;;  %v1229_v30 = vsel %vm1101_vm11, %v1029_v22, %v1165_v26 }
 0x191   : > { %v905_v31 = vpop.f32.mrb[60].mxu0  ;;  %v1033_v32 = vpop.f32.mrb[60].mxu1  ;;  %v1903_v33 = vpack.c.bf16 %v1197_v29, %v1196_v27  ;;  %v1983_v34 = vpack.c.bf16 %v1229_v30, %v1228_v28 }
 0x192   : > { %v906_v35 = vadd.f32 %v2376_v17, %v905_v31  ;;  %v1034_v36 = vadd.f32 %v2376_v17, %v1033_v32  ;;  %v907_v37 = vpop.f32.mrb[61].mxu0  ;;  %v1035_v38 = vpop.f32.mrb[61].mxu1 }
 0x193   : > { %v908_v39 = vpop.f32.mrb[62].mxu0  ;;  %v1036_v40 = vpop.f32.mrb[62].mxu1  ;;  %2003 = vst [vmem:[%s2386_s10 + $0x70] sm:$0xff] %v1903_v33   ;;  %2019 = vst [vmem:[%s2386_s10 + $0xf0] sm:$0xff] %v1983_v34  }
 0x194   : > { %v1134_v41 = vmul.f32 0.2, %v906_v35  ;;  %v1166_v42 = vmul.f32 0.2, %v1034_v36  ;;  %v909_v43 = vadd.f32 %v2376_v17, %v908_v39  ;;  %v1037_v44 = vadd.f32 %v2376_v17, %v1036_v40  ;;  %v910_v45 = vpop.f32.mrb[63].mxu0  ;;  %v1038_v46 = vpop.f32.mrb[63].mxu1 }
 0x195   : > { %vm1070_vm12 = vcmp.gt.f32.partialorder %v906_v35, 0.0  ;;  %vm1102_vm13 = vcmp.gt.f32.partialorder %v1034_v36, 0.0 }
 0x196   : > { %vm1071_vm14 = vcmp.gt.f32.partialorder %v909_v43, 0.0  ;;  %v1135_v47 = vmul.f32 0.2, %v909_v43  ;;  %vm1103_vm15 = vcmp.gt.f32.partialorder %v1037_v44, 0.0  ;;  %v1167_v48 = vmul.f32 0.2, %v1037_v44 }
 0x197   : > { %v1198_v49 = vsel %vm1070_vm12, %v906_v35, %v1134_v41  ;;  %v1230_v50 = vsel %vm1102_vm13, %v1034_v36, %v1166_v42 }
 0x198   : > { %v1199_v51 = vsel %vm1071_vm14, %v909_v43, %v1135_v47  ;;  %v1231_v52 = vsel %vm1103_vm15, %v1037_v44, %v1167_v48 }
 0x199   : > { %v1908_v53 = vpack.c.bf16 %v1199_v51, %v1198_v49  ;;  %v1988_v54 = vpack.c.bf16 %v1231_v52, %v1230_v50 }
 0x19b   : > { %2004 = vst [vmem:[%s2386_s10 + $0x78] sm:$0xff] %v1908_v53   ;;  %2020 = vst [vmem:[%s2386_s10 + $0xf8] sm:$0xff] %v1988_v54  }
 0x19c PF: > { %s15_s18 = sadd.s32 1, %s2180_s18  }
 0x19d   : > { %p12_p4 = scmp.ge.s32.totalorder %s15_s18, 4  }
 0x19f   :  { %14 = sbr.rel (!%p12_p4) target bundleno = 1 (0x1), region = 70 }

// kernel: nlayer_discriminator.6
= control target key start
LH: loop header
LB: loop body
LE: loop exit
PB: predicated region body
PF: predicated region fallthrough
CT: control target
= control target key end

     0   :  { %s1265_s18 = smov 0   ;;  %s1482_s0 = inlined_call_operand.vmem [shape: bf16[128,512], index: 0, kind: input, shape index: {}]   ;;  %s1483_s1 = inlined_call_operand.vmem [shape: bf16[512,128], index: 1, kind: input, shape index: {}]   ;;  %s1484_s2 = inlined_call_operand.vmem [shape: f32[1,128], index: 2, kind: input, shape index: {}, may-alias: {2,4}]   ;;  %s1485_s3 = inlined_call_operand.vmem [shape: f32[1,128], index: 3, kind: input, shape index: {}]   ;;  %s1486_s4 = inlined_call_operand.vmem [shape: f32[1,128], index: 4, kind: input, shape index: {}, may-alias: {2,4}]   ;;  %s1487_s5 = inlined_call_operand.vmem [shape: bf16[128,128], index: 5, kind: output, shape index: {}]  }
   0x1 LB: > { %s965_s2 = sadd.s32 4294967295, %s1233_s18   ;;  %p969_p0 = scmp.ge.s32.totalorder %s1233_s18, 1  ;;  %s1233_s18 = sphi %s1265_s18, %s15_s18  }
   0x2   : > { %p189_p1 = scmp.lt.s32.totalorder %s1233_s18, 3 }
   0x4   : > { %p190_p2 = pnand %p969_p0, %p189_p1 }
   0x5   : > { %v1155_v0 = vld [vmem:[%s1483_s1 + $0x40] sm:$0xff] (!%p190_p2)   ;;  %v1159_v4 = vld [vmem:[%s1483_s1 + $0x48] sm:$0xff] (!%p190_p2)   ;;  %v1163_v8 = vld [vmem:[%s1483_s1 + $0x50] sm:$0xff] (!%p190_p2)   ;;  %s970_s27 = sshll.u32 (!%p190_p2), %s965_s2, 3 }
   0x6   : > { %193 = sbr.rel (%p190_p2) target bundleno = 601 (0x259), region = 40  ;;  %v1156_v1 = vld [vmem:[%s1483_s1 + $0xc0] sm:$0xff] (!%p190_p2)   ;;  %1067 = vmatprep.subr.bf16.mxu0 (!%p190_p2), %v1155_v0  ;;  %v1160_v5 = vld [vmem:[%s1483_s1 + $0xc8] sm:$0xff] (!%p190_p2)   ;;  %v1164_v9 = vld [vmem:[%s1483_s1 + $0xd0] sm:$0xff] (!%p190_p2)   ;;  %p219_p3 = scmp.lt.s32.totalorder (!%p190_p2), %s970_s27, 15 }
   0x7   : > { %v1157_v2 = vld [vmem:[%s1483_s1] sm:$0xff] (!%p190_p2)   ;;  %1107 = vmatprep.subr.bf16.mxu1 (!%p190_p2), %v1156_v1  ;;  %v1161_v6 = vld [vmem:[%s1483_s1 + $0x8] sm:$0xff] (!%p190_p2)   ;;  %v1165_v10 = vld [vmem:[%s1483_s1 + $0x10] sm:$0xff] (!%p190_p2)  }
   0x8   : > { %v1158_v3 = vld [vmem:[%s1483_s1 + $0x80] sm:$0xff] (!%p190_p2)   ;;  %1068 = vmatpush3.bf16.msra.mxu0 (!%p190_p2), %v1157_v2  ;;  %v1162_v7 = vld [vmem:[%s1483_s1 + $0x88] sm:$0xff] (!%p190_p2)   ;;  %v1166_v11 = vld [vmem:[%s1483_s1 + $0x90] sm:$0xff] (!%p190_p2)  }
   0x9   : > { %1108 = vmatpush3.bf16.msra.mxu1 (!%p190_p2), %v1158_v3  ;;  %1069 = vmatprep.subr.bf16.mxu0 (!%p190_p2), %v1159_v4  ;;  %v1167_v12 = vld [vmem:[%s1483_s1 + $0x58] sm:$0xff] (!%p190_p2)   ;;  %v1171_v16 = vld [vmem:[%s1483_s1 + $0x60] sm:$0xff] (!%p190_p2)   ;;  %v1175_v20 = vld [vmem:[%s1483_s1 + $0x68] sm:$0xff] (!%p190_p2)  }
   0xa   : > { %1109 = vmatprep.subr.bf16.mxu1 (!%p190_p2), %v1160_v5  ;;  %v1168_v13 = vld [vmem:[%s1483_s1 + $0xd8] sm:$0xff] (!%p190_p2)   ;;  %v1172_v17 = vld [vmem:[%s1483_s1 + $0xe0] sm:$0xff] (!%p190_p2)   ;;  %v1176_v21 = vld [vmem:[%s1483_s1 + $0xe8] sm:$0xff] (!%p190_p2)  }
   0xb   : > { %v1169_v14 = vld [vmem:[%s1483_s1 + $0x18] sm:$0xff] (!%p190_p2)   ;;  %v1173_v18 = vld [vmem:[%s1483_s1 + $0x20] sm:$0xff] (!%p190_p2)   ;;  %v1177_v22 = vld [vmem:[%s1483_s1 + $0x28] sm:$0xff] (!%p190_p2)  }
   0xc   : > { %1070 = vmatpush3.bf16.msra.mxu0 (!%p190_p2), %v1161_v6  ;;  %v1170_v15 = vld [vmem:[%s1483_s1 + $0x98] sm:$0xff] (!%p190_p2)   ;;  %v1174_v19 = vld [vmem:[%s1483_s1 + $0xa0] sm:$0xff] (!%p190_p2)   ;;  %v1178_v23 = vld [vmem:[%s1483_s1 + $0xa8] sm:$0xff] (!%p190_p2)  }
   0xd   : > { %1110 = vmatpush3.bf16.msra.mxu1 %v1162_v7  ;;  %1071 = vmatprep.subr.bf16.mxu0 %v1163_v8  ;;  %s1489_s27 = smov (!%p219_p3, %s970_s27), 15  ;;  %v1179_v24 = vld [vmem:[%s1483_s1 + $0x70] sm:$0xff]   ;;  %v1183_v28 = vld [vmem:[%s1483_s1 + $0x78] sm:$0xff]  }
   0xe   : > { %1111 = vmatprep.subr.bf16.mxu1 %v1164_v9  ;;  %v1180_v25 = vld [vmem:[%s1483_s1 + $0xf0] sm:$0xff]   ;;  %s1035_s25 = sshll.u32 %s1489_s27, 4  ;;  %v1184_v29 = vld [vmem:[%s1483_s1 + $0xf8] sm:$0xff]   ;;  %s974_s19 = sshll.u32 %s1489_s27, 2 }
   0xf   : > { %v1181_v26 = vld [vmem:[%s1483_s1 + $0x30] sm:$0xff]   ;;  %s1371_s10 = scalar_lea.vmem %s1482_s0, %s1035_s25  ;;  %v1185_v30 = vld [vmem:[%s1483_s1 + $0x38] sm:$0xff]   ;;  %s1457_s22 = scalar_lea.vmem %s1487_s5, %s974_s19 }
  0x10   : > { %1072 = vmatpush3.bf16.msra.mxu0 %v1165_v10  ;;  %v1182_v27 = vld [vmem:[%s1483_s1 + $0xb0] sm:$0xff]   ;;  %v1186_v31 = vld [vmem:[%s1483_s1 + $0xb8] sm:$0xff]  }
  0x11   : > { %1112 = vmatpush3.bf16.msra.mxu1 %v1166_v11  ;;  %1073 = vmatprep.subr.bf16.mxu0 %v1167_v12  ;;  %v1187_v32 = vld [vmem:[%s1371_s10] ss:$16 sps:$4 sm:$0xff]   ;;  %v1189_v33 = vld [vmem:[%s1371_s10 + $0x4] ss:$16 sps:$4 sm:$0xff]   ;;  %v1190_v34 = vld [vmem:[%s1371_s10 + $0x8] ss:$16 sps:$4 sm:$0xff]  }
  0x12   : > { %1113 = vmatprep.subr.bf16.mxu1 %v1168_v13  ;;  %v1192_v35 = vld [vmem:[%s1371_s10 + $0xc] ss:$16 sps:$4 sm:$0xff]   ;;  %616 = vmatprep.mubr.bf16.mxu0 %v1189_v33  ;;  %v1193_v36 = vld [vmem:[%s1371_s10 + $0x24] ss:$16 sps:$4 sm:$0xff]   ;;  %v1197_v38 = vld [vmem:[%s1371_s10 + $0x20] ss:$16 sps:$4 sm:$0xff]  }
  0x13   : > { %681 = vmatprep.mubr.bf16.mxu1 %v1192_v35  ;;  %v1195_v37 = vld [vmem:[%s1371_s10 + $0x2c] ss:$16 sps:$4 sm:$0xff]   ;;  %v1198_v39 = vld [vmem:[%s1371_s10 + $0x28] ss:$16 sps:$4 sm:$0xff]   ;;  %v1199_v40 = vld [vmem:[%s1371_s10 + $0x44] ss:$16 sps:$4 sm:$0xff]  }
  0x14   : > { %1074 = vmatpush3.bf16.msra.mxu0 %v1169_v14  ;;  %v1201_v41 = vld [vmem:[%s1371_s10 + $0x4c] ss:$16 sps:$4 sm:$0xff]   ;;  %v1203_v42 = vld [vmem:[%s1371_s10 + $0x40] ss:$16 sps:$4 sm:$0xff]   ;;  %v1204_v43 = vld [vmem:[%s1371_s10 + $0x48] ss:$16 sps:$4 sm:$0xff]  }
  0x15   : > { %1114 = vmatpush3.bf16.msra.mxu1 %v1170_v15  ;;  %1075 = vmatprep.subr.bf16.mxu0 %v1171_v16  ;;  %v1205_v44 = vld [vmem:[%s1371_s10 + $0x64] ss:$16 sps:$4 sm:$0xff]   ;;  %v1207_v45 = vld [vmem:[%s1371_s10 + $0x6c] ss:$16 sps:$4 sm:$0xff]   ;;  %v1209_v46 = vld [vmem:[%s1371_s10 + $0x60] ss:$16 sps:$4 sm:$0xff]  }
  0x16   : > { %1115 = vmatprep.subr.bf16.mxu1 %v1172_v17  ;;  %v1210_v47 = vld [vmem:[%s1371_s10 + $0x68] ss:$16 sps:$4 sm:$0xff]  }
  0x18   : > { %1076 = vmatpush3.bf16.msra.mxu0 %v1173_v18 }
  0x19   : > { %1116 = vmatpush3.bf16.msra.mxu1 %v1174_v19  ;;  %1077 = vmatprep.subr.bf16.mxu0 %v1175_v20 }
  0x1a   : > { %1117 = vmatprep.subr.bf16.mxu1 %v1176_v21 }
  0x1c   : > { %1078 = vmatpush3.bf16.msra.mxu0 %v1177_v22 }
  0x1d   : > { %1118 = vmatpush3.bf16.msra.mxu1 %v1178_v23  ;;  %1079 = vmatprep.subr.bf16.mxu0 %v1179_v24 }
  0x1e   : > { %1119 = vmatprep.subr.bf16.mxu1 %v1180_v25 }
  0x20   : > { %1080 = vmatpush3.bf16.msra.mxu0 %v1181_v26 }
  0x21   : > { %1120 = vmatpush3.bf16.msra.mxu1 %v1182_v27  ;;  %1081 = vmatprep.subr.bf16.mxu0 %v1183_v28 }
  0x22   : > { %1121 = vmatprep.subr.bf16.mxu1 %v1184_v29 }
  0x24   : > { %1082 = vmatpush3.bf16.msra.mxu0 %v1185_v30 }
  0x25   : > { %1122 = vmatpush3.bf16.msra.mxu1 %v1186_v31 }
  0x27   : > { %617 = vmatmul.mubr.bf16.vlgmr.msra.gmra.mrb[0].mxu0 %v1187_v32 }
  0x28   : > { %682 = vmatmul.mubr.bf16.vlgmr.msra.gmra.mrb[0].mxu1 %v1190_v34  ;;  %624 = vmatprep.mubr.bf16.mxu0 %v1193_v36 }
  0x29   : > { %689 = vmatprep.mubr.bf16.mxu1 %v1195_v37 }
  0x2f   : > { %625 = vmatmul.mubr.bf16.gmra.mrb[4].mxu0 %v1197_v38 }
  0x30   : > { %690 = vmatmul.mubr.bf16.gmra.mrb[4].mxu1 %v1198_v39  ;;  %632 = vmatprep.mubr.bf16.mxu0 %v1199_v40  ;;  %v746_v40 = vlaneseq }
  0x31   : > { %697 = vmatprep.mubr.bf16.mxu1 %v1201_v41 }
  0x37   : > { %633 = vmatmul.mubr.bf16.gmra.mrb[8].mxu0 %v1203_v42  ;;  %v747_v42 = vand.u32 127, %v746_v40 }
  0x38   : > { %698 = vmatmul.mubr.bf16.gmra.mrb[8].mxu1 %v1204_v43  ;;  %640 = vmatprep.mubr.bf16.mxu0 %v1205_v44 }
  0x39   : > { %705 = vmatprep.mubr.bf16.mxu1 %v1207_v45  ;;  %vm748_vm0 = vcmp.lt.s32.totalorder %v747_v42, 16 }
  0x3f   : > { %641 = vmatmul.mubr.bf16.gmra.mrb[12].mxu0 %v1209_v46 }
  0x40   : > { %706 = vmatmul.mubr.bf16.gmra.mrb[12].mxu1 %v1210_v47 }
  0xfa   : > { %v1083_v48 = vpop.f32.mrb[0].mxu0 }
  0xfb   : > { %v1123_v49 = vpop.f32.mrb[0].mxu1  ;;  %v1084_v50 = vpop.f32.mrb[1].mxu0 }
  0xfc   : > { %v1085_v51 = vadd.f32 %v1084_v50, %v1083_v48  ;;  %v1124_v52 = vpop.f32.mrb[1].mxu1  ;;  %v1086_v53 = vpop.f32.mrb[2].mxu0 }
  0xfd   : > { %v1125_v54 = vadd.f32 %v1124_v52, %v1123_v49  ;;  %v1126_v55 = vpop.f32.mrb[2].mxu1  ;;  %v1087_v56 = vpop.f32.mrb[3].mxu0 }
  0xfe   : > { %v1088_v57 = vadd.f32 %v1087_v56, %v1086_v53  ;;  %v1127_v58 = vpop.f32.mrb[3].mxu1 }
  0xff   : > { %v1128_v59 = vadd.f32 %v1127_v58, %v1126_v55  ;;  %v684_v60 = vadd.f32 %v1125_v54, %v1085_v51 }
 0x101   : > { %714 = vadd.xlane.f32.xlu0 %v684_v60  ;;  %v687_v61 = vadd.f32 %v1128_v59, %v1088_v57 }
 0x102   : > { %v1089_v62 = vpop.f32.mrb[4].mxu0 }
 0x103   : > { %v1129_v63 = vpop.f32.mrb[4].mxu1  ;;  %v1090_v0 = vpop.f32.mrb[5].mxu0 }
 0x104   : > { %v1091_v1 = vadd.f32 %v1090_v0, %v1089_v62  ;;  %v1130_v2 = vpop.f32.mrb[5].mxu1  ;;  %v1092_v3 = vpop.f32.mrb[6].mxu0 }
 0x105   : > { %v1131_v4 = vadd.f32 %v1130_v2, %v1129_v63  ;;  %v1132_v5 = vpop.f32.mrb[6].mxu1  ;;  %716 = vadd.xlane.f32.xlu0 %v687_v61  ;;  %v1093_v6 = vpop.f32.mrb[7].mxu0 }
 0x106   : > { %v1094_v7 = vadd.f32 %v1093_v6, %v1092_v3  ;;  %v1133_v8 = vpop.f32.mrb[7].mxu1 }
 0x107   : > { %v1134_v9 = vadd.f32 %v1133_v8, %v1132_v5  ;;  %v692_v10 = vadd.f32 %v1131_v4, %v1091_v1 }
 0x109   : > { %718 = vadd.xlane.f32.xlu1 %v692_v10  ;;  %v695_v11 = vadd.f32 %v1134_v9, %v1094_v7 }
 0x10a   : > { %v1095_v12 = vpop.f32.mrb[8].mxu0 }
 0x10b   : > { %v1135_v13 = vpop.f32.mrb[8].mxu1  ;;  %v1096_v14 = vpop.f32.mrb[9].mxu0 }
 0x10c   : > { %v1097_v15 = vadd.f32 %v1096_v14, %v1095_v12  ;;  %v1136_v16 = vpop.f32.mrb[9].mxu1  ;;  %v1098_v17 = vpop.f32.mrb[10].mxu0 }
 0x10d   : > { %v1137_v18 = vadd.f32 %v1136_v16, %v1135_v13  ;;  %v1138_v19 = vpop.f32.mrb[10].mxu1  ;;  %720 = vadd.xlane.f32.xlu1 %v695_v11  ;;  %v1099_v20 = vpop.f32.mrb[11].mxu0 }
 0x10e   : > { %v1100_v21 = vadd.f32 %v1099_v20, %v1098_v17  ;;  %v1139_v22 = vpop.f32.mrb[11].mxu1 }
 0x10f   : > { %v1140_v23 = vadd.f32 %v1139_v22, %v1138_v19  ;;  %v700_v24 = vadd.f32 %v1137_v18, %v1097_v15 }
 0x111   : > { %722 = vadd.xlane.f32.xlu0 %v700_v24  ;;  %v703_v25 = vadd.f32 %v1140_v23, %v1100_v21 }
 0x112   : > { %v1101_v26 = vpop.f32.mrb[12].mxu0 }
 0x113   : > { %v1141_v27 = vpop.f32.mrb[12].mxu1  ;;  %724 = vadd.xlane.f32.xlu1 %v703_v25  ;;  %v1102_v28 = vpop.f32.mrb[13].mxu0 }
 0x114   : > { %v1103_v29 = vadd.f32 %v1102_v28, %v1101_v26  ;;  %v1142_v30 = vpop.f32.mrb[13].mxu1  ;;  %v1104_v31 = vpop.f32.mrb[14].mxu0 }
 0x115   : > { %v1143_v32 = vadd.f32 %v1142_v30, %v1141_v27  ;;  %v1144_v33 = vpop.f32.mrb[14].mxu1  ;;  %v1105_v34 = vpop.f32.mrb[15].mxu0  ;;  %v1438_v30 = vld [vmem:[%s1485_s3] ss:$0 sm:$0xff] }
 0x116   : > { %v1106_v35 = vadd.f32 %v1105_v34, %v1104_v31  ;;  %v1145_v36 = vpop.f32.mrb[15].mxu1  ;;  %v1444_v34 = vld [vmem:[%s1486_s4] ss:$0 sm:$0xff] }
 0x117   : > { %v1146_v37 = vadd.f32 %v1145_v36, %v1144_v33  ;;  %v708_v38 = vadd.f32 %v1143_v32, %v1103_v29 }
 0x119   : > { %726 = vadd.xlane.f32.xlu0 %v708_v38  ;;  %v711_v39 = vadd.f32 %v1146_v37, %v1106_v35 }
 0x11b   : > { %728 = vadd.xlane.f32.xlu1 %v711_v39 }
 0x18e   : > { %v715_v41 = vpop.xlane.xlu0 %714 }
 0x18f   : > { %v730_v43 = vmul.f32 0.0625, %v715_v41 }
 0x191   : > { %v1395_v44 = vsub.f32 %v684_v60, %v730_v43 }
 0x192   : > { %v717_v45 = vpop.xlane.xlu0 %716 }
 0x193   : > { %v731_v46 = vmul.f32 0.0625, %v717_v45  ;;  %v749_v47 = vmul.f32 %v1395_v44, %v1395_v44 }
 0x195   : > { %v1399_v48 = vsub.f32 %v687_v61, %v731_v46  ;;  %v759_v49 = vsel %vm748_vm0, %v749_v47, 0.0 }
 0x196   : > { %v719_v50 = vpop.xlane.xlu1 %718  ;;  %767 = vadd.xlane.f32.xlu0 %v759_v49 }
 0x197   : > { %v732_v51 = vmul.f32 0.0625, %v719_v50  ;;  %v750_v52 = vmul.f32 %v1399_v48, %v1399_v48 }
 0x199   : > { %v1404_v53 = vsub.f32 %v692_v10, %v732_v51  ;;  %v760_v54 = vsel %vm748_vm0, %v750_v52, 0.0 }
 0x19a   : > { %v721_v55 = vpop.xlane.xlu1 %720  ;;  %769 = vadd.xlane.f32.xlu1 %v760_v54 }
 0x19b   : > { %v733_v56 = vmul.f32 0.0625, %v721_v55  ;;  %v751_v57 = vmul.f32 %v1404_v53, %v1404_v53 }
 0x19d   : > { %v1409_v58 = vsub.f32 %v695_v11, %v733_v56  ;;  %v761_v59 = vsel %vm748_vm0, %v751_v57, 0.0 }
 0x19e   : > { %771 = vadd.xlane.f32.xlu0 %v761_v59  ;;  %v723_v60 = vpop.xlane.xlu0 %722 }
 0x19f   : > { %v734_v61 = vmul.f32 0.0625, %v723_v60  ;;  %v752_v62 = vmul.f32 %v1409_v58, %v1409_v58 }
 0x1a0   : > { %v725_v63 = vpop.xlane.xlu1 %724 }
 0x1a1   : > { %v1414_v0 = vsub.f32 %v700_v24, %v734_v61  ;;  %v735_v1 = vmul.f32 0.0625, %v725_v63  ;;  %v762_v2 = vsel %vm748_vm0, %v752_v62, 0.0 }
 0x1a2   : > { %773 = vadd.xlane.f32.xlu1 %v762_v2 }
 0x1a3   : > { %v1417_v3 = vsub.f32 %v703_v25, %v735_v1  ;;  %v753_v4 = vmul.f32 %v1414_v0, %v1414_v0 }
 0x1a5   : > { %v763_v5 = vsel %vm748_vm0, %v753_v4, 0.0  ;;  %v754_v6 = vmul.f32 %v1417_v3, %v1417_v3 }
 0x1a6   : > { %775 = vadd.xlane.f32.xlu0 %v763_v5  ;;  %v727_v7 = vpop.xlane.xlu0 %726 }
 0x1a7   : > { %v736_v8 = vmul.f32 0.0625, %v727_v7  ;;  %v764_v9 = vsel %vm748_vm0, %v754_v6, 0.0 }
 0x1a8   : > { %v729_v10 = vpop.xlane.xlu1 %728  ;;  %777 = vadd.xlane.f32.xlu1 %v764_v9 }
 0x1a9   : > { %v1425_v11 = vsub.f32 %v708_v38, %v736_v8  ;;  %v737_v12 = vmul.f32 0.0625, %v729_v10 }
 0x1ab   : > { %v1427_v13 = vsub.f32 %v711_v39, %v737_v12  ;;  %v755_v14 = vmul.f32 %v1425_v11, %v1425_v11 }
 0x1ad   : > { %v765_v15 = vsel %vm748_vm0, %v755_v14, 0.0  ;;  %v756_v16 = vmul.f32 %v1427_v13, %v1427_v13 }
 0x1ae   : > { %779 = vadd.xlane.f32.xlu0 %v765_v15 }
 0x1af   : > { %v766_v17 = vsel %vm748_vm0, %v756_v16, 0.0 }
 0x1b0   : > { %781 = vadd.xlane.f32.xlu1 %v766_v17 }
 0x223   : > { %v768_v18 = vpop.xlane.xlu0 %767 }
 0x224   : > { %v783_v19 = vmul.f32 0.0625, %v768_v18 }
 0x226   : > { %v791_v20 = vadd.f32 1e-06, %v783_v19 }
 0x227   : > { %v770_v21 = vpop.xlane.xlu1 %769 }
 0x228   : > { %1211 = vrsqrt.f32 %v791_v20  ;;  %v784_v22 = vmul.f32 0.0625, %v770_v21 }
 0x22a   : > { %v792_v23 = vadd.f32 1e-06, %v784_v22 }
 0x22b   : > { %v772_v24 = vpop.xlane.xlu0 %771 }
 0x22c   : > { %1213 = vrsqrt.f32 %v792_v23  ;;  %v785_v25 = vmul.f32 0.0625, %v772_v24 }
 0x22e   : > { %v793_v26 = vadd.f32 1e-06, %v785_v25 }
 0x22f   : > { %v774_v27 = vpop.xlane.xlu1 %773 }
 0x230   : > { %1215 = vrsqrt.f32 %v793_v26  ;;  %v786_v28 = vmul.f32 0.0625, %v774_v27 }
 0x232   : > { %v1212_v29 = vpop.eup %1211  ;;  %v794_v31 = vadd.f32 1e-06, %v786_v28 }
 0x233   : > { %v807_v32 = vmul.f32 %v1212_v29, %v1395_v44  ;;  %v776_v33 = vpop.xlane.xlu0 %775 }
 0x234   : > { %1217 = vrsqrt.f32 %v794_v31  ;;  %v787_v35 = vmul.f32 0.0625, %v776_v33 }
 0x235   : > { %v822_v36 = vmul.f32 %v1438_v30, %v807_v32  ;;  %v778_v37 = vpop.xlane.xlu1 %777 }
 0x236   : > { %v1214_v38 = vpop.eup %1213  ;;  %v795_v39 = vadd.f32 1e-06, %v787_v35  ;;  %v788_v40 = vmul.f32 0.0625, %v778_v37 }
 0x237   : > { %v837_v41 = vadd.f32 %v1444_v34, %v822_v36  ;;  %v808_v42 = vmul.f32 %v1214_v38, %v1399_v48 }
 0x238   : > { %1219 = vrsqrt.f32 %v795_v39  ;;  %v796_v43 = vadd.f32 1e-06, %v788_v40 }
 0x239   : > { %v823_v44 = vmul.f32 %v1438_v30, %v808_v42  ;;  %v853_v46 = vmul.f32 0.2, %v837_v41  ;;  %vm845_vm1 = vcmp.gt.f32.partialorder %v837_v41, 0.0 }
 0x23a   : > { %v1216_v45 = vpop.eup %1215  ;;  %1221 = vrsqrt.f32 %v796_v43 }
 0x23b   : > { %v838_v47 = vadd.f32 %v1444_v34, %v823_v44  ;;  %v809_v49 = vmul.f32 %v1216_v45, %v1404_v53  ;;  %v780_v50 = vpop.xlane.xlu0 %779  ;;  %v861_v59 = vsel %vm845_vm1, %v837_v41, %v853_v46 }
 0x23c   : > { %v789_v51 = vmul.f32 0.0625, %v780_v50 }
 0x23d   : > { %vm846_vm2 = vcmp.gt.f32.partialorder %v838_v47, 0.0  ;;  %v854_v52 = vmul.f32 0.2, %v838_v47  ;;  %v824_v54 = vmul.f32 %v1438_v30, %v809_v49  ;;  %v782_v48 = vpop.xlane.xlu1 %781 }
 0x23e   : > { %v1218_v55 = vpop.eup %1217  ;;  %v797_v56 = vadd.f32 1e-06, %v789_v51  ;;  %v790_v57 = vmul.f32 0.0625, %v782_v48 }
 0x23f   : > { %v862_v53 = vsel %vm846_vm2, %v838_v47, %v854_v52  ;;  %v839_v60 = vadd.f32 %v1444_v34, %v824_v54  ;;  %v810_v61 = vmul.f32 %v1218_v55, %v1409_v58 }
 0x240   : > { %v1047_v62 = vpack.c.bf16 %v862_v53, %v861_v59  ;;  %1223 = vrsqrt.f32 %v797_v56  ;;  %v798_v63 = vadd.f32 1e-06, %v790_v57 }
 0x241   : > { %v825_v1 = vmul.f32 %v1438_v30, %v810_v61  ;;  %v855_v4 = vmul.f32 0.2, %v839_v60  ;;  %vm847_vm3 = vcmp.gt.f32.partialorder %v839_v60, 0.0 }
 0x242   : > { %v1220_v2 = vpop.eup %1219  ;;  %1048 = vst [vmem:[%s1457_s22] sm:$0xff] %v1047_v62   ;;  %1225 = vrsqrt.f32 %v798_v63 }
 0x243   : > { %v840_v5 = vadd.f32 %v1444_v34, %v825_v1  ;;  %v811_v6 = vmul.f32 %v1220_v2, %v1414_v0  ;;  %v863_v10 = vsel %vm847_vm3, %v839_v60, %v855_v4 }
 0x244   : > { %v1222_v7 = vpop.eup %1221 }
 0x245   : > { %vm848_vm4 = vcmp.gt.f32.partialorder %v840_v5, 0.0  ;;  %v856_v8 = vmul.f32 0.2, %v840_v5  ;;  %v826_v58 = vmul.f32 %v1438_v30, %v811_v6  ;;  %v812_v9 = vmul.f32 %v1222_v7, %v1417_v3 }
 0x247   : > { %v864_v12 = vsel %vm848_vm4, %v840_v5, %v856_v8  ;;  %v841_v14 = vadd.f32 %v1444_v34, %v826_v58  ;;  %v827_v15 = vmul.f32 %v1438_v30, %v812_v9 }
 0x248   : > { %v1052_v16 = vpack.c.bf16 %v864_v12, %v863_v10 }
 0x249   : > { %v857_v17 = vmul.f32 0.2, %v841_v14  ;;  %v842_v18 = vadd.f32 %v1444_v34, %v827_v15  ;;  %vm849_vm5 = vcmp.gt.f32.partialorder %v841_v14, 0.0 }
 0x24a   : > { %v1224_v0 = vpop.eup %1223  ;;  %1064 = vst [vmem:[%s1457_s22 + $0x8] sm:$0xff] %v1052_v16  }
 0x24b   : > { %vm850_vm6 = vcmp.gt.f32.partialorder %v842_v18, 0.0  ;;  %v858_v19 = vmul.f32 0.2, %v842_v18  ;;  %v813_v20 = vmul.f32 %v1224_v0, %v1425_v11  ;;  %v865_v3 = vsel %vm849_vm5, %v841_v14, %v857_v17 }
 0x24c   : > { %v1226_v21 = vpop.eup %1225 }
 0x24d   : > { %v866_v22 = vsel %vm850_vm6, %v842_v18, %v858_v19  ;;  %v828_v23 = vmul.f32 %v1438_v30, %v813_v20  ;;  %v814_v24 = vmul.f32 %v1226_v21, %v1427_v13 }
 0x24e   : > { %v1057_v25 = vpack.c.bf16 %v866_v22, %v865_v3 }
 0x24f   : > { %v843_v26 = vadd.f32 %v1444_v34, %v828_v23  ;;  %v829_v27 = vmul.f32 %v1438_v30, %v814_v24 }
 0x250   : > { %1065 = vst [vmem:[%s1457_s22 + $0x10] sm:$0xff] %v1057_v25  }
 0x251   : > { %v859_v28 = vmul.f32 0.2, %v843_v26  ;;  %v844_v29 = vadd.f32 %v1444_v34, %v829_v27  ;;  %vm851_vm7 = vcmp.gt.f32.partialorder %v843_v26, 0.0 }
 0x253   : > { %vm852_vm8 = vcmp.gt.f32.partialorder %v844_v29, 0.0  ;;  %v860_v11 = vmul.f32 0.2, %v844_v29  ;;  %v867_v31 = vsel %vm851_vm7, %v843_v26, %v859_v28 }
 0x255   : > { %v868_v32 = vsel %vm852_vm8, %v844_v29, %v860_v11 }
 0x256   : > { %v1062_v33 = vpack.c.bf16 %v868_v32, %v867_v31 }
 0x258   : > { %1066 = vst [vmem:[%s1457_s22 + $0x18] sm:$0xff] %v1062_v33  }
 0x259 PF: > { %s15_s18 = sadd.s32 1, %s1233_s18  }
 0x25a   : > { %p12_p4 = scmp.ge.s32.totalorder %s15_s18, 4  }
 0x25c   :  { %14 = sbr.rel (!%p12_p4) target bundleno = 1 (0x1), region = 70 }

// kernel: nlayer_discriminator.7
= control target key start
LH: loop header
LB: loop body
LE: loop exit
PB: predicated region body
PF: predicated region fallthrough
CT: control target
= control target key end

     0   :  { %s1306_s1 = inlined_call_operand.vmem [shape: bf16[1024,128], index: 1, kind: input, shape index: {}]   ;;  %s1307_s2 = inlined_call_operand.vmem [shape: f32[1,128], index: 2, kind: input, shape index: {}, may-alias: {2,4}]   ;;  %s1308_s0 = inlined_call_operand.vmem [shape: bf16[16,1024], index: 0, kind: input, shape index: {}]   ;;  %s1309_s3 = inlined_call_operand.vmem [shape: f32[1,128], index: 3, kind: input, shape index: {}]   ;;  %s1310_s4 = inlined_call_operand.vmem [shape: f32[1,128], index: 4, kind: input, shape index: {}, may-alias: {2,4}]   ;;  %s1311_s5 = inlined_call_operand.vmem [shape: bf16[16,128], index: 5, kind: output, shape index: {}]  }
   0x1   :  { %v983_v0 = vld [vmem:[%s1306_s1 + $0x40] sm:$0xff]   ;;  %v987_v4 = vld [vmem:[%s1306_s1 + $0x48] sm:$0xff]   ;;  %v991_v8 = vld [vmem:[%s1306_s1 + $0x50] sm:$0xff]  }
   0x2   :  { %v984_v1 = vld [vmem:[%s1306_s1 + $0xc0] sm:$0xff]   ;;  %895 = vmatprep.subr.bf16.mxu0 %v983_v0  ;;  %v988_v5 = vld [vmem:[%s1306_s1 + $0xc8] sm:$0xff]   ;;  %v992_v9 = vld [vmem:[%s1306_s1 + $0xd0] sm:$0xff]  }
   0x3   :  { %v985_v2 = vld [vmem:[%s1306_s1] sm:$0xff]   ;;  %917 = vmatprep.subr.bf16.mxu1 %v984_v1  ;;  %v989_v6 = vld [vmem:[%s1306_s1 + $0x8] sm:$0xff]   ;;  %v993_v10 = vld [vmem:[%s1306_s1 + $0x10] sm:$0xff]  }
   0x4   :  { %v986_v3 = vld [vmem:[%s1306_s1 + $0x80] sm:$0xff]   ;;  %896 = vmatpush3.bf16.msra.mxu0 %v985_v2  ;;  %v990_v7 = vld [vmem:[%s1306_s1 + $0x88] sm:$0xff]   ;;  %v994_v11 = vld [vmem:[%s1306_s1 + $0x90] sm:$0xff]  }
   0x5   :  { %918 = vmatpush3.bf16.msra.mxu1 %v986_v3  ;;  %897 = vmatprep.subr.bf16.mxu0 %v987_v4  ;;  %v995_v12 = vld [vmem:[%s1306_s1 + $0x58] sm:$0xff]   ;;  %v999_v16 = vld [vmem:[%s1306_s1 + $0x60] sm:$0xff]   ;;  %v1003_v20 = vld [vmem:[%s1306_s1 + $0x68] sm:$0xff]  }
   0x6   :  { %919 = vmatprep.subr.bf16.mxu1 %v988_v5  ;;  %v996_v13 = vld [vmem:[%s1306_s1 + $0xd8] sm:$0xff]   ;;  %v1000_v17 = vld [vmem:[%s1306_s1 + $0xe0] sm:$0xff]   ;;  %v1004_v21 = vld [vmem:[%s1306_s1 + $0xe8] sm:$0xff]  }
   0x7   :  { %v997_v14 = vld [vmem:[%s1306_s1 + $0x18] sm:$0xff]   ;;  %v1001_v18 = vld [vmem:[%s1306_s1 + $0x20] sm:$0xff]   ;;  %v1005_v22 = vld [vmem:[%s1306_s1 + $0x28] sm:$0xff]  }
   0x8   :  { %898 = vmatpush3.bf16.msra.mxu0 %v989_v6  ;;  %v998_v15 = vld [vmem:[%s1306_s1 + $0x98] sm:$0xff]   ;;  %v1002_v19 = vld [vmem:[%s1306_s1 + $0xa0] sm:$0xff]   ;;  %v1006_v23 = vld [vmem:[%s1306_s1 + $0xa8] sm:$0xff]  }
   0x9   :  { %920 = vmatpush3.bf16.msra.mxu1 %v990_v7  ;;  %899 = vmatprep.subr.bf16.mxu0 %v991_v8  ;;  %v1007_v24 = vld [vmem:[%s1306_s1 + $0x70] sm:$0xff]   ;;  %v1011_v28 = vld [vmem:[%s1306_s1 + $0x78] sm:$0xff]   ;;  %v21_v32 = vld [vmem:[%s1308_s0] sm:$0xff] }
   0xa   :  { %921 = vmatprep.subr.bf16.mxu1 %v992_v9  ;;  %v1008_v25 = vld [vmem:[%s1306_s1 + $0xf0] sm:$0xff]   ;;  %v1012_v29 = vld [vmem:[%s1306_s1 + $0xf8] sm:$0xff]   ;;  %v25_v33 = vld [vmem:[%s1308_s0 + $0x20] sm:$0xff] }
   0xb   :  { %v1009_v26 = vld [vmem:[%s1306_s1 + $0x30] sm:$0xff]   ;;  %v1013_v30 = vld [vmem:[%s1306_s1 + $0x38] sm:$0xff]   ;;  %v22_v34 = vld [vmem:[%s1308_s0 + $0x8] sm:$0xff]  ;;  %v812_v35 = vcombine.low %v21_v32, %v25_v33  ;;  %v813_v36 = vcombine.high %v21_v32, %v25_v33 }
   0xc   :  { %900 = vmatpush3.bf16.msra.mxu0 %v993_v10  ;;  %v1010_v27 = vld [vmem:[%s1306_s1 + $0xb0] sm:$0xff]   ;;  %v1014_v31 = vld [vmem:[%s1306_s1 + $0xb8] sm:$0xff]   ;;  %v26_v37 = vld [vmem:[%s1308_s0 + $0x28] sm:$0xff] }
   0xd   :  { %922 = vmatpush3.bf16.msra.mxu1 %v994_v11  ;;  %901 = vmatprep.subr.bf16.mxu0 %v995_v12  ;;  %v814_v38 = vcombine.low %v22_v34, %v26_v37  ;;  %v815_v39 = vcombine.high %v22_v34, %v26_v37  ;;  %v1015_v40 = vld [vmem:[%s1306_s1 + $0x140] sm:$0xff]   ;;  %v1019_v44 = vld [vmem:[%s1306_s1 + $0x148] sm:$0xff]   ;;  %v1023_v48 = vld [vmem:[%s1306_s1 + $0x150] sm:$0xff]  }
   0xe   :  { %923 = vmatprep.subr.bf16.mxu1 %v996_v13  ;;  %613 = vmatprep.mubr.bf16.mxu0 %v813_v36  ;;  %v1016_v41 = vld [vmem:[%s1306_s1 + $0x1c0] sm:$0xff]   ;;  %v1020_v45 = vld [vmem:[%s1306_s1 + $0x1c8] sm:$0xff]   ;;  %v1024_v49 = vld [vmem:[%s1306_s1 + $0x1d0] sm:$0xff]  }
   0xf   :  { %654 = vmatprep.mubr.bf16.mxu1 %v815_v39  ;;  %v1017_v42 = vld [vmem:[%s1306_s1 + $0x100] sm:$0xff]   ;;  %v1021_v46 = vld [vmem:[%s1306_s1 + $0x108] sm:$0xff]   ;;  %v1025_v50 = vld [vmem:[%s1306_s1 + $0x110] sm:$0xff]  }
  0x10   :  { %902 = vmatpush3.bf16.msra.mxu0 %v997_v14  ;;  %v1018_v43 = vld [vmem:[%s1306_s1 + $0x180] sm:$0xff]   ;;  %v1022_v47 = vld [vmem:[%s1306_s1 + $0x188] sm:$0xff]   ;;  %v1026_v51 = vld [vmem:[%s1306_s1 + $0x190] sm:$0xff]  }
  0x11   :  { %924 = vmatpush3.bf16.msra.mxu1 %v998_v15  ;;  %903 = vmatprep.subr.bf16.mxu0 %v999_v16  ;;  %v1027_v52 = vld [vmem:[%s1306_s1 + $0x158] sm:$0xff]   ;;  %v1031_v56 = vld [vmem:[%s1306_s1 + $0x160] sm:$0xff]   ;;  %v1035_v60 = vld [vmem:[%s1306_s1 + $0x168] sm:$0xff]  }
  0x12   :  { %925 = vmatprep.subr.bf16.mxu1 %v1000_v17  ;;  %v1028_v53 = vld [vmem:[%s1306_s1 + $0x1d8] sm:$0xff]   ;;  %v1032_v57 = vld [vmem:[%s1306_s1 + $0x1e0] sm:$0xff]   ;;  %v1036_v61 = vld [vmem:[%s1306_s1 + $0x1e8] sm:$0xff]  }
  0x13   :  { %v1029_v54 = vld [vmem:[%s1306_s1 + $0x118] sm:$0xff]   ;;  %v1033_v58 = vld [vmem:[%s1306_s1 + $0x120] sm:$0xff]   ;;  %v1037_v62 = vld [vmem:[%s1306_s1 + $0x128] sm:$0xff]  }
  0x14   :  { %904 = vmatpush3.bf16.msra.mxu0 %v1001_v18  ;;  %v1030_v55 = vld [vmem:[%s1306_s1 + $0x198] sm:$0xff]   ;;  %v1034_v59 = vld [vmem:[%s1306_s1 + $0x1a0] sm:$0xff]   ;;  %v1038_v63 = vld [vmem:[%s1306_s1 + $0x1a8] sm:$0xff]  }
  0x15   :  { %926 = vmatpush3.bf16.msra.mxu1 %v1002_v19  ;;  %905 = vmatprep.subr.bf16.mxu0 %v1003_v20  ;;  %v1039_v0 = vld [vmem:[%s1306_s1 + $0x170] sm:$0xff]   ;;  %v1043_v4 = vld [vmem:[%s1306_s1 + $0x178] sm:$0xff]  }
  0x16   :  { %927 = vmatprep.subr.bf16.mxu1 %v1004_v21  ;;  %v1040_v1 = vld [vmem:[%s1306_s1 + $0x1f0] sm:$0xff]   ;;  %v1044_v5 = vld [vmem:[%s1306_s1 + $0x1f8] sm:$0xff]  }
  0x17   :  { %v1041_v2 = vld [vmem:[%s1306_s1 + $0x130] sm:$0xff]   ;;  %v1045_v6 = vld [vmem:[%s1306_s1 + $0x138] sm:$0xff]  }
  0x18   :  { %906 = vmatpush3.bf16.msra.mxu0 %v1005_v22  ;;  %v1042_v3 = vld [vmem:[%s1306_s1 + $0x1b0] sm:$0xff]   ;;  %v1046_v7 = vld [vmem:[%s1306_s1 + $0x1b8] sm:$0xff]  }
  0x19   :  { %928 = vmatpush3.bf16.msra.mxu1 %v1006_v23  ;;  %907 = vmatprep.subr.bf16.mxu0 %v1007_v24  ;;  %v23_v8 = vld [vmem:[%s1308_s0 + $0x10] sm:$0xff]  ;;  %v24_v12 = vld [vmem:[%s1308_s0 + $0x18] sm:$0xff] }
  0x1a   :  { %929 = vmatprep.subr.bf16.mxu1 %v1008_v25  ;;  %v27_v9 = vld [vmem:[%s1308_s0 + $0x30] sm:$0xff]  ;;  %v28_v13 = vld [vmem:[%s1308_s0 + $0x38] sm:$0xff] }
  0x1b   :  { %v816_v10 = vcombine.low %v23_v8, %v27_v9  ;;  %v817_v11 = vcombine.high %v23_v8, %v27_v9  ;;  %v818_v14 = vcombine.low %v24_v12, %v28_v13  ;;  %v819_v15 = vcombine.high %v24_v12, %v28_v13 }
  0x1c   :  { %908 = vmatpush3.bf16.msra.mxu0 %v1009_v26 }
  0x1d   :  { %930 = vmatpush3.bf16.msra.mxu1 %v1010_v27  ;;  %909 = vmatprep.subr.bf16.mxu0 %v1011_v28 }
  0x1e   :  { %931 = vmatprep.subr.bf16.mxu1 %v1012_v29 }
  0x20   :  { %910 = vmatpush3.bf16.msra.mxu0 %v1013_v30 }
  0x21   :  { %932 = vmatpush3.bf16.msra.mxu1 %v1014_v31  ;;  %939 = vmatprep.subr.bf16.mxu0 %v1015_v40 }
  0x22   :  { %961 = vmatprep.subr.bf16.mxu1 %v1016_v41 }
  0x23   :  { %614 = vmatmul.mubr.bf16.vlgmr.msra.gmra.mrb[0].mxu0 %v812_v35 }
  0x24   :  { %655 = vmatmul.mubr.bf16.vlgmr.msra.gmra.mrb[0].mxu1 %v814_v38  ;;  %940 = vmatpush3.bf16.msra.mxu0 %v1017_v42 }
  0x25   :  { %962 = vmatpush3.bf16.msra.mxu1 %v1018_v43  ;;  %941 = vmatprep.subr.bf16.mxu0 %v1019_v44 }
  0x26   :  { %963 = vmatprep.subr.bf16.mxu1 %v1020_v45  ;;  %695 = vmatprep.mubr.bf16.mxu0 %v817_v11 }
  0x27   :  { %736 = vmatprep.mubr.bf16.mxu1 %v819_v15 }
  0x28   :  { %942 = vmatpush3.bf16.msra.mxu0 %v1021_v46  ;;  %v753_v46 = vlaneseq }
  0x29   :  { %964 = vmatpush3.bf16.msra.mxu1 %v1022_v47  ;;  %943 = vmatprep.subr.bf16.mxu0 %v1023_v48 }
  0x2a   :  { %965 = vmatprep.subr.bf16.mxu1 %v1024_v49  ;;  %v754_v48 = vand.u32 127, %v753_v46 }
  0x2c   :  { %944 = vmatpush3.bf16.msra.mxu0 %v1025_v50  ;;  %vm755_vm0 = vcmp.lt.s32.totalorder %v754_v48, 32 }
  0x2d   :  { %966 = vmatpush3.bf16.msra.mxu1 %v1026_v51  ;;  %945 = vmatprep.subr.bf16.mxu0 %v1027_v52 }
  0x2e   :  { %967 = vmatprep.subr.bf16.mxu1 %v1028_v53 }
  0x30   :  { %946 = vmatpush3.bf16.msra.mxu0 %v1029_v54 }
  0x31   :  { %968 = vmatpush3.bf16.msra.mxu1 %v1030_v55  ;;  %947 = vmatprep.subr.bf16.mxu0 %v1031_v56 }
  0x32   :  { %969 = vmatprep.subr.bf16.mxu1 %v1032_v57 }
  0x34   :  { %948 = vmatpush3.bf16.msra.mxu0 %v1033_v58 }
  0x35   :  { %970 = vmatpush3.bf16.msra.mxu1 %v1034_v59  ;;  %949 = vmatprep.subr.bf16.mxu0 %v1035_v60 }
  0x36   :  { %971 = vmatprep.subr.bf16.mxu1 %v1036_v61 }
  0x38   :  { %950 = vmatpush3.bf16.msra.mxu0 %v1037_v62 }
  0x39   :  { %972 = vmatpush3.bf16.msra.mxu1 %v1038_v63  ;;  %951 = vmatprep.subr.bf16.mxu0 %v1039_v0 }
  0x3a   :  { %973 = vmatprep.subr.bf16.mxu1 %v1040_v1  ;;  %v884_v1 = vld [vmem:[%s1309_s3] ss:$0 sm:$0xff] }
  0x3c   :  { %952 = vmatpush3.bf16.msra.mxu0 %v1041_v2 }
  0x3d   :  { %974 = vmatpush3.bf16.msra.mxu1 %v1042_v3  ;;  %953 = vmatprep.subr.bf16.mxu0 %v1043_v4  ;;  %v885_v3 = vld [vmem:[%s1310_s4] ss:$0 sm:$0xff] }
  0x3e   :  { %975 = vmatprep.subr.bf16.mxu1 %v1044_v5 }
  0x40   :  { %954 = vmatpush3.bf16.msra.mxu0 %v1045_v6 }
  0x41   :  { %976 = vmatpush3.bf16.msra.mxu1 %v1046_v7 }
  0x43   :  { %696 = vmatmul.mubr.bf16.vlgmr.msra.gmra.mrb[4].mxu0 %v816_v10 }
  0x44   :  { %737 = vmatmul.mubr.bf16.vlgmr.msra.gmra.mrb[4].mxu1 %v818_v14 }
  0xf6   :  { %v911_v16 = vpop.f32.mrb[0].mxu0 }
  0xf7   :  { %v933_v17 = vpop.f32.mrb[0].mxu1  ;;  %v912_v18 = vpop.f32.mrb[1].mxu0 }
  0xf8   :  { %v913_v19 = vadd.f32 %v912_v18, %v911_v16  ;;  %v934_v20 = vpop.f32.mrb[1].mxu1  ;;  %v914_v21 = vpop.f32.mrb[2].mxu0 }
  0xf9   :  { %v935_v22 = vadd.f32 %v934_v20, %v933_v17  ;;  %v936_v23 = vpop.f32.mrb[2].mxu1  ;;  %v915_v24 = vpop.f32.mrb[3].mxu0 }
  0xfa   :  { %v916_v25 = vadd.f32 %v915_v24, %v914_v21  ;;  %v937_v26 = vpop.f32.mrb[3].mxu1 }
  0xfb   :  { %v657_v27 = vadd.f32 %v935_v22, %v913_v19  ;;  %v938_v28 = vadd.f32 %v937_v26, %v936_v23 }
  0xfd   :  { %v660_v29 = vadd.f32 %v938_v28, %v916_v25 }
 0x116   :  { %v955_v30 = vpop.f32.mrb[4].mxu0 }
 0x117   :  { %v977_v31 = vpop.f32.mrb[4].mxu1  ;;  %v956_v32 = vpop.f32.mrb[5].mxu0 }
 0x118   :  { %v957_v33 = vadd.f32 %v956_v32, %v955_v30  ;;  %v978_v34 = vpop.f32.mrb[5].mxu1  ;;  %v958_v35 = vpop.f32.mrb[6].mxu0 }
 0x119   :  { %v979_v36 = vadd.f32 %v978_v34, %v977_v31  ;;  %v980_v37 = vpop.f32.mrb[6].mxu1  ;;  %v959_v38 = vpop.f32.mrb[7].mxu0 }
 0x11a   :  { %v698_v39 = vadd.f32 %v957_v33, %v657_v27  ;;  %v960_v40 = vadd.f32 %v959_v38, %v958_v35  ;;  %v981_v41 = vpop.f32.mrb[7].mxu1 }
 0x11b   :  { %v982_v42 = vadd.f32 %v981_v41, %v980_v37 }
 0x11c   :  { %v701_v43 = vadd.f32 %v960_v40, %v660_v29  ;;  %v739_v44 = vadd.f32 %v979_v36, %v698_v39 }
 0x11e   :  { %745 = vadd.xlane.f32.xlu0 %v739_v44  ;;  %v742_v45 = vadd.f32 %v982_v42, %v701_v43 }
 0x122   :  { %747 = vadd.xlane.f32.xlu0 %v742_v45 }
 0x1ab   :  { %v746_v47 = vpop.xlane.xlu0 %745 }
 0x1ac   :  { %v749_v49 = vmul.f32 0.03125, %v746_v47 }
 0x1ae   :  { %v751_v50 = vsub.f32 %v739_v44, %v749_v49 }
 0x1af   :  { %v748_v51 = vpop.xlane.xlu0 %747 }
 0x1b0   :  { %v750_v52 = vmul.f32 0.03125, %v748_v51  ;;  %v756_v53 = vmul.f32 %v751_v50, %v751_v50 }
 0x1b2   :  { %v752_v54 = vsub.f32 %v742_v45, %v750_v52  ;;  %v760_v55 = vsel %vm755_vm0, %v756_v53, 0.0 }
 0x1b3   :  { %762 = vadd.xlane.f32.xlu1 %v760_v55 }
 0x1b4   :  { %v757_v56 = vmul.f32 %v752_v54, %v752_v54 }
 0x1b6   :  { %v761_v57 = vsel %vm755_vm0, %v757_v56, 0.0 }
 0x1b7   :  { %764 = vadd.xlane.f32.xlu1 %v761_v57 }
 0x240   :  { %v763_v58 = vpop.xlane.xlu1 %762 }
 0x241   :  { %v766_v59 = vmul.f32 0.03125, %v763_v58 }
 0x243   :  { %v768_v60 = vadd.f32 1e-06, %v766_v59 }
 0x244   :  { %v765_v61 = vpop.xlane.xlu1 %764 }
 0x245   :  { %1047 = vrsqrt.f32 %v768_v60  ;;  %v767_v62 = vmul.f32 0.03125, %v765_v61 }
 0x247   :  { %v769_v63 = vadd.f32 1e-06, %v767_v62 }
 0x249   :  { %1049 = vrsqrt.f32 %v769_v63 }
 0x24f   :  { %v1048_v0 = vpop.eup %1047 }
 0x250   :  { %v772_v2 = vmul.f32 %v1048_v0, %v751_v50 }
 0x252   :  { %v781_v4 = vmul.f32 %v884_v1, %v772_v2 }
 0x253   :  { %v1050_v5 = vpop.eup %1049 }
 0x254   :  { %v790_v6 = vadd.f32 %v885_v3, %v781_v4  ;;  %v773_v7 = vmul.f32 %v1050_v5, %v752_v54 }
 0x256   :  { %v782_v8 = vmul.f32 %v884_v1, %v773_v7  ;;  %v794_v9 = vmul.f32 0.2, %v790_v6  ;;  %vm792_vm1 = vcmp.gt.f32.partialorder %v790_v6, 0.0 }
 0x258   :  { %v791_v10 = vadd.f32 %v885_v3, %v782_v8  ;;  %v796_v12 = vsel %vm792_vm1, %v790_v6, %v794_v9 }
 0x25a   :  { %vm793_vm2 = vcmp.gt.f32.partialorder %v791_v10, 0.0  ;;  %v795_v11 = vmul.f32 0.2, %v791_v10 }
 0x25c   :  { %v797_v13 = vsel %vm793_vm2, %v791_v10, %v795_v11 }
 0x25d   :  { %v893_v14 = vpack.c.bf16 %v797_v13, %v796_v12 }
 0x25f   :  { %894 = vst [vmem:[%s1311_s5] sm:$0xff] %v893_v14  }

// kernel: nlayer_discriminator.8
= control target key start
LH: loop header
LB: loop body
LE: loop exit
PB: predicated region body
PF: predicated region fallthrough
CT: control target
= control target key end

     0   :  { %s2470_s1 = inlined_call_operand.vmem [shape: bf16[2048,128], index: 1, kind: input, shape index: {}]   ;;  %s2471_s2 = inlined_call_operand.vmem [shape: f32[1,128], index: 2, kind: input, shape index: {}, may-alias: {2,4}]   ;;  %s2472_s0 = inlined_call_operand.vmem [shape: bf16[16,2048], index: 0, kind: input, shape index: {}]   ;;  %s2473_s3 = inlined_call_operand.vmem [shape: f32[1,128], index: 3, kind: input, shape index: {}]   ;;  %s2474_s4 = inlined_call_operand.vmem [shape: f32[1,128], index: 4, kind: input, shape index: {}, may-alias: {2,4}]   ;;  %s2475_s5 = inlined_call_operand.vmem [shape: bf16[16,128], index: 5, kind: output, shape index: {}]  }
   0x1   :  { %v1867_v0 = vld [vmem:[%s2470_s1 + $0x40] sm:$0xff]   ;;  %v1871_v4 = vld [vmem:[%s2470_s1 + $0x48] sm:$0xff]   ;;  %v1875_v8 = vld [vmem:[%s2470_s1 + $0x50] sm:$0xff]  }
   0x2   :  { %v1868_v1 = vld [vmem:[%s2470_s1 + $0xc0] sm:$0xff]   ;;  %1691 = vmatprep.subr.bf16.mxu0 %v1867_v0  ;;  %v1872_v5 = vld [vmem:[%s2470_s1 + $0xc8] sm:$0xff]   ;;  %v1876_v9 = vld [vmem:[%s2470_s1 + $0xd0] sm:$0xff]  }
   0x3   :  { %v1869_v2 = vld [vmem:[%s2470_s1] sm:$0xff]   ;;  %1713 = vmatprep.subr.bf16.mxu1 %v1868_v1  ;;  %v1873_v6 = vld [vmem:[%s2470_s1 + $0x8] sm:$0xff]   ;;  %v1877_v10 = vld [vmem:[%s2470_s1 + $0x10] sm:$0xff]  }
   0x4   :  { %v1870_v3 = vld [vmem:[%s2470_s1 + $0x80] sm:$0xff]   ;;  %1692 = vmatpush3.bf16.msra.mxu0 %v1869_v2  ;;  %v1874_v7 = vld [vmem:[%s2470_s1 + $0x88] sm:$0xff]   ;;  %v1878_v11 = vld [vmem:[%s2470_s1 + $0x90] sm:$0xff]  }
   0x5   :  { %1714 = vmatpush3.bf16.msra.mxu1 %v1870_v3  ;;  %1693 = vmatprep.subr.bf16.mxu0 %v1871_v4  ;;  %v1879_v12 = vld [vmem:[%s2470_s1 + $0x58] sm:$0xff]   ;;  %v1883_v16 = vld [vmem:[%s2470_s1 + $0x60] sm:$0xff]   ;;  %v1887_v20 = vld [vmem:[%s2470_s1 + $0x68] sm:$0xff]  }
   0x6   :  { %1715 = vmatprep.subr.bf16.mxu1 %v1872_v5  ;;  %v1880_v13 = vld [vmem:[%s2470_s1 + $0xd8] sm:$0xff]   ;;  %v1884_v17 = vld [vmem:[%s2470_s1 + $0xe0] sm:$0xff]   ;;  %v1888_v21 = vld [vmem:[%s2470_s1 + $0xe8] sm:$0xff]  }
   0x7   :  { %v1881_v14 = vld [vmem:[%s2470_s1 + $0x18] sm:$0xff]   ;;  %v1885_v18 = vld [vmem:[%s2470_s1 + $0x20] sm:$0xff]   ;;  %v1889_v22 = vld [vmem:[%s2470_s1 + $0x28] sm:$0xff]  }
   0x8   :  { %1694 = vmatpush3.bf16.msra.mxu0 %v1873_v6  ;;  %v1882_v15 = vld [vmem:[%s2470_s1 + $0x98] sm:$0xff]   ;;  %v1886_v19 = vld [vmem:[%s2470_s1 + $0xa0] sm:$0xff]   ;;  %v1890_v23 = vld [vmem:[%s2470_s1 + $0xa8] sm:$0xff]  }
   0x9   :  { %1716 = vmatpush3.bf16.msra.mxu1 %v1874_v7  ;;  %1695 = vmatprep.subr.bf16.mxu0 %v1875_v8  ;;  %v1891_v24 = vld [vmem:[%s2470_s1 + $0x70] sm:$0xff]   ;;  %v1895_v28 = vld [vmem:[%s2470_s1 + $0x78] sm:$0xff]   ;;  %v21_v32 = vld [vmem:[%s2472_s0] sm:$0xff] }
   0xa   :  { %1717 = vmatprep.subr.bf16.mxu1 %v1876_v9  ;;  %v1892_v25 = vld [vmem:[%s2470_s1 + $0xf0] sm:$0xff]   ;;  %v1896_v29 = vld [vmem:[%s2470_s1 + $0xf8] sm:$0xff]   ;;  %v29_v33 = vld [vmem:[%s2472_s0 + $0x40] sm:$0xff] }
   0xb   :  { %v1893_v26 = vld [vmem:[%s2470_s1 + $0x30] sm:$0xff]   ;;  %v1897_v30 = vld [vmem:[%s2470_s1 + $0x38] sm:$0xff]   ;;  %v22_v34 = vld [vmem:[%s2472_s0 + $0x8] sm:$0xff]  ;;  %v1536_v35 = vcombine.low %v21_v32, %v29_v33  ;;  %v1537_v36 = vcombine.high %v21_v32, %v29_v33 }
   0xc   :  { %1696 = vmatpush3.bf16.msra.mxu0 %v1877_v10  ;;  %v1894_v27 = vld [vmem:[%s2470_s1 + $0xb0] sm:$0xff]   ;;  %v1898_v31 = vld [vmem:[%s2470_s1 + $0xb8] sm:$0xff]   ;;  %v30_v37 = vld [vmem:[%s2472_s0 + $0x48] sm:$0xff] }
   0xd   :  { %1718 = vmatpush3.bf16.msra.mxu1 %v1878_v11  ;;  %1697 = vmatprep.subr.bf16.mxu0 %v1879_v12  ;;  %v1538_v38 = vcombine.low %v22_v34, %v30_v37  ;;  %v1539_v39 = vcombine.high %v22_v34, %v30_v37  ;;  %v1899_v40 = vld [vmem:[%s2470_s1 + $0x140] sm:$0xff]   ;;  %v1903_v44 = vld [vmem:[%s2470_s1 + $0x148] sm:$0xff]   ;;  %v1907_v48 = vld [vmem:[%s2470_s1 + $0x150] sm:$0xff]  }
   0xe   :  { %1719 = vmatprep.subr.bf16.mxu1 %v1880_v13  ;;  %1173 = vmatprep.mubr.bf16.mxu0 %v1537_v36  ;;  %v1900_v41 = vld [vmem:[%s2470_s1 + $0x1c0] sm:$0xff]   ;;  %v1904_v45 = vld [vmem:[%s2470_s1 + $0x1c8] sm:$0xff]   ;;  %v1908_v49 = vld [vmem:[%s2470_s1 + $0x1d0] sm:$0xff]  }
   0xf   :  { %1214 = vmatprep.mubr.bf16.mxu1 %v1539_v39  ;;  %v1901_v42 = vld [vmem:[%s2470_s1 + $0x100] sm:$0xff]   ;;  %v1905_v46 = vld [vmem:[%s2470_s1 + $0x108] sm:$0xff]   ;;  %v1909_v50 = vld [vmem:[%s2470_s1 + $0x110] sm:$0xff]  }
  0x10   :  { %1698 = vmatpush3.bf16.msra.mxu0 %v1881_v14  ;;  %v1902_v43 = vld [vmem:[%s2470_s1 + $0x180] sm:$0xff]   ;;  %v1906_v47 = vld [vmem:[%s2470_s1 + $0x188] sm:$0xff]   ;;  %v1910_v51 = vld [vmem:[%s2470_s1 + $0x190] sm:$0xff]  }
  0x11   :  { %1720 = vmatpush3.bf16.msra.mxu1 %v1882_v15  ;;  %1699 = vmatprep.subr.bf16.mxu0 %v1883_v16  ;;  %v1911_v52 = vld [vmem:[%s2470_s1 + $0x158] sm:$0xff]   ;;  %v1915_v56 = vld [vmem:[%s2470_s1 + $0x160] sm:$0xff]   ;;  %v1919_v60 = vld [vmem:[%s2470_s1 + $0x168] sm:$0xff]  }
  0x12   :  { %1721 = vmatprep.subr.bf16.mxu1 %v1884_v17  ;;  %v1912_v53 = vld [vmem:[%s2470_s1 + $0x1d8] sm:$0xff]   ;;  %v1916_v57 = vld [vmem:[%s2470_s1 + $0x1e0] sm:$0xff]   ;;  %v1920_v61 = vld [vmem:[%s2470_s1 + $0x1e8] sm:$0xff]  }
  0x13   :  { %v1913_v54 = vld [vmem:[%s2470_s1 + $0x118] sm:$0xff]   ;;  %v1917_v58 = vld [vmem:[%s2470_s1 + $0x120] sm:$0xff]   ;;  %v1921_v62 = vld [vmem:[%s2470_s1 + $0x128] sm:$0xff]  }
  0x14   :  { %1700 = vmatpush3.bf16.msra.mxu0 %v1885_v18  ;;  %v1914_v55 = vld [vmem:[%s2470_s1 + $0x198] sm:$0xff]   ;;  %v1918_v59 = vld [vmem:[%s2470_s1 + $0x1a0] sm:$0xff]   ;;  %v1922_v63 = vld [vmem:[%s2470_s1 + $0x1a8] sm:$0xff]  }
  0x15   :  { %1722 = vmatpush3.bf16.msra.mxu1 %v1886_v19  ;;  %1701 = vmatprep.subr.bf16.mxu0 %v1887_v20  ;;  %v1923_v0 = vld [vmem:[%s2470_s1 + $0x170] sm:$0xff]   ;;  %v1927_v4 = vld [vmem:[%s2470_s1 + $0x178] sm:$0xff]   ;;  %v1931_v16 = vld [vmem:[%s2470_s1 + $0x240] sm:$0xff]  }
  0x16   :  { %1723 = vmatprep.subr.bf16.mxu1 %v1888_v21  ;;  %v1924_v1 = vld [vmem:[%s2470_s1 + $0x1f0] sm:$0xff]   ;;  %v1928_v5 = vld [vmem:[%s2470_s1 + $0x1f8] sm:$0xff]   ;;  %v1932_v17 = vld [vmem:[%s2470_s1 + $0x2c0] sm:$0xff]  }
  0x17   :  { %v1925_v2 = vld [vmem:[%s2470_s1 + $0x130] sm:$0xff]   ;;  %v1929_v6 = vld [vmem:[%s2470_s1 + $0x138] sm:$0xff]   ;;  %v1933_v18 = vld [vmem:[%s2470_s1 + $0x200] sm:$0xff]  }
  0x18   :  { %1702 = vmatpush3.bf16.msra.mxu0 %v1889_v22  ;;  %v1926_v3 = vld [vmem:[%s2470_s1 + $0x1b0] sm:$0xff]   ;;  %v1930_v7 = vld [vmem:[%s2470_s1 + $0x1b8] sm:$0xff]   ;;  %v1934_v19 = vld [vmem:[%s2470_s1 + $0x280] sm:$0xff]  }
  0x19   :  { %1724 = vmatpush3.bf16.msra.mxu1 %v1890_v23  ;;  %1703 = vmatprep.subr.bf16.mxu0 %v1891_v24  ;;  %v23_v8 = vld [vmem:[%s2472_s0 + $0x10] sm:$0xff]  ;;  %v24_v12 = vld [vmem:[%s2472_s0 + $0x18] sm:$0xff]  ;;  %v1935_v20 = vld [vmem:[%s2470_s1 + $0x248] sm:$0xff]  }
  0x1a   :  { %1725 = vmatprep.subr.bf16.mxu1 %v1892_v25  ;;  %v31_v9 = vld [vmem:[%s2472_s0 + $0x50] sm:$0xff]  ;;  %v32_v13 = vld [vmem:[%s2472_s0 + $0x58] sm:$0xff]  ;;  %v1936_v21 = vld [vmem:[%s2470_s1 + $0x2c8] sm:$0xff]  }
  0x1b   :  { %v1540_v10 = vcombine.low %v23_v8, %v31_v9  ;;  %v1541_v11 = vcombine.high %v23_v8, %v31_v9  ;;  %v1542_v14 = vcombine.low %v24_v12, %v32_v13  ;;  %v1543_v15 = vcombine.high %v24_v12, %v32_v13  ;;  %v1937_v22 = vld [vmem:[%s2470_s1 + $0x208] sm:$0xff]   ;;  %v1939_v24 = vld [vmem:[%s2470_s1 + $0x250] sm:$0xff]   ;;  %v1947_v32 = vld [vmem:[%s2470_s1 + $0x260] sm:$0xff]  }
  0x1c   :  { %1704 = vmatpush3.bf16.msra.mxu0 %v1893_v26  ;;  %v1938_v23 = vld [vmem:[%s2470_s1 + $0x288] sm:$0xff]   ;;  %v1940_v25 = vld [vmem:[%s2470_s1 + $0x2d0] sm:$0xff]   ;;  %v1948_v33 = vld [vmem:[%s2470_s1 + $0x2e0] sm:$0xff]  }
  0x1d   :  { %1726 = vmatpush3.bf16.msra.mxu1 %v1894_v27  ;;  %1705 = vmatprep.subr.bf16.mxu0 %v1895_v28  ;;  %v1941_v26 = vld [vmem:[%s2470_s1 + $0x210] sm:$0xff]   ;;  %v1943_v28 = vld [vmem:[%s2470_s1 + $0x258] sm:$0xff]   ;;  %v1949_v34 = vld [vmem:[%s2470_s1 + $0x220] sm:$0xff]  }
  0x1e   :  { %1727 = vmatprep.subr.bf16.mxu1 %v1896_v29  ;;  %v1942_v27 = vld [vmem:[%s2470_s1 + $0x290] sm:$0xff]   ;;  %v1944_v29 = vld [vmem:[%s2470_s1 + $0x2d8] sm:$0xff]   ;;  %v1951_v36 = vld [vmem:[%s2470_s1 + $0x268] sm:$0xff]  }
  0x1f   :  { %v1952_v37 = vld [vmem:[%s2470_s1 + $0x2e8] sm:$0xff]   ;;  %v1979_v8 = vld [vmem:[%s2470_s1 + $0x360] sm:$0xff]  }
  0x20   :  { %1706 = vmatpush3.bf16.msra.mxu0 %v1897_v30  ;;  %v1945_v30 = vld [vmem:[%s2470_s1 + $0x218] sm:$0xff]   ;;  %v1954_v39 = vld [vmem:[%s2470_s1 + $0x2a8] sm:$0xff]   ;;  %v1980_v9 = vld [vmem:[%s2470_s1 + $0x3e0] sm:$0xff]  }
  0x21   :  { %1728 = vmatpush3.bf16.msra.mxu1 %v1898_v31  ;;  %1735 = vmatprep.subr.bf16.mxu0 %v1899_v40  ;;  %v1946_v31 = vld [vmem:[%s2470_s1 + $0x298] sm:$0xff]   ;;  %v1955_v40 = vld [vmem:[%s2470_s1 + $0x270] sm:$0xff]   ;;  %v1983_v12 = vld [vmem:[%s2470_s1 + $0x368] sm:$0xff]  }
  0x22   :  { %1757 = vmatprep.subr.bf16.mxu1 %v1900_v41  ;;  %v1956_v41 = vld [vmem:[%s2470_s1 + $0x2f0] sm:$0xff]   ;;  %v1984_v13 = vld [vmem:[%s2470_s1 + $0x3e8] sm:$0xff]  }
  0x23   :  { %1174 = vmatmul.mubr.bf16.vlgmr.msra.gmra.mrb[0].mxu0 %v1536_v35  ;;  %v1950_v35 = vld [vmem:[%s2470_s1 + $0x2a0] sm:$0xff]  }
  0x24   :  { %1215 = vmatmul.mubr.bf16.vlgmr.msra.gmra.mrb[0].mxu1 %v1538_v38  ;;  %1736 = vmatpush3.bf16.msra.mxu0 %v1901_v42  ;;  %v1953_v38 = vld [vmem:[%s2470_s1 + $0x228] sm:$0xff]   ;;  %v1957_v42 = vld [vmem:[%s2470_s1 + $0x230] sm:$0xff]  }
  0x25   :  { %1758 = vmatpush3.bf16.msra.mxu1 %v1902_v43  ;;  %1737 = vmatprep.subr.bf16.mxu0 %v1903_v44  ;;  %v1958_v43 = vld [vmem:[%s2470_s1 + $0x2b0] sm:$0xff]   ;;  %v1959_v44 = vld [vmem:[%s2470_s1 + $0x278] sm:$0xff]  }
  0x26   :  { %1759 = vmatprep.subr.bf16.mxu1 %v1904_v45  ;;  %1255 = vmatprep.mubr.bf16.mxu0 %v1541_v11  ;;  %v1960_v45 = vld [vmem:[%s2470_s1 + $0x2f8] sm:$0xff]   ;;  %v1982_v11 = vld [vmem:[%s2470_s1 + $0x3a0] sm:$0xff]  }
  0x27   :  { %1296 = vmatprep.mubr.bf16.mxu1 %v1543_v15  ;;  %v1986_v15 = vld [vmem:[%s2470_s1 + $0x3a8] sm:$0xff]  }
  0x28   :  { %1738 = vmatpush3.bf16.msra.mxu0 %v1905_v46  ;;  %v1961_v46 = vld [vmem:[%s2470_s1 + $0x238] sm:$0xff]  }
  0x29   :  { %1760 = vmatpush3.bf16.msra.mxu1 %v1906_v47  ;;  %1739 = vmatprep.subr.bf16.mxu0 %v1907_v48  ;;  %v1962_v47 = vld [vmem:[%s2470_s1 + $0x2b8] sm:$0xff]   ;;  %v25_v48 = vld [vmem:[%s2472_s0 + $0x20] sm:$0xff] }
  0x2a   :  { %1761 = vmatprep.subr.bf16.mxu1 %v1908_v49  ;;  %v33_v49 = vld [vmem:[%s2472_s0 + $0x60] sm:$0xff] }
  0x2c   :  { %1740 = vmatpush3.bf16.msra.mxu0 %v1909_v50  ;;  %v26_v50 = vld [vmem:[%s2472_s0 + $0x28] sm:$0xff] }
  0x2d   :  { %1762 = vmatpush3.bf16.msra.mxu1 %v1910_v51  ;;  %1741 = vmatprep.subr.bf16.mxu0 %v1911_v52  ;;  %v34_v51 = vld [vmem:[%s2472_s0 + $0x68] sm:$0xff]  ;;  %v1544_v52 = vcombine.low %v25_v48, %v33_v49 }
  0x2e   :  { %1763 = vmatprep.subr.bf16.mxu1 %v1912_v53  ;;  %v1545_v53 = vcombine.high %v25_v48, %v33_v49 }
  0x30   :  { %1742 = vmatpush3.bf16.msra.mxu0 %v1913_v54  ;;  %v1546_v54 = vcombine.low %v26_v50, %v34_v51 }
  0x31   :  { %1764 = vmatpush3.bf16.msra.mxu1 %v1914_v55  ;;  %1743 = vmatprep.subr.bf16.mxu0 %v1915_v56  ;;  %v1547_v55 = vcombine.high %v26_v50, %v34_v51  ;;  %v1963_v56 = vld [vmem:[%s2470_s1 + $0x340] sm:$0xff]  }
  0x32   :  { %1765 = vmatprep.subr.bf16.mxu1 %v1916_v57  ;;  %v1964_v57 = vld [vmem:[%s2470_s1 + $0x3c0] sm:$0xff]  }
  0x34   :  { %1744 = vmatpush3.bf16.msra.mxu0 %v1917_v58  ;;  %v1965_v58 = vld [vmem:[%s2470_s1 + $0x300] sm:$0xff]  }
  0x35   :  { %1766 = vmatpush3.bf16.msra.mxu1 %v1918_v59  ;;  %1745 = vmatprep.subr.bf16.mxu0 %v1919_v60  ;;  %v1966_v59 = vld [vmem:[%s2470_s1 + $0x380] sm:$0xff]   ;;  %v1967_v60 = vld [vmem:[%s2470_s1 + $0x348] sm:$0xff]  }
  0x36   :  { %1767 = vmatprep.subr.bf16.mxu1 %v1920_v61  ;;  %v1968_v61 = vld [vmem:[%s2470_s1 + $0x3c8] sm:$0xff]  }
  0x38   :  { %1746 = vmatpush3.bf16.msra.mxu0 %v1921_v62  ;;  %v1969_v62 = vld [vmem:[%s2470_s1 + $0x308] sm:$0xff]  }
  0x39   :  { %1768 = vmatpush3.bf16.msra.mxu1 %v1922_v63  ;;  %1747 = vmatprep.subr.bf16.mxu0 %v1923_v0  ;;  %v1970_v63 = vld [vmem:[%s2470_s1 + $0x388] sm:$0xff]   ;;  %v1971_v0 = vld [vmem:[%s2470_s1 + $0x350] sm:$0xff]  }
  0x3a   :  { %1769 = vmatprep.subr.bf16.mxu1 %v1924_v1  ;;  %v1972_v1 = vld [vmem:[%s2470_s1 + $0x3d0] sm:$0xff]  }
  0x3c   :  { %1748 = vmatpush3.bf16.msra.mxu0 %v1925_v2  ;;  %v1973_v2 = vld [vmem:[%s2470_s1 + $0x310] sm:$0xff]  }
  0x3d   :  { %1770 = vmatpush3.bf16.msra.mxu1 %v1926_v3  ;;  %1749 = vmatprep.subr.bf16.mxu0 %v1927_v4  ;;  %v1974_v3 = vld [vmem:[%s2470_s1 + $0x390] sm:$0xff]   ;;  %v1975_v4 = vld [vmem:[%s2470_s1 + $0x358] sm:$0xff]  }
  0x3e   :  { %1771 = vmatprep.subr.bf16.mxu1 %v1928_v5  ;;  %v1976_v5 = vld [vmem:[%s2470_s1 + $0x3d8] sm:$0xff]  }
  0x40   :  { %1750 = vmatpush3.bf16.msra.mxu0 %v1929_v6  ;;  %v1977_v6 = vld [vmem:[%s2470_s1 + $0x318] sm:$0xff]  }
  0x41   :  { %1772 = vmatpush3.bf16.msra.mxu1 %v1930_v7  ;;  %1779 = vmatprep.subr.bf16.mxu0 %v1931_v16  ;;  %v1978_v7 = vld [vmem:[%s2470_s1 + $0x398] sm:$0xff]   ;;  %v1987_v16 = vld [vmem:[%s2470_s1 + $0x370] sm:$0xff]  }
  0x42   :  { %1801 = vmatprep.subr.bf16.mxu1 %v1932_v17  ;;  %v1988_v17 = vld [vmem:[%s2470_s1 + $0x3f0] sm:$0xff]  }
  0x43   :  { %1256 = vmatmul.mubr.bf16.vlgmr.msra.gmra.mrb[4].mxu0 %v1540_v10  ;;  %v1981_v10 = vld [vmem:[%s2470_s1 + $0x320] sm:$0xff]  }
  0x44   :  { %1297 = vmatmul.mubr.bf16.vlgmr.msra.gmra.mrb[4].mxu1 %v1542_v14  ;;  %1780 = vmatpush3.bf16.msra.mxu0 %v1933_v18  ;;  %v1985_v14 = vld [vmem:[%s2470_s1 + $0x328] sm:$0xff]   ;;  %v1989_v18 = vld [vmem:[%s2470_s1 + $0x330] sm:$0xff]  }
  0x45   :  { %1802 = vmatpush3.bf16.msra.mxu1 %v1934_v19  ;;  %1781 = vmatprep.subr.bf16.mxu0 %v1935_v20  ;;  %v1990_v19 = vld [vmem:[%s2470_s1 + $0x3b0] sm:$0xff]   ;;  %v1991_v20 = vld [vmem:[%s2470_s1 + $0x378] sm:$0xff]  }
  0x46   :  { %1803 = vmatprep.subr.bf16.mxu1 %v1936_v21  ;;  %1337 = vmatprep.mubr.bf16.mxu0 %v1545_v53  ;;  %v1992_v21 = vld [vmem:[%s2470_s1 + $0x3f8] sm:$0xff]  }
  0x47   :  { %1378 = vmatprep.mubr.bf16.mxu1 %v1547_v55 }
  0x48   :  { %1782 = vmatpush3.bf16.msra.mxu0 %v1937_v22  ;;  %v1993_v22 = vld [vmem:[%s2470_s1 + $0x338] sm:$0xff]  }
  0x49   :  { %1804 = vmatpush3.bf16.msra.mxu1 %v1938_v23  ;;  %1783 = vmatprep.subr.bf16.mxu0 %v1939_v24  ;;  %v1994_v23 = vld [vmem:[%s2470_s1 + $0x3b8] sm:$0xff]   ;;  %v27_v24 = vld [vmem:[%s2472_s0 + $0x30] sm:$0xff] }
  0x4a   :  { %1805 = vmatprep.subr.bf16.mxu1 %v1940_v25  ;;  %v35_v25 = vld [vmem:[%s2472_s0 + $0x70] sm:$0xff] }
  0x4c   :  { %1784 = vmatpush3.bf16.msra.mxu0 %v1941_v26  ;;  %v28_v26 = vld [vmem:[%s2472_s0 + $0x38] sm:$0xff] }
  0x4d   :  { %1806 = vmatpush3.bf16.msra.mxu1 %v1942_v27  ;;  %1785 = vmatprep.subr.bf16.mxu0 %v1943_v28  ;;  %v1548_v27 = vcombine.low %v27_v24, %v35_v25  ;;  %v1549_v28 = vcombine.high %v27_v24, %v35_v25 }
  0x4e   :  { %1807 = vmatprep.subr.bf16.mxu1 %v1944_v29  ;;  %v36_v29 = vld [vmem:[%s2472_s0 + $0x78] sm:$0xff] }
  0x50   :  { %1786 = vmatpush3.bf16.msra.mxu0 %v1945_v30  ;;  %v1550_v30 = vcombine.low %v28_v26, %v36_v29 }
  0x51   :  { %1808 = vmatpush3.bf16.msra.mxu1 %v1946_v31  ;;  %1787 = vmatprep.subr.bf16.mxu0 %v1947_v32  ;;  %v1551_v31 = vcombine.high %v28_v26, %v36_v29 }
  0x52   :  { %1809 = vmatprep.subr.bf16.mxu1 %v1948_v33 }
  0x54   :  { %1788 = vmatpush3.bf16.msra.mxu0 %v1949_v34 }
  0x55   :  { %1810 = vmatpush3.bf16.msra.mxu1 %v1950_v35  ;;  %1789 = vmatprep.subr.bf16.mxu0 %v1951_v36 }
  0x56   :  { %1811 = vmatprep.subr.bf16.mxu1 %v1952_v37 }
  0x58   :  { %1790 = vmatpush3.bf16.msra.mxu0 %v1953_v38 }
  0x59   :  { %1812 = vmatpush3.bf16.msra.mxu1 %v1954_v39  ;;  %1791 = vmatprep.subr.bf16.mxu0 %v1955_v40 }
  0x5a   :  { %1813 = vmatprep.subr.bf16.mxu1 %v1956_v41 }
  0x5c   :  { %1792 = vmatpush3.bf16.msra.mxu0 %v1957_v42 }
  0x5d   :  { %1814 = vmatpush3.bf16.msra.mxu1 %v1958_v43  ;;  %1793 = vmatprep.subr.bf16.mxu0 %v1959_v44 }
  0x5e   :  { %1815 = vmatprep.subr.bf16.mxu1 %v1960_v45 }
  0x60   :  { %1794 = vmatpush3.bf16.msra.mxu0 %v1961_v46 }
  0x61   :  { %1816 = vmatpush3.bf16.msra.mxu1 %v1962_v47  ;;  %1823 = vmatprep.subr.bf16.mxu0 %v1963_v56 }
  0x62   :  { %1845 = vmatprep.subr.bf16.mxu1 %v1964_v57 }
  0x63   :  { %1338 = vmatmul.mubr.bf16.vlgmr.msra.gmra.mrb[8].mxu0 %v1544_v52 }
  0x64   :  { %1379 = vmatmul.mubr.bf16.vlgmr.msra.gmra.mrb[8].mxu1 %v1546_v54  ;;  %1824 = vmatpush3.bf16.msra.mxu0 %v1965_v58 }
  0x65   :  { %1846 = vmatpush3.bf16.msra.mxu1 %v1966_v59  ;;  %1825 = vmatprep.subr.bf16.mxu0 %v1967_v60 }
  0x66   :  { %1847 = vmatprep.subr.bf16.mxu1 %v1968_v61  ;;  %1419 = vmatprep.mubr.bf16.mxu0 %v1549_v28 }
  0x67   :  { %1460 = vmatprep.mubr.bf16.mxu1 %v1551_v31 }
  0x68   :  { %1826 = vmatpush3.bf16.msra.mxu0 %v1969_v62 }
  0x69   :  { %1848 = vmatpush3.bf16.msra.mxu1 %v1970_v63  ;;  %1827 = vmatprep.subr.bf16.mxu0 %v1971_v0 }
  0x6a   :  { %1849 = vmatprep.subr.bf16.mxu1 %v1972_v1 }
  0x6c   :  { %1828 = vmatpush3.bf16.msra.mxu0 %v1973_v2 }
  0x6d   :  { %1850 = vmatpush3.bf16.msra.mxu1 %v1974_v3  ;;  %1829 = vmatprep.subr.bf16.mxu0 %v1975_v4 }
  0x6e   :  { %1851 = vmatprep.subr.bf16.mxu1 %v1976_v5 }
  0x70   :  { %1830 = vmatpush3.bf16.msra.mxu0 %v1977_v6 }
  0x71   :  { %1852 = vmatpush3.bf16.msra.mxu1 %v1978_v7  ;;  %1831 = vmatprep.subr.bf16.mxu0 %v1979_v8 }
  0x72   :  { %1853 = vmatprep.subr.bf16.mxu1 %v1980_v9 }
  0x74   :  { %1832 = vmatpush3.bf16.msra.mxu0 %v1981_v10 }
  0x75   :  { %1854 = vmatpush3.bf16.msra.mxu1 %v1982_v11  ;;  %1833 = vmatprep.subr.bf16.mxu0 %v1983_v12 }
  0x76   :  { %1855 = vmatprep.subr.bf16.mxu1 %v1984_v13 }
  0x78   :  { %1834 = vmatpush3.bf16.msra.mxu0 %v1985_v14 }
  0x79   :  { %1856 = vmatpush3.bf16.msra.mxu1 %v1986_v15  ;;  %1835 = vmatprep.subr.bf16.mxu0 %v1987_v16 }
  0x7a   :  { %1857 = vmatprep.subr.bf16.mxu1 %v1988_v17 }
  0x7c   :  { %1836 = vmatpush3.bf16.msra.mxu0 %v1989_v18 }
  0x7d   :  { %1858 = vmatpush3.bf16.msra.mxu1 %v1990_v19  ;;  %1837 = vmatprep.subr.bf16.mxu0 %v1991_v20 }
  0x7e   :  { %1859 = vmatprep.subr.bf16.mxu1 %v1992_v21 }
  0x80   :  { %1838 = vmatpush3.bf16.msra.mxu0 %v1993_v22 }
  0x81   :  { %1860 = vmatpush3.bf16.msra.mxu1 %v1994_v23 }
  0x83   :  { %1420 = vmatmul.mubr.bf16.vlgmr.msra.gmra.mrb[12].mxu0 %v1548_v27 }
  0x84   :  { %1461 = vmatmul.mubr.bf16.vlgmr.msra.gmra.mrb[12].mxu1 %v1550_v30  ;;  %v1477_v30 = vlaneseq }
  0xf6   :  { %v1707_v32 = vpop.f32.mrb[0].mxu0 }
  0xf7   :  { %v1729_v33 = vpop.f32.mrb[0].mxu1  ;;  %v1708_v34 = vpop.f32.mrb[1].mxu0 }
  0xf8   :  { %v1709_v35 = vadd.f32 %v1708_v34, %v1707_v32  ;;  %v1730_v36 = vpop.f32.mrb[1].mxu1  ;;  %v1710_v37 = vpop.f32.mrb[2].mxu0  ;;  %v1478_v32 = vand.u32 127, %v1477_v30 }
  0xf9   :  { %v1731_v38 = vadd.f32 %v1730_v36, %v1729_v33  ;;  %v1732_v39 = vpop.f32.mrb[2].mxu1  ;;  %v1711_v40 = vpop.f32.mrb[3].mxu0 }
  0xfa   :  { %v1712_v41 = vadd.f32 %v1711_v40, %v1710_v37  ;;  %v1733_v42 = vpop.f32.mrb[3].mxu1  ;;  %vm1479_vm0 = vcmp.lt.s32.totalorder %v1478_v32, 64 }
  0xfb   :  { %v1217_v43 = vadd.f32 %v1731_v38, %v1709_v35  ;;  %v1734_v44 = vadd.f32 %v1733_v42, %v1732_v39 }
  0xfd   :  { %v1220_v45 = vadd.f32 %v1734_v44, %v1712_v41 }
 0x116   :  { %v1751_v46 = vpop.f32.mrb[4].mxu0 }
 0x117   :  { %v1773_v47 = vpop.f32.mrb[4].mxu1  ;;  %v1752_v48 = vpop.f32.mrb[5].mxu0 }
 0x118   :  { %v1753_v49 = vadd.f32 %v1752_v48, %v1751_v46  ;;  %v1774_v50 = vpop.f32.mrb[5].mxu1  ;;  %v1754_v51 = vpop.f32.mrb[6].mxu0 }
 0x119   :  { %v1775_v52 = vadd.f32 %v1774_v50, %v1773_v47  ;;  %v1776_v53 = vpop.f32.mrb[6].mxu1  ;;  %v1755_v54 = vpop.f32.mrb[7].mxu0 }
 0x11a   :  { %v1258_v55 = vadd.f32 %v1753_v49, %v1217_v43  ;;  %v1756_v56 = vadd.f32 %v1755_v54, %v1754_v51  ;;  %v1777_v57 = vpop.f32.mrb[7].mxu1  ;;  %v1680_v49 = vld [vmem:[%s2473_s3] ss:$0 sm:$0xff] }
 0x11b   :  { %v1778_v58 = vadd.f32 %v1777_v57, %v1776_v53  ;;  %v1681_v51 = vld [vmem:[%s2474_s4] ss:$0 sm:$0xff] }
 0x11c   :  { %v1299_v59 = vadd.f32 %v1775_v52, %v1258_v55  ;;  %v1261_v60 = vadd.f32 %v1756_v56, %v1220_v45 }
 0x11e   :  { %v1302_v61 = vadd.f32 %v1778_v58, %v1261_v60 }
 0x136   :  { %v1795_v62 = vpop.f32.mrb[8].mxu0 }
 0x137   :  { %v1817_v63 = vpop.f32.mrb[8].mxu1  ;;  %v1796_v0 = vpop.f32.mrb[9].mxu0 }
 0x138   :  { %v1818_v1 = vpop.f32.mrb[9].mxu1  ;;  %v1797_v2 = vadd.f32 %v1796_v0, %v1795_v62  ;;  %v1798_v4 = vpop.f32.mrb[10].mxu0 }
 0x139   :  { %v1819_v3 = vadd.f32 %v1818_v1, %v1817_v63  ;;  %v1820_v5 = vpop.f32.mrb[10].mxu1  ;;  %v1799_v6 = vpop.f32.mrb[11].mxu0 }
 0x13a   :  { %v1821_v7 = vpop.f32.mrb[11].mxu1  ;;  %v1340_v8 = vadd.f32 %v1797_v2, %v1299_v59  ;;  %v1800_v9 = vadd.f32 %v1799_v6, %v1798_v4 }
 0x13b   :  { %v1822_v10 = vadd.f32 %v1821_v7, %v1820_v5 }
 0x13c   :  { %v1381_v11 = vadd.f32 %v1819_v3, %v1340_v8  ;;  %v1343_v12 = vadd.f32 %v1800_v9, %v1302_v61 }
 0x13e   :  { %v1384_v13 = vadd.f32 %v1822_v10, %v1343_v12 }
 0x156   :  { %v1839_v14 = vpop.f32.mrb[12].mxu0 }
 0x157   :  { %v1861_v15 = vpop.f32.mrb[12].mxu1  ;;  %v1840_v16 = vpop.f32.mrb[13].mxu0 }
 0x158   :  { %v1841_v17 = vadd.f32 %v1840_v16, %v1839_v14  ;;  %v1862_v18 = vpop.f32.mrb[13].mxu1  ;;  %v1842_v19 = vpop.f32.mrb[14].mxu0 }
 0x159   :  { %v1863_v20 = vadd.f32 %v1862_v18, %v1861_v15  ;;  %v1864_v21 = vpop.f32.mrb[14].mxu1  ;;  %v1843_v22 = vpop.f32.mrb[15].mxu0 }
 0x15a   :  { %v1422_v23 = vadd.f32 %v1841_v17, %v1381_v11  ;;  %v1844_v24 = vadd.f32 %v1843_v22, %v1842_v19  ;;  %v1865_v25 = vpop.f32.mrb[15].mxu1 }
 0x15b   :  { %v1866_v26 = vadd.f32 %v1865_v25, %v1864_v21 }
 0x15c   :  { %v1425_v27 = vadd.f32 %v1844_v24, %v1384_v13  ;;  %v1463_v28 = vadd.f32 %v1863_v20, %v1422_v23 }
 0x15e   :  { %1469 = vadd.xlane.f32.xlu0 %v1463_v28  ;;  %v1466_v29 = vadd.f32 %v1866_v26, %v1425_v27 }
 0x162   :  { %1471 = vadd.xlane.f32.xlu0 %v1466_v29 }
 0x1eb   :  { %v1470_v31 = vpop.xlane.xlu0 %1469 }
 0x1ec   :  { %v1473_v33 = vmul.f32 0.015625, %v1470_v31 }
 0x1ee   :  { %v1475_v34 = vsub.f32 %v1463_v28, %v1473_v33 }
 0x1ef   :  { %v1472_v35 = vpop.xlane.xlu0 %1471 }
 0x1f0   :  { %v1474_v36 = vmul.f32 0.015625, %v1472_v35  ;;  %v1480_v37 = vmul.f32 %v1475_v34, %v1475_v34 }
 0x1f2   :  { %v1476_v38 = vsub.f32 %v1466_v29, %v1474_v36  ;;  %v1484_v39 = vsel %vm1479_vm0, %v1480_v37, 0.0 }
 0x1f3   :  { %1486 = vadd.xlane.f32.xlu1 %v1484_v39 }
 0x1f4   :  { %v1481_v40 = vmul.f32 %v1476_v38, %v1476_v38 }
 0x1f6   :  { %v1485_v41 = vsel %vm1479_vm0, %v1481_v40, 0.0 }
 0x1f7   :  { %1488 = vadd.xlane.f32.xlu1 %v1485_v41 }
 0x280   :  { %v1487_v42 = vpop.xlane.xlu1 %1486 }
 0x281   :  { %v1490_v43 = vmul.f32 0.015625, %v1487_v42 }
 0x283   :  { %v1492_v44 = vadd.f32 1e-06, %v1490_v43 }
 0x284   :  { %v1489_v45 = vpop.xlane.xlu1 %1488 }
 0x285   :  { %1995 = vrsqrt.f32 %v1492_v44  ;;  %v1491_v46 = vmul.f32 0.015625, %v1489_v45 }
 0x287   :  { %v1493_v47 = vadd.f32 1e-06, %v1491_v46 }
 0x289   :  { %1997 = vrsqrt.f32 %v1493_v47 }
 0x28f   :  { %v1996_v48 = vpop.eup %1995 }
 0x290   :  { %v1496_v50 = vmul.f32 %v1996_v48, %v1475_v34 }
 0x292   :  { %v1505_v52 = vmul.f32 %v1680_v49, %v1496_v50 }
 0x293   :  { %v1998_v53 = vpop.eup %1997 }
 0x294   :  { %v1514_v54 = vadd.f32 %v1681_v51, %v1505_v52  ;;  %v1497_v55 = vmul.f32 %v1998_v53, %v1476_v38 }
 0x296   :  { %v1506_v56 = vmul.f32 %v1680_v49, %v1497_v55  ;;  %v1518_v57 = vmul.f32 0.2, %v1514_v54  ;;  %vm1516_vm1 = vcmp.gt.f32.partialorder %v1514_v54, 0.0 }
 0x298   :  { %v1515_v58 = vadd.f32 %v1681_v51, %v1506_v56  ;;  %v1520_v60 = vsel %vm1516_vm1, %v1514_v54, %v1518_v57 }
 0x29a   :  { %vm1517_vm2 = vcmp.gt.f32.partialorder %v1515_v58, 0.0  ;;  %v1519_v59 = vmul.f32 0.2, %v1515_v58 }
 0x29c   :  { %v1521_v61 = vsel %vm1517_vm2, %v1515_v58, %v1519_v59 }
 0x29d   :  { %v1689_v62 = vpack.c.bf16 %v1521_v61, %v1520_v60 }
 0x29f   :  { %1690 = vst [vmem:[%s2475_s5] sm:$0xff] %v1689_v62  }

// kernel: nlayer_discriminator.9
= control target key start
LH: loop header
LB: loop body
LE: loop exit
PB: predicated region body
PF: predicated region fallthrough
CT: control target
= control target key end

     0   :  { %s1585_s30 = smov 0   ;;  %s1802_s0 = inlined_call_operand.vmem [shape: bf16[2,16,128], index: 0, kind: input, shape index: {}]   ;;  %s1803_s1 = inlined_call_operand.vmem [shape: bf16[2,128,128], index: 1, kind: input, shape index: {}]   ;;  %s1804_s2 = inlined_call_operand.vmem [shape: f32[2,1,128], index: 2, kind: input, shape index: {}]   ;;  %s1805_s3 = inlined_call_operand.vmem [shape: f32[1,128], index: 3, kind: input, shape index: {}, may-alias: {3,6}]   ;;  %s1806_s4 = inlined_call_operand.vmem [shape: bf16[2,128,128], index: 4, kind: input, shape index: {}]   ;;  %s1807_s5 = inlined_call_operand.vmem [shape: f32[2,1,128], index: 5, kind: input, shape index: {}]   ;;  %s1808_s6 = inlined_call_operand.vmem [shape: f32[1,128], index: 6, kind: input, shape index: {}, may-alias: {3,6}]   ;;  %s1809_s7 = inlined_call_operand.vmem [shape: bf16[128,384], index: 7, kind: input, shape index: {}]   ;;  %s1810_s8 = inlined_call_operand.vmem [shape: bf16[128,128], index: 8, kind: input, shape index: {}]   ;;  %s1811_s9 = inlined_call_operand.vmem [shape: f32[2,16,128], index: 9, kind: output, shape index: {}]  }
   0x1 LB: > { %s1242_s10 = sadd.s32 4294967295, %s1530_s30   ;;  %p1246_p0 = scmp.ge.s32.totalorder %s1530_s30, 1  ;;  %s1530_s30 = sphi %s1585_s30, %s19_s30  }
   0x2   : > { %p323_p1 = scmp.lt.s32.totalorder %s1530_s30, 3 }
   0x4   : > { %p324_p2 = pnand %p1246_p0, %p323_p1 }
   0x5   : > { %p375_p3 = scmp.lt.s32.totalorder (!%p324_p2), %s1242_s10, 1  ;;  %v1532_v0 = vmov (!%p324_p2), 0.0   ;;  %vm1533_vm0 = vmmov (!%p324_p2), 0   ;;  %v1475_v18 = vld [vmem:[%s1809_s7] ss:$12 sps:$4 sm:$0xff] (!%p324_p2)   ;;  %v1534_v61 = vmov (!%p324_p2), 0  }
   0x6   : > { %327 = sbr.rel (%p324_p2) target bundleno = 1690 (0x69a), region = 56  ;;  %1355 = vmatprep.subr.bf16.mxu0 (!%p324_p2), %v1532_v0  ;;  %1371 = vmatprep.mubr.msk.bf16.mxu0 (!%p324_p2), %vm1533_vm0, %v1532_v0  ;;  %v1477_v19 = vld [vmem:[%s1809_s7 + $0x4] ss:$12 sps:$4 sm:$0xff] (!%p324_p2)   ;;  %v1481_v20 = vld [vmem:[%s1809_s7 + $0x1c] ss:$12 sps:$4 sm:$0xff] (!%p324_p2)   ;;  %vm967_vm6 = vcmask (!%p324_p2), 130048  }
   0x7   : > { %1375 = vmatprep.subr.bf16.mxu1 (!%p324_p2), %v1532_v0  ;;  %1391 = vmatprep.mubr.msk.bf16.mxu1 (!%p324_p2), %vm1533_vm0, %v1532_v0  ;;  %v1479_v21 = vld [vmem:[%s1809_s7 + $0x18] ss:$12 sps:$4 sm:$0xff] (!%p324_p2)   ;;  %v1485_v22 = vld [vmem:[%s1809_s7 + $0x34] ss:$12 sps:$4 sm:$0xff] (!%p324_p2)   ;;  %v1483_v23 = vld [vmem:[%s1809_s7 + $0x30] ss:$12 sps:$4 sm:$0xff] (!%p324_p2)  }
   0x8   : > { %v1489_v24 = vld [vmem:[%s1809_s7 + $0x4c] ss:$12 sps:$4 sm:$0xff] (!%p324_p2)   ;;  %v1487_v25 = vld [vmem:[%s1809_s7 + $0x48] ss:$12 sps:$4 sm:$0xff] (!%p324_p2)   ;;  %v1493_v26 = vld [vmem:[%s1809_s7 + $0x64] ss:$12 sps:$4 sm:$0xff] (!%p324_p2)  }
   0x9   : > { %v1491_v27 = vld [vmem:[%s1809_s7 + $0x60] ss:$12 sps:$4 sm:$0xff] (!%p324_p2)   ;;  %v1478_v46 = vld [vmem:[%s1809_s7 + $0x8] ss:$12 sps:$4 sm:$0xff] (!%p324_p2)   ;;  %v1486_v49 = vld [vmem:[%s1809_s7 + $0x38] ss:$12 sps:$4 sm:$0xff] (!%p324_p2)  }
   0xa   : > { %v1265_v33 = vld [vmem:[%s1805_s3] ss:$0 sm:$0xff] (!%p324_p2)  ;;  %v1490_v50 = vld [vmem:[%s1809_s7 + $0x50] ss:$12 sps:$4 sm:$0xff] (!%p324_p2)   ;;  %v1494_v51 = vld [vmem:[%s1809_s7 + $0x68] ss:$12 sps:$4 sm:$0xff] (!%p324_p2)  }
   0xb   : > { %v1482_v48 = vld [vmem:[%s1809_s7 + $0x20] ss:$12 sps:$4 sm:$0xff] (!%p324_p2)   ;;  %v1497_v52 = vld [vmem:[%s1809_s7 + $0x7c] ss:$12 sps:$4 sm:$0xff] (!%p324_p2)   ;;  %v1495_v53 = vld [vmem:[%s1809_s7 + $0x78] ss:$12 sps:$4 sm:$0xff] (!%p324_p2)  }
   0xc   : > { %v1498_v54 = vld [vmem:[%s1809_s7 + $0x80] ss:$12 sps:$4 sm:$0xff] (!%p324_p2)   ;;  %v1499_v56 = vld [vmem:[%s1809_s7 + $0x90] ss:$12 sps:$4 sm:$0xff] (!%p324_p2)   ;;  %v1502_v57 = vld [vmem:[%s1809_s7 + $0x98] ss:$12 sps:$4 sm:$0xff] (!%p324_p2)  }
   0xd   : > { %s1813_s10 = smov (!%p375_p3, %s1242_s10), 1  ;;  %v1501_v55 = vld [vmem:[%s1809_s7 + $0x94] ss:$12 sps:$4 sm:$0xff]   ;;  %v1505_v58 = vld [vmem:[%s1809_s7 + $0xac] ss:$12 sps:$4 sm:$0xff]  }
   0xe   : > { %s1312_s11 = sshll.u32 %s1813_s10, 6  ;;  %s1311_s18 = sshll.u32 %s1813_s10, 3  ;;  %v1503_v59 = vld [vmem:[%s1809_s7 + $0xa8] ss:$12 sps:$4 sm:$0xff]   ;;  %v1506_v60 = vld [vmem:[%s1809_s7 + $0xb0] ss:$12 sps:$4 sm:$0xff]  }
   0xf   : > { %s1605_s14 = scalar_lea.vmem %s1803_s1, %s1312_s11  ;;  %s1614_s17 = scalar_lea.vmem %s1806_s4, %s1312_s11 }
  0x10   : > { %v1458_v1 = vld [vmem:[%s1605_s14] sm:$0xff]   ;;  %v1459_v2 = vld [vmem:[%s1605_s14 + $0x8] sm:$0xff]   ;;  %v1460_v3 = vld [vmem:[%s1605_s14 + $0x10] sm:$0xff]   ;;  %s379_s21 = scalar_lea.vmem %s1802_s0, %s1311_s18  ;;  %s387_s25 = scalar_lea.vmem %s1804_s2, %s1813_s10 }
  0x11   : > { %1356 = vmatpush3.bf16.msra.mxu0 %v1458_v1  ;;  %v1467_v4 = vld [vmem:[%s1614_s17] sm:$0xff]   ;;  %v1461_v5 = vld [vmem:[%s1605_s14 + $0x18] sm:$0xff]   ;;  %v1468_v6 = vld [vmem:[%s1614_s17 + $0x8] sm:$0xff]   ;;  %s395_s20 = scalar_lea.vmem %s1807_s5, %s1813_s10 }
  0x12   : > { %1357 = vmatprep.subr.bf16.mxu0 %v1532_v0  ;;  %1376 = vmatpush3.bf16.msra.mxu1 %v1467_v4  ;;  %v1462_v7 = vld [vmem:[%s1605_s14 + $0x20] sm:$0xff]   ;;  %v1469_v8 = vld [vmem:[%s1614_s17 + $0x10] sm:$0xff]   ;;  %v1463_v9 = vld [vmem:[%s1605_s14 + $0x28] sm:$0xff]  }
  0x13   : > { %1377 = vmatprep.subr.bf16.mxu1 %v1532_v0  ;;  %v1470_v10 = vld [vmem:[%s1614_s17 + $0x18] sm:$0xff]   ;;  %v1464_v11 = vld [vmem:[%s1605_s14 + $0x30] sm:$0xff]   ;;  %v1471_v12 = vld [vmem:[%s1614_s17 + $0x20] sm:$0xff]  }
  0x14   : > { %v1465_v13 = vld [vmem:[%s1605_s14 + $0x38] sm:$0xff]   ;;  %v402_v14 = vld [vmem:[%s379_s21] sm:$0xff]   ;;  %v1472_v15 = vld [vmem:[%s1614_s17 + $0x28] sm:$0xff]  }
  0x15   : > { %1358 = vmatpush3.bf16.msra.mxu0 %v1459_v2  ;;  %v1473_v16 = vld [vmem:[%s1614_s17 + $0x30] sm:$0xff]   ;;  %v1474_v17 = vld [vmem:[%s1614_s17 + $0x38] sm:$0xff]   ;;  %v1255_v28 = vld [vmem:[%s387_s25] ss:$0 sm:$0xff]  ;;  %v404_v37 = vunpack.c.l.bf16 %v402_v14  ;;  %v405_v40 = vunpack.c.h.bf16 %v402_v14 }
  0x16   : > { %1359 = vmatprep.subr.bf16.mxu0 %v1532_v0  ;;  %1378 = vmatpush3.bf16.msra.mxu1 %v1468_v6  ;;  %v1266_v62 = vld [vmem:[%s395_s20] ss:$0 sm:$0xff]  ;;  %s1314_s20 = sshll.u32 %s1813_s10, 4 }
  0x17   : > { %1379 = vmatprep.subr.bf16.mxu1 %v1532_v0  ;;  %v1275_v4 = vld [vmem:[%s1808_s6] ss:$0 sm:$0xff]  ;;  %s400_s23 = scalar_lea.vmem %s1811_s9, %s1314_s20 }
  0x19   : > { %1360 = vmatpush3.bf16.msra.mxu0 %v1460_v3 }
  0x1a   : > { %1361 = vmatprep.subr.bf16.mxu0 %v1532_v0  ;;  %1380 = vmatpush3.bf16.msra.mxu1 %v1469_v8 }
  0x1b   : > { %1381 = vmatprep.subr.bf16.mxu1 %v1532_v0 }
  0x1d   : > { %1362 = vmatpush3.bf16.msra.mxu0 %v1461_v5 }
  0x1e   : > { %1363 = vmatprep.subr.bf16.mxu0 %v1532_v0  ;;  %1382 = vmatpush3.bf16.msra.mxu1 %v1470_v10 }
  0x1f   : > { %1383 = vmatprep.subr.bf16.mxu1 %v1532_v0 }
  0x21   : > { %1364 = vmatpush3.bf16.msra.mxu0 %v1462_v7 }
  0x22   : > { %1365 = vmatprep.subr.bf16.mxu0 %v1532_v0  ;;  %1384 = vmatpush3.bf16.msra.mxu1 %v1471_v12 }
  0x23   : > { %1385 = vmatprep.subr.bf16.mxu1 %v1532_v0 }
  0x25   : > { %1366 = vmatpush3.bf16.msra.mxu0 %v1463_v9 }
  0x26   : > { %1367 = vmatprep.subr.bf16.mxu0 %v1532_v0  ;;  %1386 = vmatpush3.bf16.msra.mxu1 %v1472_v15 }
  0x27   : > { %1387 = vmatprep.subr.bf16.mxu1 %v1532_v0 }
  0x29   : > { %1368 = vmatpush3.bf16.msra.mxu0 %v1464_v11 }
  0x2a   : > { %1369 = vmatprep.subr.bf16.mxu0 %v1532_v0  ;;  %1388 = vmatpush3.bf16.msra.mxu1 %v1473_v16 }
  0x2b   : > { %1389 = vmatprep.subr.bf16.mxu1 %v1532_v0 }
  0x2d   : > { %1370 = vmatpush3.bf16.msra.mxu0 %v1465_v13 }
  0x2e   : > { %1390 = vmatpush3.bf16.msra.mxu1 %v1474_v17  ;;  %832 = vmatprep.subr.bf16.mxu0 %v1477_v19 }
  0x2f   : > { %1395 = vmatprep.subr.bf16.mxu1 %v1532_v0 }
  0x30   : > { %1372 = vmatmul.mubr.bf16.vlgmr.msra.gmra.mrb[0].mxu0 %v402_v14 }
  0x31   : > { %833 = vmatpush1.bf16.msra.mxu0 %v1475_v18  ;;  %864 = vmatprep.mubr.bf16.mxu0 %v1534_v61 }
  0x32   : > { %834 = vmatprep.subr.bf16.mxu0 %v1481_v20 }
  0x35   : > { %835 = vmatpush1.bf16.msra.mxu0 %v1479_v21 }
  0x36   : > { %836 = vmatprep.subr.bf16.mxu0 %v1485_v22 }
  0x39   : > { %837 = vmatpush1.bf16.msra.mxu0 %v1483_v23 }
  0x3a   : > { %838 = vmatprep.subr.bf16.mxu0 %v1489_v24 }
  0x3d   : > { %839 = vmatpush1.bf16.msra.mxu0 %v1487_v25 }
  0x3e   : > { %840 = vmatprep.subr.bf16.mxu0 %v1493_v26 }
  0x41   : > { %841 = vmatpush1.bf16.msra.mxu0 %v1491_v27  ;;  %v962_v27 = vlaneseq }
  0x42   : > { %842 = vmatprep.subr.bf16.mxu0 %v1497_v52  ;;  %v1510_v52 = vld [vmem:[%s1810_s8 + $0x18] sm:$0xff]  }
  0x45   : > { %843 = vmatpush1.bf16.msra.mxu0 %v1495_v53  ;;  %v1511_v53 = vld [vmem:[%s1810_s8 + $0x20] sm:$0xff]  }
  0x46   : > { %844 = vmatprep.subr.bf16.mxu0 %v1501_v55  ;;  %v1513_v55 = vld [vmem:[%s1810_s8 + $0x30] sm:$0xff]  }
  0x49   : > { %845 = vmatpush1.bf16.msra.mxu0 %v1499_v56 }
  0x4a   : > { %846 = vmatprep.subr.bf16.mxu0 %v1505_v58 }
  0x4d   : > { %847 = vmatpush1.bf16.msra.mxu0 %v1503_v59 }
  0x4e   : > { %1427 = vmatprep.subr.bf16.mxu0 %v1532_v0 }
 0x103   : > { %v517_v29 = vpop.f32.mrb[0].mxu0 }
 0x104   : > { %v518_v30 = vadd.f32 %v1255_v28, %v517_v29  ;;  %v1373_v31 = vpop.f32.mrb[1].mxu0 }
 0x105   : > { %v520_v32 = vpop.f32.mrb[2].mxu0 }
 0x106   : > { %vm525_vm1 = vcmp.gt.f32.partialorder %v518_v30, 0.0  ;;  %v527_v34 = vmul.f32 0.2, %v518_v30  ;;  %v521_v35 = vadd.f32 %v1255_v28, %v520_v32  ;;  %v1374_v36 = vpop.f32.mrb[3].mxu0  ;;  %v963_v28 = vand.u32 127, %v962_v27 }
 0x108   : > { %v529_v38 = vsel %vm525_vm1, %v518_v30, %v527_v34  ;;  %vm526_vm2 = vcmp.gt.f32.partialorder %v521_v35, 0.0  ;;  %v528_v39 = vmul.f32 0.2, %v521_v35  ;;  %vm964_vm5 = vcmp.lt.s32.totalorder %v963_v28, 1 }
 0x109   : > { %v537_v41 = vmul.f32 %v1265_v33, %v529_v38 }
 0x10a   : > { %v530_v42 = vsel %vm526_vm2, %v521_v35, %v528_v39 }
 0x10b   : > { %v538_v43 = vmul.f32 %v1265_v33, %v530_v42  ;;  %v539_v44 = vadd.f32 %v537_v41, %v404_v37 }
 0x10d   : > { %v540_v45 = vadd.f32 %v538_v43, %v405_v40 }
 0x10f   : > { %v541_v47 = vpack.c.bf16 %v540_v45, %v539_v44 }
 0x111   : > { %1392 = vmatmul.mubr.bf16.vlgmr.msra.gmra.mrb[0].mxu1 %v541_v47 }
 0x112   : > { %1396 = vmatpush3.bf16.msra.mxu1 %v1478_v46  ;;  %1411 = vmatprep.mubr.msk.bf16.mxu1 %vm1533_vm0, %v1532_v0 }
 0x113   : > { %1397 = vmatprep.subr.bf16.mxu1 %v1532_v0 }
 0x116   : > { %1398 = vmatpush3.bf16.msra.mxu1 %v1482_v48 }
 0x117   : > { %1399 = vmatprep.subr.bf16.mxu1 %v1532_v0 }
 0x11a   : > { %1400 = vmatpush3.bf16.msra.mxu1 %v1486_v49  ;;  %v1507_v49 = vld [vmem:[%s1810_s8] sm:$0xff]  }
 0x11b   : > { %1401 = vmatprep.subr.bf16.mxu1 %v1532_v0 }
 0x11e   : > { %1402 = vmatpush3.bf16.msra.mxu1 %v1490_v50  ;;  %v1508_v50 = vld [vmem:[%s1810_s8 + $0x8] sm:$0xff]  }
 0x11f   : > { %1403 = vmatprep.subr.bf16.mxu1 %v1532_v0 }
 0x122   : > { %1404 = vmatpush3.bf16.msra.mxu1 %v1494_v51  ;;  %v1509_v51 = vld [vmem:[%s1810_s8 + $0x10] sm:$0xff]  }
 0x123   : > { %1405 = vmatprep.subr.bf16.mxu1 %v1532_v0 }
 0x126   : > { %1406 = vmatpush3.bf16.msra.mxu1 %v1498_v54  ;;  %v1512_v54 = vld [vmem:[%s1810_s8 + $0x28] sm:$0xff]  }
 0x127   : > { %1407 = vmatprep.subr.bf16.mxu1 %v1532_v0 }
 0x12a   : > { %1408 = vmatpush3.bf16.msra.mxu1 %v1502_v57 }
 0x12b   : > { %1409 = vmatprep.subr.bf16.mxu1 %v1532_v0 }
 0x12e   : > { %1410 = vmatpush3.bf16.msra.mxu1 %v1506_v60 }
 0x12f   : > { %1415 = vmatprep.subr.bf16.mxu1 %v1532_v0 }
 0x1e4   : > { %v647_v63 = vpop.f32.mrb[0].mxu1 }
 0x1e5   : > { %v648_v1 = vadd.f32 %v1266_v62, %v647_v63  ;;  %v1393_v2 = vpop.f32.mrb[1].mxu1  ;;  %v1514_v63 = vld [vmem:[%s1810_s8 + $0x38] sm:$0xff]  }
 0x1e6   : > { %v650_v3 = vpop.f32.mrb[2].mxu1 }
 0x1e7   : > { %vm655_vm3 = vcmp.gt.f32.partialorder %v648_v1, 0.0  ;;  %v657_v5 = vmul.f32 0.2, %v648_v1  ;;  %v651_v6 = vadd.f32 %v1266_v62, %v650_v3  ;;  %v1394_v7 = vpop.f32.mrb[3].mxu1 }
 0x1e9   : > { %v659_v8 = vsel %vm655_vm3, %v648_v1, %v657_v5  ;;  %vm656_vm4 = vcmp.gt.f32.partialorder %v651_v6, 0.0  ;;  %v658_v9 = vmul.f32 0.2, %v651_v6 }
 0x1ea   : > { %v667_v10 = vmul.f32 %v1275_v4, %v659_v8 }
 0x1eb   : > { %v660_v11 = vsel %vm656_vm4, %v651_v6, %v658_v9 }
 0x1ec   : > { %v668_v12 = vmul.f32 %v1275_v4, %v660_v11  ;;  %v1744_v13 = vadd.f32 %v667_v10, %v539_v44 }
 0x1ee   : > { %v1746_v14 = vadd.f32 %v668_v12, %v540_v45 }
 0x1f0   : > { %v671_v15 = vpack.c.bf16 %v1746_v14, %v1744_v13 }
 0x1f2   : > { %865 = vmatmul.mubr.bf16.vlgmr.msra.gmra.mrb[4].mxu0 %v671_v15  ;;  %1412 = vmatmul.mubr.bf16.vlgmr.msra.gmra.mrb[4].mxu1 %v671_v15 }
 0x1f3   : > { %1417 = vmatprep.mubr.msk.bf16.mxu1 %vm1533_vm0, %v1532_v0  ;;  %1443 = vmatprep.mubr.msk.bf16.mxu0 %vm1533_vm0, %v1532_v0 }
 0x1f4   : > { %1428 = vmatpush3.bf16.msra.mxu0 %v1507_v49 }
 0x1f5   : > { %1429 = vmatprep.subr.bf16.mxu0 %v1532_v0 }
 0x1f8   : > { %1430 = vmatpush3.bf16.msra.mxu0 %v1508_v50 }
 0x1f9   : > { %1431 = vmatprep.subr.bf16.mxu0 %v1532_v0 }
 0x1fc   : > { %1432 = vmatpush3.bf16.msra.mxu0 %v1509_v51 }
 0x1fd   : > { %1433 = vmatprep.subr.bf16.mxu0 %v1532_v0 }
 0x200   : > { %1434 = vmatpush3.bf16.msra.mxu0 %v1510_v52 }
 0x201   : > { %1435 = vmatprep.subr.bf16.mxu0 %v1532_v0 }
 0x204   : > { %1436 = vmatpush3.bf16.msra.mxu0 %v1511_v53 }
 0x205   : > { %1437 = vmatprep.subr.bf16.mxu0 %v1532_v0 }
 0x208   : > { %1438 = vmatpush3.bf16.msra.mxu0 %v1512_v54 }
 0x209   : > { %1439 = vmatprep.subr.bf16.mxu0 %v1532_v0 }
 0x20c   : > { %1440 = vmatpush3.bf16.msra.mxu0 %v1513_v55 }
 0x20d   : > { %1441 = vmatprep.subr.bf16.mxu0 %v1532_v0 }
 0x210   : > { %1442 = vmatpush3.bf16.msra.mxu0 %v1514_v63 }
 0x2c5   : > { %v866_v16 = vpop.f32.mrb[4].mxu0  ;;  %v909_v17 = vpop.f32.mrb[4].mxu1 }
 0x2c6   : > { %v868_v18 = vpop.f32.mrb[5].mxu0  ;;  %v1413_v19 = vpop.f32.mrb[5].mxu1 }
 0x2c7   : > { %v870_v20 = vpop.f32.mrb[6].mxu0  ;;  %v912_v21 = vpop.f32.mrb[6].mxu1 }
 0x2c8   : > { %v916_v22 = vpack.c.bf16 %v870_v20, %v866_v16  ;;  %v918_v23 = vpack.c.bf16 %v912_v21, %v909_v17  ;;  %v872_v24 = vpop.f32.mrb[7].mxu0  ;;  %v1414_v25 = vpop.f32.mrb[7].mxu1 }
 0x2c9   : > { %v917_v26 = vpack.c.bf16 %v872_v24, %v868_v18 }
 0x2cb   : > { %1416 = vmatpush3.bf16.xpose.msra.mxu1 %v917_v26 }
 0x2cc   : > { %1421 = vmatprep.subr.bf16.mxu1 %v1532_v0 }
 0x2d2   : > { %1418 = vmatmul.mubr.bf16.vlgmr.msra.gmra.mrb[8].mxu1 %v916_v22 }
 0x2d3   : > { %1422 = vmatpush3.bf16.msra.mxu1 %v918_v23  ;;  %1423 = vmatprep.mubr.msk.bf16.mxu1 %vm1533_vm0, %v1532_v0 }
 0x3a5   : > { %v953_v29 = vpop.f32.mrb[8].mxu1 }
 0x3a6   : > { %v960_v30 = vmul.f32 0.125, %v953_v29  ;;  %v1419_v31 = vpop.f32.mrb[9].mxu1 }
 0x3a7   : > { %v956_v32 = vpop.f32.mrb[10].mxu1 }
 0x3a8   : > { %v961_v33 = vmul.f32 0.125, %v956_v32  ;;  %v1420_v34 = vpop.f32.mrb[11].mxu1  ;;  %v965_v35 = vsel %vm964_vm5, %v960_v30, -1e+30 }
 0x3a9   : > { %v968_v36 = vsel %vm967_vm6, %v965_v35, -inf }
 0x3aa   : > { %969 = vmax.xlane.f32.xlu0 %v968_v36  ;;  %v966_v37 = vsel %vm964_vm5, %v961_v33, -1e+30 }
 0x3ab   : > { %v971_v38 = vsel %vm967_vm6, %v966_v37, -inf }
 0x3ae   : > { %972 = vmax.xlane.f32.xlu0 %v971_v38 }
 0x437   : > { %v970_v39 = vpop.xlane.xlu0 %969 }
 0x438   : > { %v974_v40 = vsub.f32 %v965_v35, %v970_v39 }
 0x43a   : > { %v976_v41 = vmul.f32 1.442695, %v974_v40 }
 0x43b   : > { %v973_v42 = vpop.xlane.xlu0 %972 }
 0x43c   : > { %1516 = vpow2.f32 %v976_v41  ;;  %v975_v43 = vsub.f32 %v966_v37, %v973_v42 }
 0x43e   : > { %v978_v44 = vmul.f32 1.442695, %v975_v43 }
 0x440   : > { %1518 = vpow2.f32 %v978_v44 }
 0x446   : > { %v1517_v45 = vpop.eup %1516 }
 0x447   : > { %v980_v46 = vsel %vm967_vm6, %v1517_v45, 0.0 }
 0x448   : > { %981 = vadd.xlane.f32.xlu1 %v980_v46 }
 0x44a   : > { %v1519_v47 = vpop.eup %1518 }
 0x44b   : > { %v983_v48 = vsel %vm967_vm6, %v1519_v47, 0.0 }
 0x44c   : > { %984 = vadd.xlane.f32.xlu1 %v983_v48 }
 0x4d5   : > { %v982_v56 = vpop.xlane.xlu1 %981 }
 0x4d6   : > { %1520 = vrcp.f32 %v982_v56 }
 0x4d9   : > { %v985_v57 = vpop.xlane.xlu1 %984 }
 0x4da   : > { %1522 = vrcp.f32 %v985_v57 }
 0x4e0   : > { %v1521_v58 = vpop.eup %1520 }
 0x4e1   : > { %v988_v60 = vmul.f32 %v1521_v58, %v1517_v45 }
 0x4e4   : > { %v1523_v59 = vpop.eup %1522 }
 0x4e5   : > { %v989_v61 = vmul.f32 %v1523_v59, %v1519_v47 }
 0x4e7   : > { %v990_v62 = vpack.c.bf16 %v989_v61, %v988_v60 }
 0x4e9   : > { %1424 = vmatmul.mubr.msk.bf16.vlgmr.msra.gmra.mrb[12].mxu1 %vm967_vm6, %v990_v62 }
 0x5bc   : > { %v1028_v1 = vpop.f32.mrb[12].mxu1 }
 0x5bd   : > { %v1425_v2 = vpop.f32.mrb[13].mxu1 }
 0x5be   : > { %v1031_v0 = vpop.f32.mrb[14].mxu1 }
 0x5bf   : > { %v1035_v3 = vpack.c.bf16 %v1031_v0, %v1028_v1  ;;  %v1426_v4 = vpop.f32.mrb[15].mxu1 }
 0x5c1   : > { %1444 = vmatmul.mubr.bf16.vlgmr.msra.gmra.mrb[8].mxu0 %v1035_v3 }
 0x694   : > { %v1134_v5 = vpop.f32.mrb[8].mxu0 }
 0x695   : > { %v1141_v6 = vadd.f32 %v1134_v5, %v1744_v13  ;;  %v1445_v7 = vpop.f32.mrb[9].mxu0 }
 0x696   : > { %v1137_v8 = vpop.f32.mrb[10].mxu0 }
 0x697   : > { %1143 = vst [vmem:[%s400_s23] sm:$0xff] %v1141_v6  ;;  %v1142_v9 = vadd.f32 %v1137_v8, %v1746_v14  ;;  %v1446_v10 = vpop.f32.mrb[11].mxu0 }
 0x699   : > { %1144 = vst [vmem:[%s400_s23 + $0x8] sm:$0xff] %v1142_v9 }
 0x69a PF: > { %s19_s30 = sadd.s32 1, %s1530_s30  }
 0x69b   : > { %p16_p4 = scmp.ge.s32.totalorder %s19_s30, 4  }
 0x69d   :  { %18 = sbr.rel (!%p16_p4) target bundleno = 1 (0x1), region = 98 }

</bundles_post_ra>
